<compile_context>
chip_gen: v7x
topology: tpu7x:2x2x1
jax: 0.10.0
libtpu: 0.0.40
codegen_flags: <defaults>
</compile_context>

<pallas_src>
import functools

import jax
import jax.numpy as jnp
from jax.experimental import pallas as pl
from jax.experimental.pallas import tpu as pltpu


# --------------------------------- kernel ------------------------------------

def slot_attention_kernel(
    # batched inputs
    feat_ref,          # (Bblk*N, C)
    slots_in_ref,      # (Bblk, K, D)    slot 0 of each batch = bg slot
    bg_ref,            # (Bblk*K, 1)     1.0 on bg rows, 0.0 on fg rows
    blk_ref,           # (Bblk*K, Bblk*N) 1.0 on own-batch blocks (block-diag mask)
    # packed weights (full-array blocks)
    ln_feat_ref,       # (2, C)          [gamma; beta] for norm_feat
    wkv_ref,           # (C, 2D)         [wk | wv]
    ln_q_ref,          # (2, Bblk*K, D)  per-slot-row to_q LN gamma/beta
    wq_ref,            # (2D, D)         [wq_bg; wq_fg]
    wih_ref,           # (3, 2D, D)      gate-aligned GRU input weights [r,z,n]
    whh_ref,           # (3, 2D, D)      gate-aligned GRU hidden weights [r,z,n]
    bih_ref,           # (3, Bblk*K, D)  per-slot-row GRU input biases
    bhh_ref,           # (3, Bblk*K, D)  per-slot-row GRU hidden biases
    ln_res_ref,        # (2, Bblk*K, D)  per-slot-row to_res LN gamma/beta
    w1_ref,            # (2D, H)         [w1_bg; w1_fg]
    b1_ref,            # (Bblk*K, H)
    w2_ref,            # (2H, D)         [w2_bg; w2_fg]
    b2_ref,            # (Bblk*K, D)
    # output
    out_ref,           # (Bblk, K, D + N)   [slots | attn] packed, lane-dense
    *, num_slots, slot_dim, seq_len, iters, eps,
):
    f32 = jnp.float32
    D, K, N = slot_dim, num_slots, seq_len
    Bblk = slots_in_ref.shape[0]
    scale32 = (D ** -0.5) * 32.0

    def ln(x, g, b):
        mu = jnp.mean(x, axis=-1, keepdims=True)
        var = jnp.mean((x - mu) ** 2, axis=-1, keepdims=True)
        return (x - mu) * jax.lax.rsqrt(var + 1e-5) * g + b

    # --- tiny masks: built once per grid step, outside the iteration loop ---
    is_bg = bg_ref[...]                       # (BK, 1) f32
    is_fg = 1.0 - is_bg
    bg_bool = is_bg > 0.5                     # (BK, 1) bool

    if Bblk > 1:
        blk = blk_ref[...]                    # (BK, BN)
        neg_mask = (blk - 1.0) * 1e30         # 0 on own blocks, -1e30 off-block
        eps_add = eps * blk                   # +eps only on own-batch blocks
    else:
        neg_mask = None
        eps_add = eps

    def masked2(x):
        # (R, F) -> (R, 2F): bg rows hit the bg half of stacked weights, fg rows
        # the fg half, so every per-iteration projection is ONE matmul.
        return jnp.concatenate([x * is_bg, x * is_fg], axis=-1)

    # --- shared k/v projection: one (Bblk*N, C) @ (C, 2D) matmul per step ---
    feat_n = ln(feat_ref[...], ln_feat_ref[0:1, :], ln_feat_ref[1:2, :])
    kv = jnp.dot(feat_n, wkv_ref[...], preferred_element_type=f32)   # (BN, 2D)
    kT = kv[:, 0:D].T                                                # (D, BN), transposed once
    v = kv[:, D:2 * D]                                               # (BN, D)

    # stack slots of the whole batch block into one (Bblk*K, D) slab
    if Bblk == 1:
        slots = slots_in_ref[0]
    else:
        slots = jnp.concatenate([slots_in_ref[b] for b in range(Bblk)], axis=0)

    attn = None
    for _ in range(iters):   # short static unroll; weights re-loaded from refs
                             # at each use so their live ranges stay bounded.
        # fused bg/fg query projection over all Bblk*K slot rows at once
        q = jnp.dot(masked2(ln(slots, ln_q_ref[0], ln_q_ref[1])), wq_ref[...],
                    preferred_element_type=f32)                      # (BK, D)

        # block-diagonal dots: one matmul for the whole batch block
        dots = jnp.dot(q, kT, preferred_element_type=f32) * scale32  # (BK, BN)
        if neg_mask is not None:
            dots = dots + neg_mask

        # joint softmax over the slot axis (off-block entries -> exactly 0)
        m = jnp.max(dots, axis=0, keepdims=True)                     # (1, BN)
        e = jnp.exp(dots - m)
        denom = jnp.sum(e, axis=0, keepdims=True)
        attn = e * pl.reciprocal(denom, approx=True) + eps_add       # (BK, BN)

        # per-group renormalization: DIRECT masked sums (no total-minus-bg
        # cancellation) + exact divide -> safe when one slot takes ~all mass.
        bg_sum = jnp.sum(attn * is_bg, axis=0, keepdims=True)        # (1, BN)
        fg_sum = jnp.sum(attn * is_fg, axis=0, keepdims=True)        # (1, BN)
        w = attn / jnp.where(bg_bool, bg_sum, fg_sum)                # (BK, BN)

        upd = jnp.dot(w, v, preferred_element_type=f32)              # (BK, D)

        # fused bg/fg GRU cell; gate-aligned weights -> three lane-aligned
        # matmuls, no cross-lane slicing of (BK, 3D) pre-activations.
        x2 = masked2(upd)
        h2 = masked2(slots)
        gi_r = jnp.dot(x2, wih_ref[0], preferred_element_type=f32) + bih_ref[0]
        gh_r = jnp.dot(h2, whh_ref[0], preferred_element_type=f32) + bhh_ref[0]
        gi_z = jnp.dot(x2, wih_ref[1], preferred_element_type=f32) + bih_ref[1]
        gh_z = jnp.dot(h2, whh_ref[1], preferred_element_type=f32) + bhh_ref[1]
        gi_n = jnp.dot(x2, wih_ref[2], preferred_element_type=f32) + bih_ref[2]
        gh_n = jnp.dot(h2, whh_ref[2], preferred_element_type=f32) + bhh_ref[2]
        r = jax.nn.sigmoid(gi_r + gh_r)
        z = jax.nn.sigmoid(gi_z + gh_z)
        n = jnp.tanh(gi_n + r * gh_n)
        s = (1.0 - z) * n + z * slots

        # fused bg/fg residual MLP
        h = ln(s, ln_res_ref[0], ln_res_ref[1])
        h = jnp.maximum(
            jnp.dot(masked2(h), w1_ref[...], preferred_element_type=f32) + b1_ref[...],
            0.0)
        slots = s + jnp.dot(masked2(h), w2_ref[...], preferred_element_type=f32) + b2_ref[...]

    # one lane-dense packed store per batch element: [slots | attn_diag_block]
    for b in range(Bblk):
        out_ref[b] = jnp.concatenate(
            [slots[b * K:(b + 1) * K, :],
             attn[b * K:(b + 1) * K, b * N:(b + 1) * N]], axis=-1)


# ------------------------------ host-side packing ------------------------------

_PACKED_ORDER = ["ln_feat", "wkv", "ln_q", "wq", "wih", "whh", "bih", "bhh",
                 "ln_res", "w1", "b1", "w2", "b2"]


def _pack_params(p, K, Bblk):
    """Pack fg/bg parameters into fused, gate-aligned slabs (bg row/block first)."""
    D = p["wq"].shape[0]

    def per_row(bg, fg):                         # (1,F),(1,F) -> (Bblk*K, F)
        grp = jnp.concatenate([bg, jnp.tile(fg, (K - 1, 1))], axis=0)   # (K, F)
        return jnp.tile(grp, (Bblk, 1))

    def gate_stack(w_bg, w_fg):                  # (D, 3D) each -> (3, 2D, D)
        return jnp.stack([jnp.concatenate([w_bg[:, g * D:(g + 1) * D],
                                           w_fg[:, g * D:(g + 1) * D]], axis=0)
                          for g in range(3)])

    def gate_bias(b_bg, b_fg):                   # (1, 3D) each -> (3, Bblk*K, D)
        return jnp.stack([per_row(b_bg[:, g * D:(g + 1) * D],
                                  b_fg[:, g * D:(g + 1) * D])
                          for g in range(3)])

    return {
        "ln_feat": jnp.concatenate([p["g_feat"], p["b_feat"]], axis=0),
        "wkv": jnp.concatenate([p["wk"], p["wv"]], axis=1),
        "ln_q": jnp.stack([per_row(p["g_qbg"], p["g_q"]),
                           per_row(p["b_qbg"], p["b_q"])]),
        "wq": jnp.concatenate([p["wqbg"], p["wq"]], axis=0),
        "wih": gate_stack(p["wih_bg"], p["wih_fg"]),
        "whh": gate_stack(p["whh_bg"], p["whh_fg"]),
        "bih": gate_bias(p["bih_bg"], p["bih_fg"]),
        "bhh": gate_bias(p["bhh_bg"], p["bhh_fg"]),
        "ln_res": jnp.stack([per_row(p["g_resbg"], p["g_res"]),
                             per_row(p["b_resbg"], p["b_res"])]),
        "w1": jnp.concatenate([p["w1_resbg"], p["w1_res"]], axis=0),
        "b1": per_row(p["b1_resbg"], p["b1_res"]),
        "w2": jnp.concatenate([p["w2_resbg"], p["w2_res"]], axis=0),
        "b2": per_row(p["b2_resbg"], p["b2_res"]),
    }


# -------------------------------- wrapper -------------------------------------

def slot_attention_forward(feat, slot_fg_init, slot_bg_init, params, *,
                           num_slots, slot_dim, iters=3, eps=1e-8,
                           batch_block=None):
    assert iters >= 1, "iters must be >= 1 (attn is produced inside the loop)"
    B, N, C = feat.shape
    K, D = num_slots, slot_dim

    if batch_block is None:
        # Keep >= 2 grid steps when B >= 2 (v7x has 2 TensorCores and the
        # pipeline needs something to double-buffer); otherwise grow toward a
        # ~256-row k/v slab (v6e 256x256 MXU).  VMEM is nowhere near a limit at
        # these sizes (no explicit vmem_limit_bytes needed).
        cap = max(1, min(256 // max(N, 1), B // 2 if B >= 2 else 1))
        batch_block = 1
        for cand in range(1, B + 1):
            if B % cand == 0 and cand <= cap:
                batch_block = cand
    Bblk = batch_block
    assert B % Bblk == 0, "batch_block must divide the batch size"
    BK, BN = Bblk * K, Bblk * N

    slots_init = jnp.concatenate([slot_bg_init, slot_fg_init], axis=1)  # (B,K,D)
    pk = _pack_params(params, K, Bblk)
    weights = [pk[name] for name in _PACKED_ORDER]

    feat2d = feat.reshape(B * N, C)

    # bg-row flags and block-diagonal (own-batch) mask for one grid step
    bg = (jnp.arange(BK) % K == 0).astype(jnp.float32)[:, None]          # (BK, 1)
    blk = (jnp.arange(BK)[:, None] // K
           == jnp.arange(BN)[None, :] // N).astype(jnp.float32)          # (BK, BN)

    def _full(shape):
        nd = len(shape)
        return pl.BlockSpec(tuple(shape), lambda g, _n=nd: (0,) * _n)

    in_specs = ([pl.BlockSpec((Bblk * N, C), lambda g: (g, 0)),
                 pl.BlockSpec((Bblk, K, D), lambda g: (g, 0, 0)),
                 _full(bg.shape), _full(blk.shape)]
                + [_full(w.shape) for w in weights])
    out_specs = pl.BlockSpec((Bblk, K, D + N), lambda g: (g, 0, 0))

    kernel = functools.partial(slot_attention_kernel,
                               num_slots=K, slot_dim=D, seq_len=N,
                               iters=iters, eps=eps)

    packed = pl.pallas_call(
        kernel,
        out_shape=jax.ShapeDtypeStruct((B, K, D + N), jnp.float32),
        grid_spec=pltpu.PrefetchScalarGridSpec(
            num_scalar_prefetch=0,
            grid=(B // Bblk,),
            in_specs=in_specs,
            out_specs=out_specs,
        ),
        compiler_params=pltpu.CompilerParams(
            dimension_semantics=("parallel",)),
    )(feat2d, slots_init, bg, blk, *weights)

    return packed[:, :, :D], packed[:, :, D:]     # slots (B,K,D), attn (B,K,N)


# --------------------------- pure-JAX reference -------------------------------

def reference_forward(feat, slot_fg0, slot_bg0, p, *, num_slots, slot_dim, iters, eps):
    D = slot_dim
    scale = D ** (-0.5)

    def ln(x, g, b):
        mu = x.mean(-1, keepdims=True)
        var = ((x - mu) ** 2).mean(-1, keepdims=True)
        return (x - mu) / jnp.sqrt(var + 1e-5) * g + b

    def gru(x, h, wih, whh, bih, bhh):
        gi = x @ wih + bih
        gh = h @ whh + bhh
        r = jax.nn.sigmoid(gi[..., :D] + gh[..., :D])
        z = jax.nn.sigmoid(gi[..., D:2 * D] + gh[..., D:2 * D])
        n = jnp.tanh(gi[..., 2 * D:] + r * gh[..., 2 * D:])
        return (1 - z) * n + z * h

    def res(x, g, b, w1, b1, w2, b2):
        h = ln(x, g, b)
        return jnp.maximum(h @ w1 + b1, 0.0) @ w2 + b2

    feat_n = ln(feat, p["g_feat"], p["b_feat"])
    k = feat_n @ p["wk"]
    v = feat_n @ p["wv"]
    slot_fg, slot_bg = slot_fg0, slot_bg0
    attn = None
    for _ in range(iters):
        q_fg = ln(slot_fg, p["g_q"], p["b_q"]) @ p["wq"]
        q_bg = ln(slot_bg, p["g_qbg"], p["b_qbg"]) @ p["wqbg"]
        dots_fg = jnp.einsum("bid,bjd->bij", q_fg, k) * scale
        dots_bg = jnp.einsum("bid,bjd->bij", q_bg, k) * scale
        dots = jnp.concatenate([dots_bg, dots_fg], axis=1) * 32.0
        attn = jax.nn.softmax(dots, axis=1) + eps
        attn_bg, attn_fg = attn[:, :1], attn[:, 1:]
        w_bg = attn_bg / attn_bg.sum(1, keepdims=True)
        w_fg = attn_fg / attn_fg.sum(1, keepdims=True)
        upd_bg = jnp.einsum("bjd,bij->bid", v, w_bg)
        upd_fg = jnp.einsum("bjd,bij->bid", v, w_fg)
        s_bg = gru(upd_bg, slot_bg, p["wih_bg"], p["whh_bg"], p["bih_bg"], p["bhh_bg"])
        slot_bg = s_bg + res(s_bg, p["g_resbg"], p["b_resbg"],
                             p["w1_resbg"], p["b1_resbg"], p["w2_resbg"], p["b2_resbg"])
        s_fg = gru(upd_fg, slot_fg, p["wih_fg"], p["whh_fg"], p["bih_fg"], p["bhh_fg"])
        slot_fg = s_fg + res(s_fg, p["g_res"], p["b_res"],
                             p["w1_res"], p["b1_res"], p["w2_res"], p["b2_res"])
    slots = jnp.concatenate([slot_bg, slot_fg], axis=1)
    return slots, attn


# ------------------------------ parameter init ---------------------------------

def init_params(key, in_dim, slot_dim, hidden_dim):
    C, D = in_dim, slot_dim
    H = max(slot_dim, hidden_dim)
    kit = iter(jax.random.split(key, 32))

    def w(shape, s=0.1):
        return (s * jax.random.normal(next(kit), shape)).astype(jnp.float32)

    return {
        "g_feat": jnp.ones((1, C), jnp.float32), "b_feat": jnp.zeros((1, C), jnp.float32),
        "wk": w((C, D)), "wv": w((C, D)),
        "g_q": jnp.ones((1, D), jnp.float32), "b_q": jnp.zeros((1, D), jnp.float32),
        "wq": w((D, D)),
        "g_qbg": jnp.ones((1, D), jnp.float32), "b_qbg": jnp.zeros((1, D), jnp.float32),
        "wqbg": w((D, D)),
        "wih_fg": w((D, 3 * D)), "whh_fg": w((D, 3 * D)),
        "bih_fg": w((1, 3 * D)), "bhh_fg": w((1, 3 * D)),
        "wih_bg": w((D, 3 * D)), "whh_bg": w((D, 3 * D)),
        "bih_bg": w((1, 3 * D)), "bhh_bg": w((1, 3 * D)),
        "g_res": jnp.ones((1, D), jnp.float32), "b_res": jnp.zeros((1, D), jnp.float32),
        "w1_res": w((D, H)), "b1_res": w((1, H)), "w2_res": w((H, D)), "b2_res": w((1, D)),
        "g_resbg": jnp.ones((1, D), jnp.float32), "b_resbg": jnp.zeros((1, D), jnp.float32),
        "w1_resbg": w((D, H)), "b1_resbg": w((1, H)), "w2_resbg": w((H, D)), "b2_resbg": w((1, D)),
    }


# ---------------------------------- main ---------------------------------------

if __name__ == "__main__":
    B, N, C = 2, 64, 64          # batch, sequence (flattened spatial), in_dim
    D = 64                       # slot_dim
    K = 5                        # num_slots (1 bg + 4 fg)
    ITERS = 3
    EPS = 1e-8
    HIDDEN = 128

    root = jax.random.PRNGKey(0)
    k_param, k_feat, k_mu, k_ls, k_mubg, k_lsbg, k_nfg, k_nbg = jax.random.split(root, 8)

    params = init_params(k_param, C, D, HIDDEN)
    feat = jax.random.normal(k_feat, (B, N, C), jnp.float32)

    # slot initialization (torch: mu + exp(logsigma) * randn_like) done host-side.
    slots_mu = 0.5 * jax.random.normal(k_mu, (1, K - 1, D), jnp.float32)
    slots_logsigma = 0.1 * jax.random.normal(k_ls, (1, K - 1, D), jnp.float32)
    slots_mu_bg = 0.5 * jax.random.normal(k_mubg, (1, 1, D), jnp.float32)
    slots_logsigma_bg = 0.1 * jax.random.normal(k_lsbg, (1, 1, D), jnp.float32)

    slot_fg_init = slots_mu + jnp.exp(slots_logsigma) * jax.random.normal(
        k_nfg, (B, K - 1, D), jnp.float32)
    slot_bg_init = slots_mu_bg + jnp.exp(slots_logsigma_bg) * jax.random.normal(
        k_nbg, (B, 1, D), jnp.float32)

    slots, attn = slot_attention_forward(
        feat, slot_fg_init, slot_bg_init, params,
        num_slots=K, slot_dim=D, iters=ITERS, eps=EPS)
    jax.block_until_ready(slots)
    jax.block_until_ready(attn)

    slots_ref, attn_ref = reference_forward(
        feat, slot_fg_init, slot_bg_init, params,
        num_slots=K, slot_dim=D, iters=ITERS, eps=EPS)

    assert slots.shape == (B, K, D) and attn.shape == (B, K, N)
    assert jnp.allclose(slots, slots_ref, atol=5e-2, rtol=5e-2)
    assert jnp.allclose(attn, attn_ref, atol=5e-2, rtol=5e-2)

    print("KERNEL_OK")
</pallas_src>

<mosaic_0001>
module attributes {stable_mosaic.version = 11 : i64} {
  func.func @slot_attention_kernel(%arg0: i32, %arg1: memref<64x64xf32, #tpu.memory_space<vmem>>, %arg2: memref<1x5x64xf32, #tpu.memory_space<vmem>>, %arg3: memref<5x1xf32, #tpu.memory_space<vmem>>, %arg4: memref<5x64xf32, #tpu.memory_space<vmem>>, %arg5: memref<2x64xf32, #tpu.memory_space<vmem>>, %arg6: memref<64x128xf32, #tpu.memory_space<vmem>>, %arg7: memref<2x5x64xf32, #tpu.memory_space<vmem>>, %arg8: memref<128x64xf32, #tpu.memory_space<vmem>>, %arg9: memref<3x128x64xf32, #tpu.memory_space<vmem>>, %arg10: memref<3x128x64xf32, #tpu.memory_space<vmem>>, %arg11: memref<3x5x64xf32, #tpu.memory_space<vmem>>, %arg12: memref<3x5x64xf32, #tpu.memory_space<vmem>>, %arg13: memref<2x5x64xf32, #tpu.memory_space<vmem>>, %arg14: memref<128x128xf32, #tpu.memory_space<vmem>>, %arg15: memref<5x128xf32, #tpu.memory_space<vmem>>, %arg16: memref<256x64xf32, #tpu.memory_space<vmem>>, %arg17: memref<5x64xf32, #tpu.memory_space<vmem>>, %arg18: memref<1x5x128xf32, #tpu.memory_space<vmem>>) attributes {dimension_semantics = [#tpu.dimension_semantics<parallel>], iteration_bounds = array<i64: 2>, scalar_prefetch = 0 : i64, scratch_operands = 0 : i64, tpu.core_type = #tpu.core_type<tc>, window_params = [{transform_indices = @transform_0, window_bounds = array<i64: 64, 64>}, {transform_indices = @transform_1, window_bounds = array<i64: 1, 5, 64>}, {pipeline_mode = #tpu.pipeline_mode<synchronous>, transform_indices = @transform_2, window_bounds = array<i64: 5, 1>}, {pipeline_mode = #tpu.pipeline_mode<synchronous>, transform_indices = @transform_3, window_bounds = array<i64: 5, 64>}, {pipeline_mode = #tpu.pipeline_mode<synchronous>, transform_indices = @transform_4, window_bounds = array<i64: 2, 64>}, {pipeline_mode = #tpu.pipeline_mode<synchronous>, transform_indices = @transform_5, window_bounds = array<i64: 64, 128>}, {pipeline_mode = #tpu.pipeline_mode<synchronous>, transform_indices = @transform_6, window_bounds = array<i64: 2, 5, 64>}, {pipeline_mode = #tpu.pipeline_mode<synchronous>, transform_indices = @transform_7, window_bounds = array<i64: 128, 64>}, {pipeline_mode = #tpu.pipeline_mode<synchronous>, transform_indices = @transform_8, window_bounds = array<i64: 3, 128, 64>}, {pipeline_mode = #tpu.pipeline_mode<synchronous>, transform_indices = @transform_9, window_bounds = array<i64: 3, 128, 64>}, {pipeline_mode = #tpu.pipeline_mode<synchronous>, transform_indices = @transform_10, window_bounds = array<i64: 3, 5, 64>}, {pipeline_mode = #tpu.pipeline_mode<synchronous>, transform_indices = @transform_11, window_bounds = array<i64: 3, 5, 64>}, {pipeline_mode = #tpu.pipeline_mode<synchronous>, transform_indices = @transform_12, window_bounds = array<i64: 2, 5, 64>}, {pipeline_mode = #tpu.pipeline_mode<synchronous>, transform_indices = @transform_13, window_bounds = array<i64: 128, 128>}, {pipeline_mode = #tpu.pipeline_mode<synchronous>, transform_indices = @transform_14, window_bounds = array<i64: 5, 128>}, {pipeline_mode = #tpu.pipeline_mode<synchronous>, transform_indices = @transform_15, window_bounds = array<i64: 256, 64>}, {pipeline_mode = #tpu.pipeline_mode<synchronous>, transform_indices = @transform_16, window_bounds = array<i64: 5, 64>}, {transform_indices = @transform_17, window_bounds = array<i64: 1, 5, 128>}]} {
    %c0 = arith.constant 0 : index
    %c0_0 = arith.constant 0 : index
    %0 = vector.load %arg3[%c0, %c0_0] : memref<5x1xf32, #tpu.memory_space<vmem>>, vector<5x1xf32>
    %cst = arith.constant 1.000000e+00 : f32
    %1 = vector.broadcast %cst : f32 to vector<5x1xf32>
    %2 = arith.subf %1, %0 : vector<5x1xf32>
    %cst_1 = arith.constant 5.000000e-01 : f32
    %3 = vector.broadcast %cst_1 : f32 to vector<5x1xf32>
    %4 = arith.cmpf ogt, %0, %3 : vector<5x1xf32>
    %c0_2 = arith.constant 0 : index
    %c0_3 = arith.constant 0 : index
    %5 = vector.load %arg1[%c0_2, %c0_3] : memref<64x64xf32, #tpu.memory_space<vmem>>, vector<64x64xf32>
    %c0_4 = arith.constant 0 : index
    %c0_5 = arith.constant 0 : index
    %6 = vector.load %arg5[%c0_4, %c0_5] : memref<2x64xf32, #tpu.memory_space<vmem>>, vector<1x64xf32>
    %c1 = arith.constant 1 : index
    %c0_6 = arith.constant 0 : index
    %7 = vector.load %arg5[%c1, %c0_6] : memref<2x64xf32, #tpu.memory_space<vmem>>, vector<1x64xf32>
    %cst_7 = arith.constant dense<0.000000e+00> : vector<64xf32>
    %8 = vector.multi_reduction <add>, %5, %cst_7 [1] : vector<64x64xf32> to vector<64xf32>
    %9 = vector.shape_cast %8 : vector<64xf32> to vector<64x1xf32>
    %cst_8 = arith.constant 6.400000e+01 : f32
    %10 = vector.broadcast %cst_8 : f32 to vector<64x1xf32>
    %11 = arith.divf %9, %10 : vector<64x1xf32>
    %12 = vector.broadcast %11 : vector<64x1xf32> to vector<64x64xf32>
    %13 = arith.subf %5, %12 : vector<64x64xf32>
    %14 = arith.mulf %13, %13 : vector<64x64xf32>
    %cst_9 = arith.constant dense<0.000000e+00> : vector<64xf32>
    %15 = vector.multi_reduction <add>, %14, %cst_9 [1] : vector<64x64xf32> to vector<64xf32>
    %16 = vector.shape_cast %15 : vector<64xf32> to vector<64x1xf32>
    %cst_10 = arith.constant 6.400000e+01 : f32
    %17 = vector.broadcast %cst_10 : f32 to vector<64x1xf32>
    %18 = arith.divf %16, %17 : vector<64x1xf32>
    %19 = vector.broadcast %11 : vector<64x1xf32> to vector<64x64xf32>
    %20 = arith.subf %5, %19 : vector<64x64xf32>
    %cst_11 = arith.constant 9.99999974E-6 : f32
    %21 = vector.broadcast %cst_11 : f32 to vector<64x1xf32>
    %22 = arith.addf %18, %21 : vector<64x1xf32>
    %23 = math.rsqrt %22 : vector<64x1xf32>
    %24 = vector.broadcast %23 : vector<64x1xf32> to vector<64x64xf32>
    %25 = arith.mulf %20, %24 : vector<64x64xf32>
    %26 = vector.broadcast %6 : vector<1x64xf32> to vector<64x64xf32>
    %27 = arith.mulf %25, %26 : vector<64x64xf32>
    %28 = vector.broadcast %7 : vector<1x64xf32> to vector<64x64xf32>
    %29 = arith.addf %27, %28 : vector<64x64xf32>
    %c0_12 = arith.constant 0 : index
    %c0_13 = arith.constant 0 : index
    %30 = vector.load %arg6[%c0_12, %c0_13] : memref<64x128xf32, #tpu.memory_space<vmem>>, vector<64x128xf32>
    %cst_14 = arith.constant dense<0.000000e+00> : vector<64x128xf32>
    %31 = tpu.matmul %29, %30, %cst_14 {dimension_numbers = #tpu.dot_dimension_numbers<[1], [0], [0], [1], [0, 0, 1, 1], [], []>} : vector<64x64xf32>, vector<64x128xf32>, vector<64x128xf32> -> vector<64x128xf32>
    %32 = vector.extract_strided_slice %31 {offsets = [0, 0], sizes = [64, 64], strides = [1, 1]} : vector<64x128xf32> to vector<64x64xf32>
    %33 = tpu.transpose %32, [1, 0] : vector<64x64xf32> -> vector<64x64xf32>
    %34 = vector.extract_strided_slice %31 {offsets = [0, 64], sizes = [64, 64], strides = [1, 1]} : vector<64x128xf32> to vector<64x64xf32>
    %c0_15 = arith.constant 0 : index
    %c0_16 = arith.constant 0 : index
    %c0_17 = arith.constant 0 : index
    %35 = vector.load %arg2[%c0_15, %c0_16, %c0_17] : memref<1x5x64xf32, #tpu.memory_space<vmem>>, vector<1x5x64xf32>
    %36 = vector.shape_cast %35 : vector<1x5x64xf32> to vector<5x64xf32>
    %c0_18 = arith.constant 0 : index
    %c0_19 = arith.constant 0 : index
    %c0_20 = arith.constant 0 : index
    %37 = vector.load %arg7[%c0_18, %c0_19, %c0_20] : memref<2x5x64xf32, #tpu.memory_space<vmem>>, vector<1x5x64xf32>
    %38 = vector.shape_cast %37 : vector<1x5x64xf32> to vector<5x64xf32>
    %c1_21 = arith.constant 1 : index
    %c0_22 = arith.constant 0 : index
    %c0_23 = arith.constant 0 : index
    %39 = vector.load %arg7[%c1_21, %c0_22, %c0_23] : memref<2x5x64xf32, #tpu.memory_space<vmem>>, vector<1x5x64xf32>
    %40 = vector.shape_cast %39 : vector<1x5x64xf32> to vector<5x64xf32>
    %cst_24 = arith.constant dense<0.000000e+00> : vector<5xf32>
    %41 = vector.multi_reduction <add>, %36, %cst_24 [1] : vector<5x64xf32> to vector<5xf32>
    %42 = vector.shape_cast %41 : vector<5xf32> to vector<5x1xf32>
    %cst_25 = arith.constant 6.400000e+01 : f32
    %43 = vector.broadcast %cst_25 : f32 to vector<5x1xf32>
    %44 = arith.divf %42, %43 : vector<5x1xf32>
    %45 = vector.broadcast %44 : vector<5x1xf32> to vector<5x64xf32>
    %46 = arith.subf %36, %45 : vector<5x64xf32>
    %47 = arith.mulf %46, %46 : vector<5x64xf32>
    %cst_26 = arith.constant dense<0.000000e+00> : vector<5xf32>
    %48 = vector.multi_reduction <add>, %47, %cst_26 [1] : vector<5x64xf32> to vector<5xf32>
    %49 = vector.shape_cast %48 : vector<5xf32> to vector<5x1xf32>
    %cst_27 = arith.constant 6.400000e+01 : f32
    %50 = vector.broadcast %cst_27 : f32 to vector<5x1xf32>
    %51 = arith.divf %49, %50 : vector<5x1xf32>
    %52 = vector.broadcast %44 : vector<5x1xf32> to vector<5x64xf32>
    %53 = arith.subf %36, %52 : vector<5x64xf32>
    %cst_28 = arith.constant 9.99999974E-6 : f32
    %54 = vector.broadcast %cst_28 : f32 to vector<5x1xf32>
    %55 = arith.addf %51, %54 : vector<5x1xf32>
    %56 = math.rsqrt %55 : vector<5x1xf32>
    %57 = vector.broadcast %56 : vector<5x1xf32> to vector<5x64xf32>
    %58 = arith.mulf %53, %57 : vector<5x64xf32>
    %59 = arith.mulf %58, %38 : vector<5x64xf32>
    %60 = arith.addf %59, %40 : vector<5x64xf32>
    %61 = vector.broadcast %0 : vector<5x1xf32> to vector<5x64xf32>
    %62 = arith.mulf %60, %61 : vector<5x64xf32>
    %63 = vector.broadcast %2 : vector<5x1xf32> to vector<5x64xf32>
    %64 = arith.mulf %60, %63 : vector<5x64xf32>
    %65 = tpu.concatenate %62, %64 in 1 : vector<5x64xf32>, vector<5x64xf32> -> vector<5x128xf32>
    %c0_29 = arith.constant 0 : index
    %c0_30 = arith.constant 0 : index
    %66 = vector.load %arg8[%c0_29, %c0_30] : memref<128x64xf32, #tpu.memory_space<vmem>>, vector<128x64xf32>
    %cst_31 = arith.constant dense<0.000000e+00> : vector<5x64xf32>
    %67 = tpu.matmul %65, %66, %cst_31 {dimension_numbers = #tpu.dot_dimension_numbers<[1], [0], [0], [1], [0, 0, 1, 1], [], []>} : vector<5x128xf32>, vector<128x64xf32>, vector<5x64xf32> -> vector<5x64xf32>
    %cst_32 = arith.constant dense<0.000000e+00> : vector<5x64xf32>
    %68 = tpu.matmul %67, %33, %cst_32 {dimension_numbers = #tpu.dot_dimension_numbers<[1], [0], [0], [1], [0, 0, 1, 1], [], []>} : vector<5x64xf32>, vector<64x64xf32>, vector<5x64xf32> -> vector<5x64xf32>
    %cst_33 = arith.constant 4.000000e+00 : f32
    %69 = vector.broadcast %cst_33 : f32 to vector<5x64xf32>
    %70 = arith.mulf %68, %69 : vector<5x64xf32>
    %cst_34 = arith.constant dense<0xFF800000> : vector<64xf32>
    %71 = vector.multi_reduction <maximumf>, %70, %cst_34 [0] : vector<5x64xf32> to vector<64xf32>
    %72 = vector.shape_cast %71 : vector<64xf32> to vector<1x64xf32>
    %73 = vector.broadcast %72 : vector<1x64xf32> to vector<5x64xf32>
    %74 = arith.subf %70, %73 : vector<5x64xf32>
    %75 = math.exp %74 : vector<5x64xf32>
    %cst_35 = arith.constant dense<0.000000e+00> : vector<64xf32>
    %76 = vector.multi_reduction <add>, %75, %cst_35 [0] : vector<5x64xf32> to vector<64xf32>
    %77 = vector.shape_cast %76 : vector<64xf32> to vector<1x64xf32>
    %78 = tpu.reciprocal %77 {approx = true} : vector<1x64xf32> -> vector<1x64xf32>
    %79 = vector.broadcast %78 : vector<1x64xf32> to vector<5x64xf32>
    %80 = arith.mulf %75, %79 : vector<5x64xf32>
    %cst_36 = arith.constant 9.99999993E-9 : f32
    %81 = vector.broadcast %cst_36 : f32 to vector<5x64xf32>
    %82 = arith.addf %80, %81 : vector<5x64xf32>
    %83 = vector.broadcast %0 : vector<5x1xf32> to vector<5x64xf32>
    %84 = arith.mulf %82, %83 : vector<5x64xf32>
    %cst_37 = arith.constant dense<0.000000e+00> : vector<64xf32>
    %85 = vector.multi_reduction <add>, %84, %cst_37 [0] : vector<5x64xf32> to vector<64xf32>
    %86 = vector.shape_cast %85 : vector<64xf32> to vector<1x64xf32>
    %87 = vector.broadcast %2 : vector<5x1xf32> to vector<5x64xf32>
    %88 = arith.mulf %82, %87 : vector<5x64xf32>
    %cst_38 = arith.constant dense<0.000000e+00> : vector<64xf32>
    %89 = vector.multi_reduction <add>, %88, %cst_38 [0] : vector<5x64xf32> to vector<64xf32>
    %90 = vector.shape_cast %89 : vector<64xf32> to vector<1x64xf32>
    %91 = vector.shape_cast %4 : vector<5x1xi1> to vector<5x1xi1>
    %92 = vector.broadcast %91 : vector<5x1xi1> to vector<5x64xi1>
    %93 = vector.shape_cast %86 : vector<1x64xf32> to vector<1x64xf32>
    %94 = vector.broadcast %93 : vector<1x64xf32> to vector<5x64xf32>
    %95 = vector.shape_cast %90 : vector<1x64xf32> to vector<1x64xf32>
    %96 = vector.broadcast %95 : vector<1x64xf32> to vector<5x64xf32>
    %97 = arith.select %92, %94, %96 : vector<5x64xi1>, vector<5x64xf32>
    %98 = arith.divf %82, %97 : vector<5x64xf32>
    %cst_39 = arith.constant dense<0.000000e+00> : vector<5x64xf32>
    %99 = tpu.matmul %98, %34, %cst_39 {dimension_numbers = #tpu.dot_dimension_numbers<[1], [0], [0], [1], [0, 0, 1, 1], [], []>} : vector<5x64xf32>, vector<64x64xf32>, vector<5x64xf32> -> vector<5x64xf32>
    %100 = vector.broadcast %0 : vector<5x1xf32> to vector<5x64xf32>
    %101 = arith.mulf %99, %100 : vector<5x64xf32>
    %102 = vector.broadcast %2 : vector<5x1xf32> to vector<5x64xf32>
    %103 = arith.mulf %99, %102 : vector<5x64xf32>
    %104 = tpu.concatenate %101, %103 in 1 : vector<5x64xf32>, vector<5x64xf32> -> vector<5x128xf32>
    %105 = vector.broadcast %0 : vector<5x1xf32> to vector<5x64xf32>
    %106 = arith.mulf %36, %105 : vector<5x64xf32>
    %107 = vector.broadcast %2 : vector<5x1xf32> to vector<5x64xf32>
    %108 = arith.mulf %36, %107 : vector<5x64xf32>
    %109 = tpu.concatenate %106, %108 in 1 : vector<5x64xf32>, vector<5x64xf32> -> vector<5x128xf32>
    %c0_40 = arith.constant 0 : index
    %c0_41 = arith.constant 0 : index
    %c0_42 = arith.constant 0 : index
    %110 = vector.load %arg9[%c0_40, %c0_41, %c0_42] : memref<3x128x64xf32, #tpu.memory_space<vmem>>, vector<1x128x64xf32>
    %111 = vector.shape_cast %110 : vector<1x128x64xf32> to vector<128x64xf32>
    %cst_43 = arith.constant dense<0.000000e+00> : vector<5x64xf32>
    %112 = tpu.matmul %104, %111, %cst_43 {dimension_numbers = #tpu.dot_dimension_numbers<[1], [0], [0], [1], [0, 0, 1, 1], [], []>} : vector<5x128xf32>, vector<128x64xf32>, vector<5x64xf32> -> vector<5x64xf32>
    %c0_44 = arith.constant 0 : index
    %c0_45 = arith.constant 0 : index
    %c0_46 = arith.constant 0 : index
    %113 = vector.load %arg11[%c0_44, %c0_45, %c0_46] : memref<3x5x64xf32, #tpu.memory_space<vmem>>, vector<1x5x64xf32>
    %114 = vector.shape_cast %113 : vector<1x5x64xf32> to vector<5x64xf32>
    %115 = arith.addf %112, %114 : vector<5x64xf32>
    %c0_47 = arith.constant 0 : index
    %c0_48 = arith.constant 0 : index
    %c0_49 = arith.constant 0 : index
    %116 = vector.load %arg10[%c0_47, %c0_48, %c0_49] : memref<3x128x64xf32, #tpu.memory_space<vmem>>, vector<1x128x64xf32>
    %117 = vector.shape_cast %116 : vector<1x128x64xf32> to vector<128x64xf32>
    %cst_50 = arith.constant dense<0.000000e+00> : vector<5x64xf32>
    %118 = tpu.matmul %109, %117, %cst_50 {dimension_numbers = #tpu.dot_dimension_numbers<[1], [0], [0], [1], [0, 0, 1, 1], [], []>} : vector<5x128xf32>, vector<128x64xf32>, vector<5x64xf32> -> vector<5x64xf32>
    %c0_51 = arith.constant 0 : index
    %c0_52 = arith.constant 0 : index
    %c0_53 = arith.constant 0 : index
    %119 = vector.load %arg12[%c0_51, %c0_52, %c0_53] : memref<3x5x64xf32, #tpu.memory_space<vmem>>, vector<1x5x64xf32>
    %120 = vector.shape_cast %119 : vector<1x5x64xf32> to vector<5x64xf32>
    %121 = arith.addf %118, %120 : vector<5x64xf32>
    %c1_54 = arith.constant 1 : index
    %c0_55 = arith.constant 0 : index
    %c0_56 = arith.constant 0 : index
    %122 = vector.load %arg9[%c1_54, %c0_55, %c0_56] : memref<3x128x64xf32, #tpu.memory_space<vmem>>, vector<1x128x64xf32>
    %123 = vector.shape_cast %122 : vector<1x128x64xf32> to vector<128x64xf32>
    %cst_57 = arith.constant dense<0.000000e+00> : vector<5x64xf32>
    %124 = tpu.matmul %104, %123, %cst_57 {dimension_numbers = #tpu.dot_dimension_numbers<[1], [0], [0], [1], [0, 0, 1, 1], [], []>} : vector<5x128xf32>, vector<128x64xf32>, vector<5x64xf32> -> vector<5x64xf32>
    %c1_58 = arith.constant 1 : index
    %c0_59 = arith.constant 0 : index
    %c0_60 = arith.constant 0 : index
    %125 = vector.load %arg11[%c1_58, %c0_59, %c0_60] : memref<3x5x64xf32, #tpu.memory_space<vmem>>, vector<1x5x64xf32>
    %126 = vector.shape_cast %125 : vector<1x5x64xf32> to vector<5x64xf32>
    %127 = arith.addf %124, %126 : vector<5x64xf32>
    %c1_61 = arith.constant 1 : index
    %c0_62 = arith.constant 0 : index
    %c0_63 = arith.constant 0 : index
    %128 = vector.load %arg10[%c1_61, %c0_62, %c0_63] : memref<3x128x64xf32, #tpu.memory_space<vmem>>, vector<1x128x64xf32>
    %129 = vector.shape_cast %128 : vector<1x128x64xf32> to vector<128x64xf32>
    %cst_64 = arith.constant dense<0.000000e+00> : vector<5x64xf32>
    %130 = tpu.matmul %109, %129, %cst_64 {dimension_numbers = #tpu.dot_dimension_numbers<[1], [0], [0], [1], [0, 0, 1, 1], [], []>} : vector<5x128xf32>, vector<128x64xf32>, vector<5x64xf32> -> vector<5x64xf32>
    %c1_65 = arith.constant 1 : index
    %c0_66 = arith.constant 0 : index
    %c0_67 = arith.constant 0 : index
    %131 = vector.load %arg12[%c1_65, %c0_66, %c0_67] : memref<3x5x64xf32, #tpu.memory_space<vmem>>, vector<1x5x64xf32>
    %132 = vector.shape_cast %131 : vector<1x5x64xf32> to vector<5x64xf32>
    %133 = arith.addf %130, %132 : vector<5x64xf32>
    %c2 = arith.constant 2 : index
    %c0_68 = arith.constant 0 : index
    %c0_69 = arith.constant 0 : index
    %134 = vector.load %arg9[%c2, %c0_68, %c0_69] : memref<3x128x64xf32, #tpu.memory_space<vmem>>, vector<1x128x64xf32>
    %135 = vector.shape_cast %134 : vector<1x128x64xf32> to vector<128x64xf32>
    %cst_70 = arith.constant dense<0.000000e+00> : vector<5x64xf32>
    %136 = tpu.matmul %104, %135, %cst_70 {dimension_numbers = #tpu.dot_dimension_numbers<[1], [0], [0], [1], [0, 0, 1, 1], [], []>} : vector<5x128xf32>, vector<128x64xf32>, vector<5x64xf32> -> vector<5x64xf32>
    %c2_71 = arith.constant 2 : index
    %c0_72 = arith.constant 0 : index
    %c0_73 = arith.constant 0 : index
    %137 = vector.load %arg11[%c2_71, %c0_72, %c0_73] : memref<3x5x64xf32, #tpu.memory_space<vmem>>, vector<1x5x64xf32>
    %138 = vector.shape_cast %137 : vector<1x5x64xf32> to vector<5x64xf32>
    %139 = arith.addf %136, %138 : vector<5x64xf32>
    %c2_74 = arith.constant 2 : index
    %c0_75 = arith.constant 0 : index
    %c0_76 = arith.constant 0 : index
    %140 = vector.load %arg10[%c2_74, %c0_75, %c0_76] : memref<3x128x64xf32, #tpu.memory_space<vmem>>, vector<1x128x64xf32>
    %141 = vector.shape_cast %140 : vector<1x128x64xf32> to vector<128x64xf32>
    %cst_77 = arith.constant dense<0.000000e+00> : vector<5x64xf32>
    %142 = tpu.matmul %109, %141, %cst_77 {dimension_numbers = #tpu.dot_dimension_numbers<[1], [0], [0], [1], [0, 0, 1, 1], [], []>} : vector<5x128xf32>, vector<128x64xf32>, vector<5x64xf32> -> vector<5x64xf32>
    %c2_78 = arith.constant 2 : index
    %c0_79 = arith.constant 0 : index
    %c0_80 = arith.constant 0 : index
    %143 = vector.load %arg12[%c2_78, %c0_79, %c0_80] : memref<3x5x64xf32, #tpu.memory_space<vmem>>, vector<1x5x64xf32>
    %144 = vector.shape_cast %143 : vector<1x5x64xf32> to vector<5x64xf32>
    %145 = arith.addf %142, %144 : vector<5x64xf32>
    %146 = arith.addf %115, %121 : vector<5x64xf32>
    %147 = arith.negf %146 : vector<5x64xf32>
    %148 = math.exp %147 : vector<5x64xf32>
    %cst_81 = arith.constant 1.000000e+00 : f32
    %149 = vector.broadcast %cst_81 : f32 to vector<5x64xf32>
    %150 = arith.addf %149, %148 : vector<5x64xf32>
    %151 = arith.divf %149, %150 : vector<5x64xf32>
    %152 = arith.addf %127, %133 : vector<5x64xf32>
    %153 = arith.negf %152 : vector<5x64xf32>
    %154 = math.exp %153 : vector<5x64xf32>
    %cst_82 = arith.constant 1.000000e+00 : f32
    %155 = vector.broadcast %cst_82 : f32 to vector<5x64xf32>
    %156 = arith.addf %155, %154 : vector<5x64xf32>
    %157 = arith.divf %155, %156 : vector<5x64xf32>
    %158 = arith.mulf %151, %145 : vector<5x64xf32>
    %159 = arith.addf %139, %158 : vector<5x64xf32>
    %160 = math.tanh %159 : vector<5x64xf32>
    %cst_83 = arith.constant 1.000000e+00 : f32
    %161 = vector.broadcast %cst_83 : f32 to vector<5x64xf32>
    %162 = arith.subf %161, %157 : vector<5x64xf32>
    %163 = arith.mulf %162, %160 : vector<5x64xf32>
    %164 = arith.mulf %157, %36 : vector<5x64xf32>
    %165 = arith.addf %163, %164 : vector<5x64xf32>
    %c0_84 = arith.constant 0 : index
    %c0_85 = arith.constant 0 : index
    %c0_86 = arith.constant 0 : index
    %166 = vector.load %arg13[%c0_84, %c0_85, %c0_86] : memref<2x5x64xf32, #tpu.memory_space<vmem>>, vector<1x5x64xf32>
    %167 = vector.shape_cast %166 : vector<1x5x64xf32> to vector<5x64xf32>
    %c1_87 = arith.constant 1 : index
    %c0_88 = arith.constant 0 : index
    %c0_89 = arith.constant 0 : index
    %168 = vector.load %arg13[%c1_87, %c0_88, %c0_89] : memref<2x5x64xf32, #tpu.memory_space<vmem>>, vector<1x5x64xf32>
    %169 = vector.shape_cast %168 : vector<1x5x64xf32> to vector<5x64xf32>
    %cst_90 = arith.constant dense<0.000000e+00> : vector<5xf32>
    %170 = vector.multi_reduction <add>, %165, %cst_90 [1] : vector<5x64xf32> to vector<5xf32>
    %171 = vector.shape_cast %170 : vector<5xf32> to vector<5x1xf32>
    %cst_91 = arith.constant 6.400000e+01 : f32
    %172 = vector.broadcast %cst_91 : f32 to vector<5x1xf32>
    %173 = arith.divf %171, %172 : vector<5x1xf32>
    %174 = vector.broadcast %173 : vector<5x1xf32> to vector<5x64xf32>
    %175 = arith.subf %165, %174 : vector<5x64xf32>
    %176 = arith.mulf %175, %175 : vector<5x64xf32>
    %cst_92 = arith.constant dense<0.000000e+00> : vector<5xf32>
    %177 = vector.multi_reduction <add>, %176, %cst_92 [1] : vector<5x64xf32> to vector<5xf32>
    %178 = vector.shape_cast %177 : vector<5xf32> to vector<5x1xf32>
    %cst_93 = arith.constant 6.400000e+01 : f32
    %179 = vector.broadcast %cst_93 : f32 to vector<5x1xf32>
    %180 = arith.divf %178, %179 : vector<5x1xf32>
    %181 = vector.broadcast %173 : vector<5x1xf32> to vector<5x64xf32>
    %182 = arith.subf %165, %181 : vector<5x64xf32>
    %cst_94 = arith.constant 9.99999974E-6 : f32
    %183 = vector.broadcast %cst_94 : f32 to vector<5x1xf32>
    %184 = arith.addf %180, %183 : vector<5x1xf32>
    %185 = math.rsqrt %184 : vector<5x1xf32>
    %186 = vector.broadcast %185 : vector<5x1xf32> to vector<5x64xf32>
    %187 = arith.mulf %182, %186 : vector<5x64xf32>
    %188 = arith.mulf %187, %167 : vector<5x64xf32>
    %189 = arith.addf %188, %169 : vector<5x64xf32>
    %190 = vector.broadcast %0 : vector<5x1xf32> to vector<5x64xf32>
    %191 = arith.mulf %189, %190 : vector<5x64xf32>
    %192 = vector.broadcast %2 : vector<5x1xf32> to vector<5x64xf32>
    %193 = arith.mulf %189, %192 : vector<5x64xf32>
    %194 = tpu.concatenate %191, %193 in 1 : vector<5x64xf32>, vector<5x64xf32> -> vector<5x128xf32>
    %c0_95 = arith.constant 0 : index
    %c0_96 = arith.constant 0 : index
    %195 = vector.load %arg14[%c0_95, %c0_96] : memref<128x128xf32, #tpu.memory_space<vmem>>, vector<128x128xf32>
    %cst_97 = arith.constant dense<0.000000e+00> : vector<5x128xf32>
    %196 = tpu.matmul %194, %195, %cst_97 {dimension_numbers = #tpu.dot_dimension_numbers<[1], [0], [0], [1], [0, 0, 1, 1], [], []>} : vector<5x128xf32>, vector<128x128xf32>, vector<5x128xf32> -> vector<5x128xf32>
    %c0_98 = arith.constant 0 : index
    %c0_99 = arith.constant 0 : index
    %197 = vector.load %arg15[%c0_98, %c0_99] : memref<5x128xf32, #tpu.memory_space<vmem>>, vector<5x128xf32>
    %198 = arith.addf %196, %197 : vector<5x128xf32>
    %cst_100 = arith.constant 0.000000e+00 : f32
    %199 = vector.broadcast %cst_100 : f32 to vector<5x128xf32>
    %200 = arith.maximumf %198, %199 : vector<5x128xf32>
    %201 = vector.broadcast %0 : vector<5x1xf32> to vector<5x128xf32>
    %202 = arith.mulf %200, %201 : vector<5x128xf32>
    %203 = vector.broadcast %2 : vector<5x1xf32> to vector<5x128xf32>
    %204 = arith.mulf %200, %203 : vector<5x128xf32>
    %205 = tpu.concatenate %202, %204 in 1 : vector<5x128xf32>, vector<5x128xf32> -> vector<5x256xf32>
    %c0_101 = arith.constant 0 : index
    %c0_102 = arith.constant 0 : index
    %206 = vector.load %arg16[%c0_101, %c0_102] : memref<256x64xf32, #tpu.memory_space<vmem>>, vector<256x64xf32>
    %cst_103 = arith.constant dense<0.000000e+00> : vector<5x64xf32>
    %207 = tpu.matmul %205, %206, %cst_103 {dimension_numbers = #tpu.dot_dimension_numbers<[1], [0], [0], [1], [0, 0, 1, 1], [], []>} : vector<5x256xf32>, vector<256x64xf32>, vector<5x64xf32> -> vector<5x64xf32>
    %208 = arith.addf %165, %207 : vector<5x64xf32>
    %c0_104 = arith.constant 0 : index
    %c0_105 = arith.constant 0 : index
    %209 = vector.load %arg17[%c0_104, %c0_105] : memref<5x64xf32, #tpu.memory_space<vmem>>, vector<5x64xf32>
    %210 = arith.addf %208, %209 : vector<5x64xf32>
    %c0_106 = arith.constant 0 : index
    %c0_107 = arith.constant 0 : index
    %c0_108 = arith.constant 0 : index
    %211 = vector.load %arg7[%c0_106, %c0_107, %c0_108] : memref<2x5x64xf32, #tpu.memory_space<vmem>>, vector<1x5x64xf32>
    %212 = vector.shape_cast %211 : vector<1x5x64xf32> to vector<5x64xf32>
    %c1_109 = arith.constant 1 : index
    %c0_110 = arith.constant 0 : index
    %c0_111 = arith.constant 0 : index
    %213 = vector.load %arg7[%c1_109, %c0_110, %c0_111] : memref<2x5x64xf32, #tpu.memory_space<vmem>>, vector<1x5x64xf32>
    %214 = vector.shape_cast %213 : vector<1x5x64xf32> to vector<5x64xf32>
    %cst_112 = arith.constant dense<0.000000e+00> : vector<5xf32>
    %215 = vector.multi_reduction <add>, %210, %cst_112 [1] : vector<5x64xf32> to vector<5xf32>
    %216 = vector.shape_cast %215 : vector<5xf32> to vector<5x1xf32>
    %cst_113 = arith.constant 6.400000e+01 : f32
    %217 = vector.broadcast %cst_113 : f32 to vector<5x1xf32>
    %218 = arith.divf %216, %217 : vector<5x1xf32>
    %219 = vector.broadcast %218 : vector<5x1xf32> to vector<5x64xf32>
    %220 = arith.subf %210, %219 : vector<5x64xf32>
    %221 = arith.mulf %220, %220 : vector<5x64xf32>
    %cst_114 = arith.constant dense<0.000000e+00> : vector<5xf32>
    %222 = vector.multi_reduction <add>, %221, %cst_114 [1] : vector<5x64xf32> to vector<5xf32>
    %223 = vector.shape_cast %222 : vector<5xf32> to vector<5x1xf32>
    %cst_115 = arith.constant 6.400000e+01 : f32
    %224 = vector.broadcast %cst_115 : f32 to vector<5x1xf32>
    %225 = arith.divf %223, %224 : vector<5x1xf32>
    %226 = vector.broadcast %218 : vector<5x1xf32> to vector<5x64xf32>
    %227 = arith.subf %210, %226 : vector<5x64xf32>
    %cst_116 = arith.constant 9.99999974E-6 : f32
    %228 = vector.broadcast %cst_116 : f32 to vector<5x1xf32>
    %229 = arith.addf %225, %228 : vector<5x1xf32>
    %230 = math.rsqrt %229 : vector<5x1xf32>
    %231 = vector.broadcast %230 : vector<5x1xf32> to vector<5x64xf32>
    %232 = arith.mulf %227, %231 : vector<5x64xf32>
    %233 = arith.mulf %232, %212 : vector<5x64xf32>
    %234 = arith.addf %233, %214 : vector<5x64xf32>
    %235 = vector.broadcast %0 : vector<5x1xf32> to vector<5x64xf32>
    %236 = arith.mulf %234, %235 : vector<5x64xf32>
    %237 = vector.broadcast %2 : vector<5x1xf32> to vector<5x64xf32>
    %238 = arith.mulf %234, %237 : vector<5x64xf32>
    %239 = tpu.concatenate %236, %238 in 1 : vector<5x64xf32>, vector<5x64xf32> -> vector<5x128xf32>
    %c0_117 = arith.constant 0 : index
    %c0_118 = arith.constant 0 : index
    %240 = vector.load %arg8[%c0_117, %c0_118] : memref<128x64xf32, #tpu.memory_space<vmem>>, vector<128x64xf32>
    %cst_119 = arith.constant dense<0.000000e+00> : vector<5x64xf32>
    %241 = tpu.matmul %239, %240, %cst_119 {dimension_numbers = #tpu.dot_dimension_numbers<[1], [0], [0], [1], [0, 0, 1, 1], [], []>} : vector<5x128xf32>, vector<128x64xf32>, vector<5x64xf32> -> vector<5x64xf32>
    %cst_120 = arith.constant dense<0.000000e+00> : vector<5x64xf32>
    %242 = tpu.matmul %241, %33, %cst_120 {dimension_numbers = #tpu.dot_dimension_numbers<[1], [0], [0], [1], [0, 0, 1, 1], [], []>} : vector<5x64xf32>, vector<64x64xf32>, vector<5x64xf32> -> vector<5x64xf32>
    %cst_121 = arith.constant 4.000000e+00 : f32
    %243 = vector.broadcast %cst_121 : f32 to vector<5x64xf32>
    %244 = arith.mulf %242, %243 : vector<5x64xf32>
    %cst_122 = arith.constant dense<0xFF800000> : vector<64xf32>
    %245 = vector.multi_reduction <maximumf>, %244, %cst_122 [0] : vector<5x64xf32> to vector<64xf32>
    %246 = vector.shape_cast %245 : vector<64xf32> to vector<1x64xf32>
    %247 = vector.broadcast %246 : vector<1x64xf32> to vector<5x64xf32>
    %248 = arith.subf %244, %247 : vector<5x64xf32>
    %249 = math.exp %248 : vector<5x64xf32>
    %cst_123 = arith.constant dense<0.000000e+00> : vector<64xf32>
    %250 = vector.multi_reduction <add>, %249, %cst_123 [0] : vector<5x64xf32> to vector<64xf32>
    %251 = vector.shape_cast %250 : vector<64xf32> to vector<1x64xf32>
    %252 = tpu.reciprocal %251 {approx = true} : vector<1x64xf32> -> vector<1x64xf32>
    %253 = vector.broadcast %252 : vector<1x64xf32> to vector<5x64xf32>
    %254 = arith.mulf %249, %253 : vector<5x64xf32>
    %cst_124 = arith.constant 9.99999993E-9 : f32
    %255 = vector.broadcast %cst_124 : f32 to vector<5x64xf32>
    %256 = arith.addf %254, %255 : vector<5x64xf32>
    %257 = vector.broadcast %0 : vector<5x1xf32> to vector<5x64xf32>
    %258 = arith.mulf %256, %257 : vector<5x64xf32>
    %cst_125 = arith.constant dense<0.000000e+00> : vector<64xf32>
    %259 = vector.multi_reduction <add>, %258, %cst_125 [0] : vector<5x64xf32> to vector<64xf32>
    %260 = vector.shape_cast %259 : vector<64xf32> to vector<1x64xf32>
    %261 = vector.broadcast %2 : vector<5x1xf32> to vector<5x64xf32>
    %262 = arith.mulf %256, %261 : vector<5x64xf32>
    %cst_126 = arith.constant dense<0.000000e+00> : vector<64xf32>
    %263 = vector.multi_reduction <add>, %262, %cst_126 [0] : vector<5x64xf32> to vector<64xf32>
    %264 = vector.shape_cast %263 : vector<64xf32> to vector<1x64xf32>
    %265 = vector.shape_cast %4 : vector<5x1xi1> to vector<5x1xi1>
    %266 = vector.broadcast %265 : vector<5x1xi1> to vector<5x64xi1>
    %267 = vector.shape_cast %260 : vector<1x64xf32> to vector<1x64xf32>
    %268 = vector.broadcast %267 : vector<1x64xf32> to vector<5x64xf32>
    %269 = vector.shape_cast %264 : vector<1x64xf32> to vector<1x64xf32>
    %270 = vector.broadcast %269 : vector<1x64xf32> to vector<5x64xf32>
    %271 = arith.select %266, %268, %270 : vector<5x64xi1>, vector<5x64xf32>
    %272 = arith.divf %256, %271 : vector<5x64xf32>
    %cst_127 = arith.constant dense<0.000000e+00> : vector<5x64xf32>
    %273 = tpu.matmul %272, %34, %cst_127 {dimension_numbers = #tpu.dot_dimension_numbers<[1], [0], [0], [1], [0, 0, 1, 1], [], []>} : vector<5x64xf32>, vector<64x64xf32>, vector<5x64xf32> -> vector<5x64xf32>
    %274 = vector.broadcast %0 : vector<5x1xf32> to vector<5x64xf32>
    %275 = arith.mulf %273, %274 : vector<5x64xf32>
    %276 = vector.broadcast %2 : vector<5x1xf32> to vector<5x64xf32>
    %277 = arith.mulf %273, %276 : vector<5x64xf32>
    %278 = tpu.concatenate %275, %277 in 1 : vector<5x64xf32>, vector<5x64xf32> -> vector<5x128xf32>
    %279 = vector.broadcast %0 : vector<5x1xf32> to vector<5x64xf32>
    %280 = arith.mulf %210, %279 : vector<5x64xf32>
    %281 = vector.broadcast %2 : vector<5x1xf32> to vector<5x64xf32>
    %282 = arith.mulf %210, %281 : vector<5x64xf32>
    %283 = tpu.concatenate %280, %282 in 1 : vector<5x64xf32>, vector<5x64xf32> -> vector<5x128xf32>
    %c0_128 = arith.constant 0 : index
    %c0_129 = arith.constant 0 : index
    %c0_130 = arith.constant 0 : index
    %284 = vector.load %arg9[%c0_128, %c0_129, %c0_130] : memref<3x128x64xf32, #tpu.memory_space<vmem>>, vector<1x128x64xf32>
    %285 = vector.shape_cast %284 : vector<1x128x64xf32> to vector<128x64xf32>
    %cst_131 = arith.constant dense<0.000000e+00> : vector<5x64xf32>
    %286 = tpu.matmul %278, %285, %cst_131 {dimension_numbers = #tpu.dot_dimension_numbers<[1], [0], [0], [1], [0, 0, 1, 1], [], []>} : vector<5x128xf32>, vector<128x64xf32>, vector<5x64xf32> -> vector<5x64xf32>
    %c0_132 = arith.constant 0 : index
    %c0_133 = arith.constant 0 : index
    %c0_134 = arith.constant 0 : index
    %287 = vector.load %arg11[%c0_132, %c0_133, %c0_134] : memref<3x5x64xf32, #tpu.memory_space<vmem>>, vector<1x5x64xf32>
    %288 = vector.shape_cast %287 : vector<1x5x64xf32> to vector<5x64xf32>
    %289 = arith.addf %286, %288 : vector<5x64xf32>
    %c0_135 = arith.constant 0 : index
    %c0_136 = arith.constant 0 : index
    %c0_137 = arith.constant 0 : index
    %290 = vector.load %arg10[%c0_135, %c0_136, %c0_137] : memref<3x128x64xf32, #tpu.memory_space<vmem>>, vector<1x128x64xf32>
    %291 = vector.shape_cast %290 : vector<1x128x64xf32> to vector<128x64xf32>
    %cst_138 = arith.constant dense<0.000000e+00> : vector<5x64xf32>
    %292 = tpu.matmul %283, %291, %cst_138 {dimension_numbers = #tpu.dot_dimension_numbers<[1], [0], [0], [1], [0, 0, 1, 1], [], []>} : vector<5x128xf32>, vector<128x64xf32>, vector<5x64xf32> -> vector<5x64xf32>
    %c0_139 = arith.constant 0 : index
    %c0_140 = arith.constant 0 : index
    %c0_141 = arith.constant 0 : index
    %293 = vector.load %arg12[%c0_139, %c0_140, %c0_141] : memref<3x5x64xf32, #tpu.memory_space<vmem>>, vector<1x5x64xf32>
    %294 = vector.shape_cast %293 : vector<1x5x64xf32> to vector<5x64xf32>
    %295 = arith.addf %292, %294 : vector<5x64xf32>
    %c1_142 = arith.constant 1 : index
    %c0_143 = arith.constant 0 : index
    %c0_144 = arith.constant 0 : index
    %296 = vector.load %arg9[%c1_142, %c0_143, %c0_144] : memref<3x128x64xf32, #tpu.memory_space<vmem>>, vector<1x128x64xf32>
    %297 = vector.shape_cast %296 : vector<1x128x64xf32> to vector<128x64xf32>
    %cst_145 = arith.constant dense<0.000000e+00> : vector<5x64xf32>
    %298 = tpu.matmul %278, %297, %cst_145 {dimension_numbers = #tpu.dot_dimension_numbers<[1], [0], [0], [1], [0, 0, 1, 1], [], []>} : vector<5x128xf32>, vector<128x64xf32>, vector<5x64xf32> -> vector<5x64xf32>
    %c1_146 = arith.constant 1 : index
    %c0_147 = arith.constant 0 : index
    %c0_148 = arith.constant 0 : index
    %299 = vector.load %arg11[%c1_146, %c0_147, %c0_148] : memref<3x5x64xf32, #tpu.memory_space<vmem>>, vector<1x5x64xf32>
    %300 = vector.shape_cast %299 : vector<1x5x64xf32> to vector<5x64xf32>
    %301 = arith.addf %298, %300 : vector<5x64xf32>
    %c1_149 = arith.constant 1 : index
    %c0_150 = arith.constant 0 : index
    %c0_151 = arith.constant 0 : index
    %302 = vector.load %arg10[%c1_149, %c0_150, %c0_151] : memref<3x128x64xf32, #tpu.memory_space<vmem>>, vector<1x128x64xf32>
    %303 = vector.shape_cast %302 : vector<1x128x64xf32> to vector<128x64xf32>
    %cst_152 = arith.constant dense<0.000000e+00> : vector<5x64xf32>
    %304 = tpu.matmul %283, %303, %cst_152 {dimension_numbers = #tpu.dot_dimension_numbers<[1], [0], [0], [1], [0, 0, 1, 1], [], []>} : vector<5x128xf32>, vector<128x64xf32>, vector<5x64xf32> -> vector<5x64xf32>
    %c1_153 = arith.constant 1 : index
    %c0_154 = arith.constant 0 : index
    %c0_155 = arith.constant 0 : index
    %305 = vector.load %arg12[%c1_153, %c0_154, %c0_155] : memref<3x5x64xf32, #tpu.memory_space<vmem>>, vector<1x5x64xf32>
    %306 = vector.shape_cast %305 : vector<1x5x64xf32> to vector<5x64xf32>
    %307 = arith.addf %304, %306 : vector<5x64xf32>
    %c2_156 = arith.constant 2 : index
    %c0_157 = arith.constant 0 : index
    %c0_158 = arith.constant 0 : index
    %308 = vector.load %arg9[%c2_156, %c0_157, %c0_158] : memref<3x128x64xf32, #tpu.memory_space<vmem>>, vector<1x128x64xf32>
    %309 = vector.shape_cast %308 : vector<1x128x64xf32> to vector<128x64xf32>
    %cst_159 = arith.constant dense<0.000000e+00> : vector<5x64xf32>
    %310 = tpu.matmul %278, %309, %cst_159 {dimension_numbers = #tpu.dot_dimension_numbers<[1], [0], [0], [1], [0, 0, 1, 1], [], []>} : vector<5x128xf32>, vector<128x64xf32>, vector<5x64xf32> -> vector<5x64xf32>
    %c2_160 = arith.constant 2 : index
    %c0_161 = arith.constant 0 : index
    %c0_162 = arith.constant 0 : index
    %311 = vector.load %arg11[%c2_160, %c0_161, %c0_162] : memref<3x5x64xf32, #tpu.memory_space<vmem>>, vector<1x5x64xf32>
    %312 = vector.shape_cast %311 : vector<1x5x64xf32> to vector<5x64xf32>
    %313 = arith.addf %310, %312 : vector<5x64xf32>
    %c2_163 = arith.constant 2 : index
    %c0_164 = arith.constant 0 : index
    %c0_165 = arith.constant 0 : index
    %314 = vector.load %arg10[%c2_163, %c0_164, %c0_165] : memref<3x128x64xf32, #tpu.memory_space<vmem>>, vector<1x128x64xf32>
    %315 = vector.shape_cast %314 : vector<1x128x64xf32> to vector<128x64xf32>
    %cst_166 = arith.constant dense<0.000000e+00> : vector<5x64xf32>
    %316 = tpu.matmul %283, %315, %cst_166 {dimension_numbers = #tpu.dot_dimension_numbers<[1], [0], [0], [1], [0, 0, 1, 1], [], []>} : vector<5x128xf32>, vector<128x64xf32>, vector<5x64xf32> -> vector<5x64xf32>
    %c2_167 = arith.constant 2 : index
    %c0_168 = arith.constant 0 : index
    %c0_169 = arith.constant 0 : index
    %317 = vector.load %arg12[%c2_167, %c0_168, %c0_169] : memref<3x5x64xf32, #tpu.memory_space<vmem>>, vector<1x5x64xf32>
    %318 = vector.shape_cast %317 : vector<1x5x64xf32> to vector<5x64xf32>
    %319 = arith.addf %316, %318 : vector<5x64xf32>
    %320 = arith.addf %289, %295 : vector<5x64xf32>
    %321 = arith.negf %320 : vector<5x64xf32>
    %322 = math.exp %321 : vector<5x64xf32>
    %cst_170 = arith.constant 1.000000e+00 : f32
    %323 = vector.broadcast %cst_170 : f32 to vector<5x64xf32>
    %324 = arith.addf %323, %322 : vector<5x64xf32>
    %325 = arith.divf %323, %324 : vector<5x64xf32>
    %326 = arith.addf %301, %307 : vector<5x64xf32>
    %327 = arith.negf %326 : vector<5x64xf32>
    %328 = math.exp %327 : vector<5x64xf32>
    %cst_171 = arith.constant 1.000000e+00 : f32
    %329 = vector.broadcast %cst_171 : f32 to vector<5x64xf32>
    %330 = arith.addf %329, %328 : vector<5x64xf32>
    %331 = arith.divf %329, %330 : vector<5x64xf32>
    %332 = arith.mulf %325, %319 : vector<5x64xf32>
    %333 = arith.addf %313, %332 : vector<5x64xf32>
    %334 = math.tanh %333 : vector<5x64xf32>
    %cst_172 = arith.constant 1.000000e+00 : f32
    %335 = vector.broadcast %cst_172 : f32 to vector<5x64xf32>
    %336 = arith.subf %335, %331 : vector<5x64xf32>
    %337 = arith.mulf %336, %334 : vector<5x64xf32>
    %338 = arith.mulf %331, %210 : vector<5x64xf32>
    %339 = arith.addf %337, %338 : vector<5x64xf32>
    %c0_173 = arith.constant 0 : index
    %c0_174 = arith.constant 0 : index
    %c0_175 = arith.constant 0 : index
    %340 = vector.load %arg13[%c0_173, %c0_174, %c0_175] : memref<2x5x64xf32, #tpu.memory_space<vmem>>, vector<1x5x64xf32>
    %341 = vector.shape_cast %340 : vector<1x5x64xf32> to vector<5x64xf32>
    %c1_176 = arith.constant 1 : index
    %c0_177 = arith.constant 0 : index
    %c0_178 = arith.constant 0 : index
    %342 = vector.load %arg13[%c1_176, %c0_177, %c0_178] : memref<2x5x64xf32, #tpu.memory_space<vmem>>, vector<1x5x64xf32>
    %343 = vector.shape_cast %342 : vector<1x5x64xf32> to vector<5x64xf32>
    %cst_179 = arith.constant dense<0.000000e+00> : vector<5xf32>
    %344 = vector.multi_reduction <add>, %339, %cst_179 [1] : vector<5x64xf32> to vector<5xf32>
    %345 = vector.shape_cast %344 : vector<5xf32> to vector<5x1xf32>
    %cst_180 = arith.constant 6.400000e+01 : f32
    %346 = vector.broadcast %cst_180 : f32 to vector<5x1xf32>
    %347 = arith.divf %345, %346 : vector<5x1xf32>
    %348 = vector.broadcast %347 : vector<5x1xf32> to vector<5x64xf32>
    %349 = arith.subf %339, %348 : vector<5x64xf32>
    %350 = arith.mulf %349, %349 : vector<5x64xf32>
    %cst_181 = arith.constant dense<0.000000e+00> : vector<5xf32>
    %351 = vector.multi_reduction <add>, %350, %cst_181 [1] : vector<5x64xf32> to vector<5xf32>
    %352 = vector.shape_cast %351 : vector<5xf32> to vector<5x1xf32>
    %cst_182 = arith.constant 6.400000e+01 : f32
    %353 = vector.broadcast %cst_182 : f32 to vector<5x1xf32>
    %354 = arith.divf %352, %353 : vector<5x1xf32>
    %355 = vector.broadcast %347 : vector<5x1xf32> to vector<5x64xf32>
    %356 = arith.subf %339, %355 : vector<5x64xf32>
    %cst_183 = arith.constant 9.99999974E-6 : f32
    %357 = vector.broadcast %cst_183 : f32 to vector<5x1xf32>
    %358 = arith.addf %354, %357 : vector<5x1xf32>
    %359 = math.rsqrt %358 : vector<5x1xf32>
    %360 = vector.broadcast %359 : vector<5x1xf32> to vector<5x64xf32>
    %361 = arith.mulf %356, %360 : vector<5x64xf32>
    %362 = arith.mulf %361, %341 : vector<5x64xf32>
    %363 = arith.addf %362, %343 : vector<5x64xf32>
    %364 = vector.broadcast %0 : vector<5x1xf32> to vector<5x64xf32>
    %365 = arith.mulf %363, %364 : vector<5x64xf32>
    %366 = vector.broadcast %2 : vector<5x1xf32> to vector<5x64xf32>
    %367 = arith.mulf %363, %366 : vector<5x64xf32>
    %368 = tpu.concatenate %365, %367 in 1 : vector<5x64xf32>, vector<5x64xf32> -> vector<5x128xf32>
    %c0_184 = arith.constant 0 : index
    %c0_185 = arith.constant 0 : index
    %369 = vector.load %arg14[%c0_184, %c0_185] : memref<128x128xf32, #tpu.memory_space<vmem>>, vector<128x128xf32>
    %cst_186 = arith.constant dense<0.000000e+00> : vector<5x128xf32>
    %370 = tpu.matmul %368, %369, %cst_186 {dimension_numbers = #tpu.dot_dimension_numbers<[1], [0], [0], [1], [0, 0, 1, 1], [], []>} : vector<5x128xf32>, vector<128x128xf32>, vector<5x128xf32> -> vector<5x128xf32>
    %c0_187 = arith.constant 0 : index
    %c0_188 = arith.constant 0 : index
    %371 = vector.load %arg15[%c0_187, %c0_188] : memref<5x128xf32, #tpu.memory_space<vmem>>, vector<5x128xf32>
    %372 = arith.addf %370, %371 : vector<5x128xf32>
    %cst_189 = arith.constant 0.000000e+00 : f32
    %373 = vector.broadcast %cst_189 : f32 to vector<5x128xf32>
    %374 = arith.maximumf %372, %373 : vector<5x128xf32>
    %375 = vector.broadcast %0 : vector<5x1xf32> to vector<5x128xf32>
    %376 = arith.mulf %374, %375 : vector<5x128xf32>
    %377 = vector.broadcast %2 : vector<5x1xf32> to vector<5x128xf32>
    %378 = arith.mulf %374, %377 : vector<5x128xf32>
    %379 = tpu.concatenate %376, %378 in 1 : vector<5x128xf32>, vector<5x128xf32> -> vector<5x256xf32>
    %c0_190 = arith.constant 0 : index
    %c0_191 = arith.constant 0 : index
    %380 = vector.load %arg16[%c0_190, %c0_191] : memref<256x64xf32, #tpu.memory_space<vmem>>, vector<256x64xf32>
    %cst_192 = arith.constant dense<0.000000e+00> : vector<5x64xf32>
    %381 = tpu.matmul %379, %380, %cst_192 {dimension_numbers = #tpu.dot_dimension_numbers<[1], [0], [0], [1], [0, 0, 1, 1], [], []>} : vector<5x256xf32>, vector<256x64xf32>, vector<5x64xf32> -> vector<5x64xf32>
    %382 = arith.addf %339, %381 : vector<5x64xf32>
    %c0_193 = arith.constant 0 : index
    %c0_194 = arith.constant 0 : index
    %383 = vector.load %arg17[%c0_193, %c0_194] : memref<5x64xf32, #tpu.memory_space<vmem>>, vector<5x64xf32>
    %384 = arith.addf %382, %383 : vector<5x64xf32>
    %c0_195 = arith.constant 0 : index
    %c0_196 = arith.constant 0 : index
    %c0_197 = arith.constant 0 : index
    %385 = vector.load %arg7[%c0_195, %c0_196, %c0_197] : memref<2x5x64xf32, #tpu.memory_space<vmem>>, vector<1x5x64xf32>
    %386 = vector.shape_cast %385 : vector<1x5x64xf32> to vector<5x64xf32>
    %c1_198 = arith.constant 1 : index
    %c0_199 = arith.constant 0 : index
    %c0_200 = arith.constant 0 : index
    %387 = vector.load %arg7[%c1_198, %c0_199, %c0_200] : memref<2x5x64xf32, #tpu.memory_space<vmem>>, vector<1x5x64xf32>
    %388 = vector.shape_cast %387 : vector<1x5x64xf32> to vector<5x64xf32>
    %cst_201 = arith.constant dense<0.000000e+00> : vector<5xf32>
    %389 = vector.multi_reduction <add>, %384, %cst_201 [1] : vector<5x64xf32> to vector<5xf32>
    %390 = vector.shape_cast %389 : vector<5xf32> to vector<5x1xf32>
    %cst_202 = arith.constant 6.400000e+01 : f32
    %391 = vector.broadcast %cst_202 : f32 to vector<5x1xf32>
    %392 = arith.divf %390, %391 : vector<5x1xf32>
    %393 = vector.broadcast %392 : vector<5x1xf32> to vector<5x64xf32>
    %394 = arith.subf %384, %393 : vector<5x64xf32>
    %395 = arith.mulf %394, %394 : vector<5x64xf32>
    %cst_203 = arith.constant dense<0.000000e+00> : vector<5xf32>
    %396 = vector.multi_reduction <add>, %395, %cst_203 [1] : vector<5x64xf32> to vector<5xf32>
    %397 = vector.shape_cast %396 : vector<5xf32> to vector<5x1xf32>
    %cst_204 = arith.constant 6.400000e+01 : f32
    %398 = vector.broadcast %cst_204 : f32 to vector<5x1xf32>
    %399 = arith.divf %397, %398 : vector<5x1xf32>
    %400 = vector.broadcast %392 : vector<5x1xf32> to vector<5x64xf32>
    %401 = arith.subf %384, %400 : vector<5x64xf32>
    %cst_205 = arith.constant 9.99999974E-6 : f32
    %402 = vector.broadcast %cst_205 : f32 to vector<5x1xf32>
    %403 = arith.addf %399, %402 : vector<5x1xf32>
    %404 = math.rsqrt %403 : vector<5x1xf32>
    %405 = vector.broadcast %404 : vector<5x1xf32> to vector<5x64xf32>
    %406 = arith.mulf %401, %405 : vector<5x64xf32>
    %407 = arith.mulf %406, %386 : vector<5x64xf32>
    %408 = arith.addf %407, %388 : vector<5x64xf32>
    %409 = vector.broadcast %0 : vector<5x1xf32> to vector<5x64xf32>
    %410 = arith.mulf %408, %409 : vector<5x64xf32>
    %411 = vector.broadcast %2 : vector<5x1xf32> to vector<5x64xf32>
    %412 = arith.mulf %408, %411 : vector<5x64xf32>
    %413 = tpu.concatenate %410, %412 in 1 : vector<5x64xf32>, vector<5x64xf32> -> vector<5x128xf32>
    %c0_206 = arith.constant 0 : index
    %c0_207 = arith.constant 0 : index
    %414 = vector.load %arg8[%c0_206, %c0_207] : memref<128x64xf32, #tpu.memory_space<vmem>>, vector<128x64xf32>
    %cst_208 = arith.constant dense<0.000000e+00> : vector<5x64xf32>
    %415 = tpu.matmul %413, %414, %cst_208 {dimension_numbers = #tpu.dot_dimension_numbers<[1], [0], [0], [1], [0, 0, 1, 1], [], []>} : vector<5x128xf32>, vector<128x64xf32>, vector<5x64xf32> -> vector<5x64xf32>
    %cst_209 = arith.constant dense<0.000000e+00> : vector<5x64xf32>
    %416 = tpu.matmul %415, %33, %cst_209 {dimension_numbers = #tpu.dot_dimension_numbers<[1], [0], [0], [1], [0, 0, 1, 1], [], []>} : vector<5x64xf32>, vector<64x64xf32>, vector<5x64xf32> -> vector<5x64xf32>
    %cst_210 = arith.constant 4.000000e+00 : f32
    %417 = vector.broadcast %cst_210 : f32 to vector<5x64xf32>
    %418 = arith.mulf %416, %417 : vector<5x64xf32>
    %cst_211 = arith.constant dense<0xFF800000> : vector<64xf32>
    %419 = vector.multi_reduction <maximumf>, %418, %cst_211 [0] : vector<5x64xf32> to vector<64xf32>
    %420 = vector.shape_cast %419 : vector<64xf32> to vector<1x64xf32>
    %421 = vector.broadcast %420 : vector<1x64xf32> to vector<5x64xf32>
    %422 = arith.subf %418, %421 : vector<5x64xf32>
    %423 = math.exp %422 : vector<5x64xf32>
    %cst_212 = arith.constant dense<0.000000e+00> : vector<64xf32>
    %424 = vector.multi_reduction <add>, %423, %cst_212 [0] : vector<5x64xf32> to vector<64xf32>
    %425 = vector.shape_cast %424 : vector<64xf32> to vector<1x64xf32>
    %426 = tpu.reciprocal %425 {approx = true} : vector<1x64xf32> -> vector<1x64xf32>
    %427 = vector.broadcast %426 : vector<1x64xf32> to vector<5x64xf32>
    %428 = arith.mulf %423, %427 : vector<5x64xf32>
    %cst_213 = arith.constant 9.99999993E-9 : f32
    %429 = vector.broadcast %cst_213 : f32 to vector<5x64xf32>
    %430 = arith.addf %428, %429 : vector<5x64xf32>
    %431 = vector.broadcast %0 : vector<5x1xf32> to vector<5x64xf32>
    %432 = arith.mulf %430, %431 : vector<5x64xf32>
    %cst_214 = arith.constant dense<0.000000e+00> : vector<64xf32>
    %433 = vector.multi_reduction <add>, %432, %cst_214 [0] : vector<5x64xf32> to vector<64xf32>
    %434 = vector.shape_cast %433 : vector<64xf32> to vector<1x64xf32>
    %435 = vector.broadcast %2 : vector<5x1xf32> to vector<5x64xf32>
    %436 = arith.mulf %430, %435 : vector<5x64xf32>
    %cst_215 = arith.constant dense<0.000000e+00> : vector<64xf32>
    %437 = vector.multi_reduction <add>, %436, %cst_215 [0] : vector<5x64xf32> to vector<64xf32>
    %438 = vector.shape_cast %437 : vector<64xf32> to vector<1x64xf32>
    %439 = vector.shape_cast %4 : vector<5x1xi1> to vector<5x1xi1>
    %440 = vector.broadcast %439 : vector<5x1xi1> to vector<5x64xi1>
    %441 = vector.shape_cast %434 : vector<1x64xf32> to vector<1x64xf32>
    %442 = vector.broadcast %441 : vector<1x64xf32> to vector<5x64xf32>
    %443 = vector.shape_cast %438 : vector<1x64xf32> to vector<1x64xf32>
    %444 = vector.broadcast %443 : vector<1x64xf32> to vector<5x64xf32>
    %445 = arith.select %440, %442, %444 : vector<5x64xi1>, vector<5x64xf32>
    %446 = arith.divf %430, %445 : vector<5x64xf32>
    %cst_216 = arith.constant dense<0.000000e+00> : vector<5x64xf32>
    %447 = tpu.matmul %446, %34, %cst_216 {dimension_numbers = #tpu.dot_dimension_numbers<[1], [0], [0], [1], [0, 0, 1, 1], [], []>} : vector<5x64xf32>, vector<64x64xf32>, vector<5x64xf32> -> vector<5x64xf32>
    %448 = vector.broadcast %0 : vector<5x1xf32> to vector<5x64xf32>
    %449 = arith.mulf %447, %448 : vector<5x64xf32>
    %450 = vector.broadcast %2 : vector<5x1xf32> to vector<5x64xf32>
    %451 = arith.mulf %447, %450 : vector<5x64xf32>
    %452 = tpu.concatenate %449, %451 in 1 : vector<5x64xf32>, vector<5x64xf32> -> vector<5x128xf32>
    %453 = vector.broadcast %0 : vector<5x1xf32> to vector<5x64xf32>
    %454 = arith.mulf %384, %453 : vector<5x64xf32>
    %455 = vector.broadcast %2 : vector<5x1xf32> to vector<5x64xf32>
    %456 = arith.mulf %384, %455 : vector<5x64xf32>
    %457 = tpu.concatenate %454, %456 in 1 : vector<5x64xf32>, vector<5x64xf32> -> vector<5x128xf32>
    %c0_217 = arith.constant 0 : index
    %c0_218 = arith.constant 0 : index
    %c0_219 = arith.constant 0 : index
    %458 = vector.load %arg9[%c0_217, %c0_218, %c0_219] : memref<3x128x64xf32, #tpu.memory_space<vmem>>, vector<1x128x64xf32>
    %459 = vector.shape_cast %458 : vector<1x128x64xf32> to vector<128x64xf32>
    %cst_220 = arith.constant dense<0.000000e+00> : vector<5x64xf32>
    %460 = tpu.matmul %452, %459, %cst_220 {dimension_numbers = #tpu.dot_dimension_numbers<[1], [0], [0], [1], [0, 0, 1, 1], [], []>} : vector<5x128xf32>, vector<128x64xf32>, vector<5x64xf32> -> vector<5x64xf32>
    %c0_221 = arith.constant 0 : index
    %c0_222 = arith.constant 0 : index
    %c0_223 = arith.constant 0 : index
    %461 = vector.load %arg11[%c0_221, %c0_222, %c0_223] : memref<3x5x64xf32, #tpu.memory_space<vmem>>, vector<1x5x64xf32>
    %462 = vector.shape_cast %461 : vector<1x5x64xf32> to vector<5x64xf32>
    %463 = arith.addf %460, %462 : vector<5x64xf32>
    %c0_224 = arith.constant 0 : index
    %c0_225 = arith.constant 0 : index
    %c0_226 = arith.constant 0 : index
    %464 = vector.load %arg10[%c0_224, %c0_225, %c0_226] : memref<3x128x64xf32, #tpu.memory_space<vmem>>, vector<1x128x64xf32>
    %465 = vector.shape_cast %464 : vector<1x128x64xf32> to vector<128x64xf32>
    %cst_227 = arith.constant dense<0.000000e+00> : vector<5x64xf32>
    %466 = tpu.matmul %457, %465, %cst_227 {dimension_numbers = #tpu.dot_dimension_numbers<[1], [0], [0], [1], [0, 0, 1, 1], [], []>} : vector<5x128xf32>, vector<128x64xf32>, vector<5x64xf32> -> vector<5x64xf32>
    %c0_228 = arith.constant 0 : index
    %c0_229 = arith.constant 0 : index
    %c0_230 = arith.constant 0 : index
    %467 = vector.load %arg12[%c0_228, %c0_229, %c0_230] : memref<3x5x64xf32, #tpu.memory_space<vmem>>, vector<1x5x64xf32>
    %468 = vector.shape_cast %467 : vector<1x5x64xf32> to vector<5x64xf32>
    %469 = arith.addf %466, %468 : vector<5x64xf32>
    %c1_231 = arith.constant 1 : index
    %c0_232 = arith.constant 0 : index
    %c0_233 = arith.constant 0 : index
    %470 = vector.load %arg9[%c1_231, %c0_232, %c0_233] : memref<3x128x64xf32, #tpu.memory_space<vmem>>, vector<1x128x64xf32>
    %471 = vector.shape_cast %470 : vector<1x128x64xf32> to vector<128x64xf32>
    %cst_234 = arith.constant dense<0.000000e+00> : vector<5x64xf32>
    %472 = tpu.matmul %452, %471, %cst_234 {dimension_numbers = #tpu.dot_dimension_numbers<[1], [0], [0], [1], [0, 0, 1, 1], [], []>} : vector<5x128xf32>, vector<128x64xf32>, vector<5x64xf32> -> vector<5x64xf32>
    %c1_235 = arith.constant 1 : index
    %c0_236 = arith.constant 0 : index
    %c0_237 = arith.constant 0 : index
    %473 = vector.load %arg11[%c1_235, %c0_236, %c0_237] : memref<3x5x64xf32, #tpu.memory_space<vmem>>, vector<1x5x64xf32>
    %474 = vector.shape_cast %473 : vector<1x5x64xf32> to vector<5x64xf32>
    %475 = arith.addf %472, %474 : vector<5x64xf32>
    %c1_238 = arith.constant 1 : index
    %c0_239 = arith.constant 0 : index
    %c0_240 = arith.constant 0 : index
    %476 = vector.load %arg10[%c1_238, %c0_239, %c0_240] : memref<3x128x64xf32, #tpu.memory_space<vmem>>, vector<1x128x64xf32>
    %477 = vector.shape_cast %476 : vector<1x128x64xf32> to vector<128x64xf32>
    %cst_241 = arith.constant dense<0.000000e+00> : vector<5x64xf32>
    %478 = tpu.matmul %457, %477, %cst_241 {dimension_numbers = #tpu.dot_dimension_numbers<[1], [0], [0], [1], [0, 0, 1, 1], [], []>} : vector<5x128xf32>, vector<128x64xf32>, vector<5x64xf32> -> vector<5x64xf32>
    %c1_242 = arith.constant 1 : index
    %c0_243 = arith.constant 0 : index
    %c0_244 = arith.constant 0 : index
    %479 = vector.load %arg12[%c1_242, %c0_243, %c0_244] : memref<3x5x64xf32, #tpu.memory_space<vmem>>, vector<1x5x64xf32>
    %480 = vector.shape_cast %479 : vector<1x5x64xf32> to vector<5x64xf32>
    %481 = arith.addf %478, %480 : vector<5x64xf32>
    %c2_245 = arith.constant 2 : index
    %c0_246 = arith.constant 0 : index
    %c0_247 = arith.constant 0 : index
    %482 = vector.load %arg9[%c2_245, %c0_246, %c0_247] : memref<3x128x64xf32, #tpu.memory_space<vmem>>, vector<1x128x64xf32>
    %483 = vector.shape_cast %482 : vector<1x128x64xf32> to vector<128x64xf32>
    %cst_248 = arith.constant dense<0.000000e+00> : vector<5x64xf32>
    %484 = tpu.matmul %452, %483, %cst_248 {dimension_numbers = #tpu.dot_dimension_numbers<[1], [0], [0], [1], [0, 0, 1, 1], [], []>} : vector<5x128xf32>, vector<128x64xf32>, vector<5x64xf32> -> vector<5x64xf32>
    %c2_249 = arith.constant 2 : index
    %c0_250 = arith.constant 0 : index
    %c0_251 = arith.constant 0 : index
    %485 = vector.load %arg11[%c2_249, %c0_250, %c0_251] : memref<3x5x64xf32, #tpu.memory_space<vmem>>, vector<1x5x64xf32>
    %486 = vector.shape_cast %485 : vector<1x5x64xf32> to vector<5x64xf32>
    %487 = arith.addf %484, %486 : vector<5x64xf32>
    %c2_252 = arith.constant 2 : index
    %c0_253 = arith.constant 0 : index
    %c0_254 = arith.constant 0 : index
    %488 = vector.load %arg10[%c2_252, %c0_253, %c0_254] : memref<3x128x64xf32, #tpu.memory_space<vmem>>, vector<1x128x64xf32>
    %489 = vector.shape_cast %488 : vector<1x128x64xf32> to vector<128x64xf32>
    %cst_255 = arith.constant dense<0.000000e+00> : vector<5x64xf32>
    %490 = tpu.matmul %457, %489, %cst_255 {dimension_numbers = #tpu.dot_dimension_numbers<[1], [0], [0], [1], [0, 0, 1, 1], [], []>} : vector<5x128xf32>, vector<128x64xf32>, vector<5x64xf32> -> vector<5x64xf32>
    %c2_256 = arith.constant 2 : index
    %c0_257 = arith.constant 0 : index
    %c0_258 = arith.constant 0 : index
    %491 = vector.load %arg12[%c2_256, %c0_257, %c0_258] : memref<3x5x64xf32, #tpu.memory_space<vmem>>, vector<1x5x64xf32>
    %492 = vector.shape_cast %491 : vector<1x5x64xf32> to vector<5x64xf32>
    %493 = arith.addf %490, %492 : vector<5x64xf32>
    %494 = arith.addf %463, %469 : vector<5x64xf32>
    %495 = arith.negf %494 : vector<5x64xf32>
    %496 = math.exp %495 : vector<5x64xf32>
    %cst_259 = arith.constant 1.000000e+00 : f32
    %497 = vector.broadcast %cst_259 : f32 to vector<5x64xf32>
    %498 = arith.addf %497, %496 : vector<5x64xf32>
    %499 = arith.divf %497, %498 : vector<5x64xf32>
    %500 = arith.addf %475, %481 : vector<5x64xf32>
    %501 = arith.negf %500 : vector<5x64xf32>
    %502 = math.exp %501 : vector<5x64xf32>
    %cst_260 = arith.constant 1.000000e+00 : f32
    %503 = vector.broadcast %cst_260 : f32 to vector<5x64xf32>
    %504 = arith.addf %503, %502 : vector<5x64xf32>
    %505 = arith.divf %503, %504 : vector<5x64xf32>
    %506 = arith.mulf %499, %493 : vector<5x64xf32>
    %507 = arith.addf %487, %506 : vector<5x64xf32>
    %508 = math.tanh %507 : vector<5x64xf32>
    %cst_261 = arith.constant 1.000000e+00 : f32
    %509 = vector.broadcast %cst_261 : f32 to vector<5x64xf32>
    %510 = arith.subf %509, %505 : vector<5x64xf32>
    %511 = arith.mulf %510, %508 : vector<5x64xf32>
    %512 = arith.mulf %505, %384 : vector<5x64xf32>
    %513 = arith.addf %511, %512 : vector<5x64xf32>
    %c0_262 = arith.constant 0 : index
    %c0_263 = arith.constant 0 : index
    %c0_264 = arith.constant 0 : index
    %514 = vector.load %arg13[%c0_262, %c0_263, %c0_264] : memref<2x5x64xf32, #tpu.memory_space<vmem>>, vector<1x5x64xf32>
    %515 = vector.shape_cast %514 : vector<1x5x64xf32> to vector<5x64xf32>
    %c1_265 = arith.constant 1 : index
    %c0_266 = arith.constant 0 : index
    %c0_267 = arith.constant 0 : index
    %516 = vector.load %arg13[%c1_265, %c0_266, %c0_267] : memref<2x5x64xf32, #tpu.memory_space<vmem>>, vector<1x5x64xf32>
    %517 = vector.shape_cast %516 : vector<1x5x64xf32> to vector<5x64xf32>
    %cst_268 = arith.constant dense<0.000000e+00> : vector<5xf32>
    %518 = vector.multi_reduction <add>, %513, %cst_268 [1] : vector<5x64xf32> to vector<5xf32>
    %519 = vector.shape_cast %518 : vector<5xf32> to vector<5x1xf32>
    %cst_269 = arith.constant 6.400000e+01 : f32
    %520 = vector.broadcast %cst_269 : f32 to vector<5x1xf32>
    %521 = arith.divf %519, %520 : vector<5x1xf32>
    %522 = vector.broadcast %521 : vector<5x1xf32> to vector<5x64xf32>
    %523 = arith.subf %513, %522 : vector<5x64xf32>
    %524 = arith.mulf %523, %523 : vector<5x64xf32>
    %cst_270 = arith.constant dense<0.000000e+00> : vector<5xf32>
    %525 = vector.multi_reduction <add>, %524, %cst_270 [1] : vector<5x64xf32> to vector<5xf32>
    %526 = vector.shape_cast %525 : vector<5xf32> to vector<5x1xf32>
    %cst_271 = arith.constant 6.400000e+01 : f32
    %527 = vector.broadcast %cst_271 : f32 to vector<5x1xf32>
    %528 = arith.divf %526, %527 : vector<5x1xf32>
    %529 = vector.broadcast %521 : vector<5x1xf32> to vector<5x64xf32>
    %530 = arith.subf %513, %529 : vector<5x64xf32>
    %cst_272 = arith.constant 9.99999974E-6 : f32
    %531 = vector.broadcast %cst_272 : f32 to vector<5x1xf32>
    %532 = arith.addf %528, %531 : vector<5x1xf32>
    %533 = math.rsqrt %532 : vector<5x1xf32>
    %534 = vector.broadcast %533 : vector<5x1xf32> to vector<5x64xf32>
    %535 = arith.mulf %530, %534 : vector<5x64xf32>
    %536 = arith.mulf %535, %515 : vector<5x64xf32>
    %537 = arith.addf %536, %517 : vector<5x64xf32>
    %538 = vector.broadcast %0 : vector<5x1xf32> to vector<5x64xf32>
    %539 = arith.mulf %537, %538 : vector<5x64xf32>
    %540 = vector.broadcast %2 : vector<5x1xf32> to vector<5x64xf32>
    %541 = arith.mulf %537, %540 : vector<5x64xf32>
    %542 = tpu.concatenate %539, %541 in 1 : vector<5x64xf32>, vector<5x64xf32> -> vector<5x128xf32>
    %c0_273 = arith.constant 0 : index
    %c0_274 = arith.constant 0 : index
    %543 = vector.load %arg14[%c0_273, %c0_274] : memref<128x128xf32, #tpu.memory_space<vmem>>, vector<128x128xf32>
    %cst_275 = arith.constant dense<0.000000e+00> : vector<5x128xf32>
    %544 = tpu.matmul %542, %543, %cst_275 {dimension_numbers = #tpu.dot_dimension_numbers<[1], [0], [0], [1], [0, 0, 1, 1], [], []>} : vector<5x128xf32>, vector<128x128xf32>, vector<5x128xf32> -> vector<5x128xf32>
    %c0_276 = arith.constant 0 : index
    %c0_277 = arith.constant 0 : index
    %545 = vector.load %arg15[%c0_276, %c0_277] : memref<5x128xf32, #tpu.memory_space<vmem>>, vector<5x128xf32>
    %546 = arith.addf %544, %545 : vector<5x128xf32>
    %cst_278 = arith.constant 0.000000e+00 : f32
    %547 = vector.broadcast %cst_278 : f32 to vector<5x128xf32>
    %548 = arith.maximumf %546, %547 : vector<5x128xf32>
    %549 = vector.broadcast %0 : vector<5x1xf32> to vector<5x128xf32>
    %550 = arith.mulf %548, %549 : vector<5x128xf32>
    %551 = vector.broadcast %2 : vector<5x1xf32> to vector<5x128xf32>
    %552 = arith.mulf %548, %551 : vector<5x128xf32>
    %553 = tpu.concatenate %550, %552 in 1 : vector<5x128xf32>, vector<5x128xf32> -> vector<5x256xf32>
    %c0_279 = arith.constant 0 : index
    %c0_280 = arith.constant 0 : index
    %554 = vector.load %arg16[%c0_279, %c0_280] : memref<256x64xf32, #tpu.memory_space<vmem>>, vector<256x64xf32>
    %cst_281 = arith.constant dense<0.000000e+00> : vector<5x64xf32>
    %555 = tpu.matmul %553, %554, %cst_281 {dimension_numbers = #tpu.dot_dimension_numbers<[1], [0], [0], [1], [0, 0, 1, 1], [], []>} : vector<5x256xf32>, vector<256x64xf32>, vector<5x64xf32> -> vector<5x64xf32>
    %556 = arith.addf %513, %555 : vector<5x64xf32>
    %c0_282 = arith.constant 0 : index
    %c0_283 = arith.constant 0 : index
    %557 = vector.load %arg17[%c0_282, %c0_283] : memref<5x64xf32, #tpu.memory_space<vmem>>, vector<5x64xf32>
    %558 = arith.addf %556, %557 : vector<5x64xf32>
    %559 = tpu.concatenate %558, %430 in 1 : vector<5x64xf32>, vector<5x64xf32> -> vector<5x128xf32>
    %c0_284 = arith.constant 0 : index
    %c0_285 = arith.constant 0 : index
    %c0_286 = arith.constant 0 : index
    %560 = vector.load %arg18[%c0_284, %c0_285, %c0_286] : memref<1x5x128xf32, #tpu.memory_space<vmem>>, vector<1x5x128xf32>
    %561 = vector.shape_cast %560 : vector<1x5x128xf32> to vector<5x128xf32>
    %562 = vector.shape_cast %559 : vector<5x128xf32> to vector<1x5x128xf32>
    tpu.vector_store %arg18[%c0_284, %c0_285, %c0_286], %562 {strides = array<i32>} : memref<1x5x128xf32, #tpu.memory_space<vmem>>, vector<1x5x128xf32>,
    return
  }
  func.func @transform_0(%arg0: i32) -> (i32, i32) {
    %c0_i32 = arith.constant 0 : i32
    %c0_i32_0 = arith.constant 0 : i32
    return %arg0, %c0_i32 : i32, i32
  }
  func.func @transform_1(%arg0: i32) -> (i32, i32, i32) {
    %c0_i32 = arith.constant 0 : i32
    %c0_i32_0 = arith.constant 0 : i32
    %c0_i32_1 = arith.constant 0 : i32
    return %arg0, %c0_i32, %c0_i32_0 : i32, i32, i32
  }
  func.func @transform_2(%arg0: i32) -> (i32, i32) {
    %c0_i32 = arith.constant 0 : i32
    %c0_i32_0 = arith.constant 0 : i32
    %c0_i32_1 = arith.constant 0 : i32
    return %c0_i32, %c0_i32_0 : i32, i32
  }
  func.func @transform_3(%arg0: i32) -> (i32, i32) {
    %c0_i32 = arith.constant 0 : i32
    %c0_i32_0 = arith.constant 0 : i32
    %c0_i32_1 = arith.constant 0 : i32
    return %c0_i32, %c0_i32_0 : i32, i32
  }
  func.func @transform_4(%arg0: i32) -> (i32, i32) {
    %c0_i32 = arith.constant 0 : i32
    %c0_i32_0 = arith.constant 0 : i32
    %c0_i32_1 = arith.constant 0 : i32
    return %c0_i32, %c0_i32_0 : i32, i32
  }
  func.func @transform_5(%arg0: i32) -> (i32, i32) {
    %c0_i32 = arith.constant 0 : i32
    %c0_i32_0 = arith.constant 0 : i32
    %c0_i32_1 = arith.constant 0 : i32
    return %c0_i32, %c0_i32_0 : i32, i32
  }
  func.func @transform_6(%arg0: i32) -> (i32, i32, i32) {
    %c0_i32 = arith.constant 0 : i32
    %c0_i32_0 = arith.constant 0 : i32
    %c0_i32_1 = arith.constant 0 : i32
    %c0_i32_2 = arith.constant 0 : i32
    return %c0_i32, %c0_i32_0, %c0_i32_1 : i32, i32, i32
  }
  func.func @transform_7(%arg0: i32) -> (i32, i32) {
    %c0_i32 = arith.constant 0 : i32
    %c0_i32_0 = arith.constant 0 : i32
    %c0_i32_1 = arith.constant 0 : i32
    return %c0_i32, %c0_i32_0 : i32, i32
  }
  func.func @transform_8(%arg0: i32) -> (i32, i32, i32) {
    %c0_i32 = arith.constant 0 : i32
    %c0_i32_0 = arith.constant 0 : i32
    %c0_i32_1 = arith.constant 0 : i32
    %c0_i32_2 = arith.constant 0 : i32
    return %c0_i32, %c0_i32_0, %c0_i32_1 : i32, i32, i32
  }
  func.func @transform_9(%arg0: i32) -> (i32, i32, i32) {
    %c0_i32 = arith.constant 0 : i32
    %c0_i32_0 = arith.constant 0 : i32
    %c0_i32_1 = arith.constant 0 : i32
    %c0_i32_2 = arith.constant 0 : i32
    return %c0_i32, %c0_i32_0, %c0_i32_1 : i32, i32, i32
  }
  func.func @transform_10(%arg0: i32) -> (i32, i32, i32) {
    %c0_i32 = arith.constant 0 : i32
    %c0_i32_0 = arith.constant 0 : i32
    %c0_i32_1 = arith.constant 0 : i32
    %c0_i32_2 = arith.constant 0 : i32
    return %c0_i32, %c0_i32_0, %c0_i32_1 : i32, i32, i32
  }
  func.func @transform_11(%arg0: i32) -> (i32, i32, i32) {
    %c0_i32 = arith.constant 0 : i32
    %c0_i32_0 = arith.constant 0 : i32
    %c0_i32_1 = arith.constant 0 : i32
    %c0_i32_2 = arith.constant 0 : i32
    return %c0_i32, %c0_i32_0, %c0_i32_1 : i32, i32, i32
  }
  func.func @transform_12(%arg0: i32) -> (i32, i32, i32) {
    %c0_i32 = arith.constant 0 : i32
    %c0_i32_0 = arith.constant 0 : i32
    %c0_i32_1 = arith.constant 0 : i32
    %c0_i32_2 = arith.constant 0 : i32
    return %c0_i32, %c0_i32_0, %c0_i32_1 : i32, i32, i32
  }
  func.func @transform_13(%arg0: i32) -> (i32, i32) {
    %c0_i32 = arith.constant 0 : i32
    %c0_i32_0 = arith.constant 0 : i32
    %c0_i32_1 = arith.constant 0 : i32
    return %c0_i32, %c0_i32_0 : i32, i32
  }
  func.func @transform_14(%arg0: i32) -> (i32, i32) {
    %c0_i32 = arith.constant 0 : i32
    %c0_i32_0 = arith.constant 0 : i32
    %c0_i32_1 = arith.constant 0 : i32
    return %c0_i32, %c0_i32_0 : i32, i32
  }
  func.func @transform_15(%arg0: i32) -> (i32, i32) {
    %c0_i32 = arith.constant 0 : i32
    %c0_i32_0 = arith.constant 0 : i32
    %c0_i32_1 = arith.constant 0 : i32
    return %c0_i32, %c0_i32_0 : i32, i32
  }
  func.func @transform_16(%arg0: i32) -> (i32, i32) {
    %c0_i32 = arith.constant 0 : i32
    %c0_i32_0 = arith.constant 0 : i32
    %c0_i32_1 = arith.constant 0 : i32
    return %c0_i32, %c0_i32_0 : i32, i32
  }
  func.func @transform_17(%arg0: i32) -> (i32, i32, i32) {
    %c0_i32 = arith.constant 0 : i32
    %c0_i32_0 = arith.constant 0 : i32
    %c0_i32_1 = arith.constant 0 : i32
    return %arg0, %c0_i32, %c0_i32_0 : i32, i32, i32
  }
}

</mosaic_0001>

<bundles_post_ra>
// kernel: tpu_custom_call.1
= control target key start
LH: loop header
LB: loop body
LE: loop exit
PB: predicated region body
PF: predicated region fallthrough
CT: control target
= control target key end

     0   :  { %s6575_s23 = smov 0   ;;  %s8207_s0 = inlined_call_operand.vmem [shape: f32[128,64], index: 0, kind: input, shape index: {}]   ;;  %s8208_s1 = inlined_call_operand.vmem [shape: f32[2,5,64], index: 1, kind: input, shape index: {}]   ;;  %s8209_s2 = inlined_call_operand.vmem [shape: f32[5,1], index: 2, kind: input, shape index: {}]   ;;  %s8210_s3 = inlined_call_operand.vmem [shape: f32[5,64], index: 3, kind: input, shape index: {}]   ;;  %s8211_s4 = inlined_call_operand.vmem [shape: f32[2,64], index: 4, kind: input, shape index: {}]   ;;  %s8212_s5 = inlined_call_operand.vmem [shape: f32[64,128], index: 5, kind: input, shape index: {}]   ;;  %s8213_s6 = inlined_call_operand.vmem [shape: f32[2,5,64], index: 6, kind: input, shape index: {}]   ;;  %s8214_s7 = inlined_call_operand.vmem [shape: f32[128,64], index: 7, kind: input, shape index: {}]   ;;  %s8215_s8 = inlined_call_operand.vmem [shape: f32[3,128,64], index: 8, kind: input, shape index: {}]   ;;  %s8216_s9 = inlined_call_operand.vmem [shape: f32[3,128,64], index: 9, kind: input, shape index: {}]   ;;  %s8217_s10 = inlined_call_operand.vmem [shape: f32[3,5,64], index: 10, kind: input, shape index: {}]   ;;  %s8218_s11 = inlined_call_operand.vmem [shape: f32[3,5,64], index: 11, kind: input, shape index: {}]   ;;  %s8219_s12 = inlined_call_operand.vmem [shape: f32[2,5,64], index: 12, kind: input, shape index: {}]   ;;  %s8220_s13 = inlined_call_operand.vmem [shape: f32[128,128], index: 13, kind: input, shape index: {}]   ;;  %s8221_s14 = inlined_call_operand.vmem [shape: f32[5,128], index: 14, kind: input, shape index: {}]   ;;  %s8222_s15 = inlined_call_operand.vmem [shape: f32[256,64], index: 15, kind: input, shape index: {}]   ;;  %s8223_s16 = inlined_call_operand.vmem [shape: f32[5,64], index: 16, kind: input, shape index: {}]   ;;  %s8224_s17 = inlined_call_operand.vmem [shape: f32[2,5,128], index: 17, kind: output, shape index: {}]  }
   0x1   :  { %8342 = sst [smem:[#allocation74_spill]] %s8207_s0 }
   0x2   :  { %8343 = sst [smem:[#allocation75_spill]] %s8208_s1 }
   0x3 LB: > { %s3864_s3 = sadd.s32 4294967295, %s6478_s23   ;;  %p3868_p0 = scmp.ge.s32.totalorder %s6478_s23, 1  ;;  %s6478_s23 = sphi %s6575_s23, %s27_s23  }
   0x4   : > { %p497_p1 = scmp.lt.s32.totalorder %s6478_s23, 3 }
   0x6   : > { %p498_p2 = pnand %p3868_p0, %p497_p1 }
   0x8   : > { %501 = sbr.rel (%p498_p2) target bundleno = 7340 (0x1cac), region = 88 }
   0xf   : > { %p558_p3 = scmp.lt.s32.totalorder %s3864_s3, 1  ;;  %s3869_s24 = sshll.u32 %s3864_s3, 3  ;;  %vm850_vm0 = vcmask 520192   ;;  %vm579_vm1 = vcmask 523264   ;;  %v6480_v18 = vmov 0   ;;  %vm6482_vm3 = vmmov 0  }
  0x10   : > { %p553_p4 = scmp.lt.s32.totalorder %s3869_s24, 15  ;;  %s8344_s28 = sld [smem:[#allocation75_spill]]  ;;  %6365 = vset.pattern.permute.xlu0 %v6480_v18  ;;  %6366 = vset.pattern.permute.xlu1 %v6480_v18  ;;  %v566_v61 = vld [vmem:[%s8209_s2] sm:$0x1f]  ;;  %vm6812_vm4 = vmpackc.low %vm579_vm1, %vm579_vm1 }
  0x11   : > { %s8523_s3 = smov (!%p558_p3, %s3864_s3), 1  ;;  %s8345_s1 = sld [smem:[#allocation74_spill]]  ;;  %vm568_vm2 = vcmp.gt.f32.partialorder %v566_v61, 0.5 }
  0x12   : > { %s8525_s24 = smov (!%p553_p4, %s3869_s24), 15  ;;  %s3871_s25 = sshll.u32 %s8523_s3, 3 }
  0x13   : > { %s3870_s29 = sshll.u32 %s8525_s24, 3  ;;  %s565_s18 = scalar_lea.vmem %s8224_s17, %s3871_s25 }
  0x16   : > { %s6591_s0 = scalar_lea.vmem %s8344_s28, %s3871_s25 }
  0x17   : > { %v6594_v0 = vld [vmem:[%s6591_s0] sm:$0x1f]  ;;  %s556_s19 = scalar_lea.vmem %s8345_s1, %s3870_s29  ;;  %s6484_s1 = smov 64  }
  0x18   : > { %v851_v1 = vsel %vm850_vm0, %v6594_v0, 0.0  ;;  %v570_v2 = vld [vmem:[%s556_s19 + $0x8] sm:$0xff]  ;;  %v569_v3 = vld [vmem:[%s556_s19] sm:$0xff]  ;;  %v571_v4 = vld [vmem:[%s556_s19 + $0x10] sm:$0xff] }
  0x19   : > { %852 = vadd.xlane.f32.xlu0 %v851_v1  ;;  %v583_v5 = vsel %vm579_vm1, %v570_v2, 0.0  ;;  %v580_v6 = vsel %vm579_vm1, %v569_v3, 0.0  ;;  %v572_v7 = vld [vmem:[%s556_s19 + $0x18] sm:$0xff]  ;;  %v586_v8 = vsel %vm579_vm1, %v571_v4, 0.0  ;;  %v573_v9 = vld [vmem:[%s556_s19 + $0x20] sm:$0xff]  ;;  %v574_v11 = vld [vmem:[%s556_s19 + $0x28] sm:$0xff] }
  0x1a   : > { %584 = vadd.xlane.f32.xlu1 %v583_v5  ;;  %v589_v10 = vsel %vm579_vm1, %v572_v7, 0.0  ;;  %v592_v12 = vsel %vm579_vm1, %v573_v9, 0.0  ;;  %v575_v13 = vld [vmem:[%s556_s19 + $0x30] sm:$0xff]  ;;  %v595_v14 = vsel %vm579_vm1, %v574_v11, 0.0  ;;  %v576_v15 = vld [vmem:[%s556_s19 + $0x38] sm:$0xff]  ;;  %v567_v1 = vsub.f32 1.0, %v566_v61 }
  0x1b   : > { %v598_v16 = vsel %vm579_vm1, %v575_v13, 0.0  ;;  %v601_v17 = vsel %vm579_vm1, %v576_v15, 0.0 }
  0x1d   : > { %581 = vadd.xlane.f32.xlu0 %v580_v6  ;;  %v711_v6 = vld [vmem:[%s8212_s5 + $0x10] sm:$0xff] }
  0x1e   : > { %587 = vadd.xlane.f32.xlu1 %v586_v8  ;;  %v1103_v8 = vsel %vm568_vm2, 1, %v6480_v18  ;;  %v885_v18 = vld [vmem:[%s8214_s7 + $0x10] sm:$0xff] }
  0x21   : > { %590 = vadd.xlane.f32.xlu0 %v589_v10  ;;  %v713_v10 = vld [vmem:[%s8212_s5 + $0x20] sm:$0xff] }
  0x22   : > { %593 = vadd.xlane.f32.xlu1 %v592_v12 }
  0x25   : > { %596 = vadd.xlane.f32.xlu0 %v595_v14  ;;  %v716_v14 = vld [vmem:[%s8212_s5 + $0x38] sm:$0xff] }
  0x26   : > { %599 = vadd.xlane.f32.xlu1 %v598_v16  ;;  %v883_v16 = vld [vmem:[%s8214_s7] sm:$0xff] }
  0x29   : > { %602 = vadd.xlane.f32.xlu0 %v601_v17  ;;  %v884_v17 = vld [vmem:[%s8214_s7 + $0x8] sm:$0xff] }
  0xa6   : > { %v853_v19 = vpop.xlane.xlu0 %852 }
  0xa7   : > { %v854_v20 = vmul.f32 0.015625, %v853_v19  ;;  %v585_v21 = vpop.xlane.xlu1 %584  ;;  %v8231_v19 = vmov 0.0|0.0  }
  0xa8   : > { %v606_v23 = vmul.f32 0.015625, %v585_v21  ;;  %5572 = vmatprep.subr.bf16.mxu1 %v8231_v19  ;;  %v886_v21 = vld [vmem:[%s8214_s7 + $0x18] sm:$0xff] }
  0xa9   : > { %v6612_v22 = vsub.f32 %v6594_v0, %v854_v20  ;;  %v6695_v20 = vpack.c.bf16 %v884_v17, %v883_v16 }
  0xaa   : > { %v582_v24 = vpop.xlane.xlu0 %581  ;;  %v6614_v25 = vsub.f32 %v570_v2, %v606_v23  ;;  %v709_v2 = vld [vmem:[%s8212_s5] sm:$0xff]  ;;  %v6702_v23 = vpack.c.bf16 %v886_v21, %v885_v18 }
  0xab   : > { %v605_v26 = vmul.f32 0.015625, %v582_v24  ;;  %v856_v27 = vmul.f32 %v6612_v22, %v6612_v22  ;;  %v588_v28 = vpop.xlane.xlu1 %587  ;;  %5574 = vmatpush3.bf16.msra.mxu1 %v6695_v20  ;;  %v887_v24 = vld [vmem:[%s8214_s7 + $0x20] sm:$0xff] }
  0xac   : > { %v607_v31 = vmul.f32 0.015625, %v588_v28  ;;  %v622_v32 = vmul.f32 %v6614_v25, %v6614_v25  ;;  %5575 = vmatprep.subr.bf16.mxu1 %v8231_v19  ;;  %v889_v28 = vld [vmem:[%s8214_s7 + $0x30] sm:$0xff]  ;;  %v3874_v18 = vld [vmem:[%s8211_s4 + $0x1] ss:$0 sm:$0xff] }
  0xad   : > { %v6618_v29 = vsub.f32 %v569_v3, %v605_v26  ;;  %v857_v30 = vsel %vm850_vm0, %v856_v27, 0.0  ;;  %v710_v3 = vld [vmem:[%s8212_s5 + $0x8] sm:$0xff] }
  0xae   : > { %858 = vadd.xlane.f32.xlu1 %v857_v30  ;;  %v591_v33 = vpop.xlane.xlu0 %590  ;;  %v6623_v34 = vsub.f32 %v571_v4, %v607_v31  ;;  %v632_v35 = vsel %vm579_vm1, %v622_v32, 0.0  ;;  %v5556_v4 = vpack.c.bf16 %v710_v3, %v709_v2  ;;  %v888_v26 = vld [vmem:[%s8214_s7 + $0x28] sm:$0xff]  ;;  %v890_v30 = vld [vmem:[%s8214_s7 + $0x38] sm:$0xff]  ;;  %v891_v32 = vld [vmem:[%s8214_s7 + $0x40] sm:$0xff] }
  0xaf   : > { %v621_v36 = vmul.f32 %v6618_v29, %v6618_v29  ;;  %v608_v37 = vmul.f32 0.015625, %v591_v33  ;;  %v594_v38 = vpop.xlane.xlu1 %593  ;;  %5577 = vmatpush3.bf16.msra.mxu1 %v6702_v23  ;;  %v6712_v27 = vpack.c.bf16 %v888_v26, %v887_v24  ;;  %v6722_v31 = vpack.c.bf16 %v890_v30, %v889_v28  ;;  %v892_v33 = vld [vmem:[%s8214_s7 + $0x48] sm:$0xff] }
  0xb0   : > { %v623_v41 = vmul.f32 %v6623_v34, %v6623_v34  ;;  %v609_v42 = vmul.f32 0.015625, %v594_v38  ;;  %5557 = vmatprep.subr.bf16.mxu0 %v5556_v4  ;;  %5578 = vmatprep.subr.bf16.mxu1 %v8231_v19 }
  0xb1   : > { %v629_v39 = vsel %vm579_vm1, %v621_v36, 0.0  ;;  %v6629_v40 = vsub.f32 %v572_v7, %v608_v37  ;;  %5559 = vmatpush3.bf16.msra.mxu0 %v5556_v4  ;;  %v712_v7 = vld [vmem:[%s8212_s5 + $0x18] sm:$0xff]  ;;  %v893_v36 = vld [vmem:[%s8214_s7 + $0x50] sm:$0xff]  ;;  %v847_v4 = vld [vmem:[%s8213_s6] sm:$0x1f] }
  0xb2   : > { %633 = vadd.xlane.f32.xlu1 %v632_v35  ;;  %630 = vadd.xlane.f32.xlu0 %v629_v39  ;;  %v597_v43 = vpop.xlane.xlu0 %596  ;;  %v635_v44 = vsel %vm579_vm1, %v623_v41, 0.0  ;;  %v6634_v45 = vsub.f32 %v573_v9, %v609_v42  ;;  %v5560_v9 = vpack.c.bf16 %v712_v7, %v711_v6  ;;  %v6732_v35 = vpack.c.bf16 %v892_v33, %v891_v32  ;;  %v894_v37 = vld [vmem:[%s8214_s7 + $0x58] sm:$0xff]  ;;  %v895_v39 = vld [vmem:[%s8214_s7 + $0x60] sm:$0xff]  ;;  %v896_v41 = vld [vmem:[%s8214_s7 + $0x68] sm:$0xff] }
  0xb3   : > { %v624_v46 = vmul.f32 %v6629_v40, %v6629_v40  ;;  %v610_v47 = vmul.f32 0.015625, %v597_v43  ;;  %v600_v48 = vpop.xlane.xlu1 %599  ;;  %5580 = vmatpush3.bf16.msra.mxu1 %v6712_v27  ;;  %v6742_v38 = vpack.c.bf16 %v894_v37, %v893_v36  ;;  %v6752_v42 = vpack.c.bf16 %v896_v41, %v895_v39  ;;  %v897_v43 = vld [vmem:[%s8214_s7 + $0x70] sm:$0xff] }
  0xb4   : > { %v611_v51 = vmul.f32 0.015625, %v600_v48  ;;  %v625_v52 = vmul.f32 %v6634_v45, %v6634_v45  ;;  %5561 = vmatprep.subr.bf16.mxu0 %v5560_v9  ;;  %5581 = vmatprep.subr.bf16.mxu1 %v8231_v19 }
  0xb5   : > { %v638_v49 = vsel %vm579_vm1, %v624_v46, 0.0  ;;  %v6639_v50 = vsub.f32 %v574_v11, %v610_v47  ;;  %5563 = vmatpush3.bf16.msra.mxu0 %v5560_v9  ;;  %v714_v11 = vld [vmem:[%s8212_s5 + $0x28] sm:$0xff] }
  0xb6   : > { %636 = vadd.xlane.f32.xlu1 %v635_v44  ;;  %v603_v53 = vpop.xlane.xlu0 %602  ;;  %v6643_v54 = vsub.f32 %v575_v13, %v611_v51  ;;  %v641_v55 = vsel %vm579_vm1, %v625_v52, 0.0  ;;  %v5564_v12 = vpack.c.bf16 %v714_v11, %v713_v10  ;;  %v715_v13 = vld [vmem:[%s8212_s5 + $0x30] sm:$0xff]  ;;  %v898_v44 = vld [vmem:[%s8214_s7 + $0x78] sm:$0xff] }
  0xb7   : > { %v626_v56 = vmul.f32 %v6639_v50, %v6639_v50  ;;  %v612_v57 = vmul.f32 0.015625, %v603_v53  ;;  %5583 = vmatpush3.bf16.msra.mxu1 %v6722_v31  ;;  %v6762_v46 = vpack.c.bf16 %v898_v44, %v897_v43 }
  0xb8   : > { %v627_v60 = vmul.f32 %v6643_v54, %v6643_v54  ;;  %5565 = vmatprep.subr.bf16.mxu0 %v5564_v12  ;;  %5584 = vmatprep.subr.bf16.mxu1 %v8231_v19 }
  0xb9   : > { %v644_v58 = vsel %vm579_vm1, %v626_v56, 0.0  ;;  %v6649_v59 = vsub.f32 %v576_v15, %v612_v57  ;;  %5567 = vmatpush3.bf16.msra.mxu0 %v5564_v12  ;;  %v5568_v15 = vpack.c.bf16 %v716_v14, %v715_v13  ;;  %8346 = vst [vmem:[#allocation2_spill] sm:$0xff] %v6762_v46  ;;  %v3873_v12 = vld [vmem:[%s8211_s4] ss:$0 sm:$0xff] }
  0xba   : > { %639 = vadd.xlane.f32.xlu1 %v638_v49  ;;  %v647_v62 = vsel %vm579_vm1, %v627_v60, 0.0 }
  0xbb   : > { %v628_v63 = vmul.f32 %v6649_v59, %v6649_v59  ;;  %5569 = vmatprep.subr.bf16.mxu0 %v5568_v15  ;;  %5586 = vmatpush3.bf16.msra.mxu1 %v6732_v35 }
  0xbc   : > { %5587 = vmatprep.subr.bf16.mxu1 %v8231_v19 }
  0xbd   : > { %v650_v5 = vsel %vm579_vm1, %v628_v63, 0.0  ;;  %5571 = vmatpush3.bf16.msra.mxu0 %v5568_v15 }
  0xbe   : > { %642 = vadd.xlane.f32.xlu1 %v641_v55  ;;  %5596 = vmatprep.subr.bf16.mxu0 %v8231_v19 }
  0xbf   : > { %5589 = vmatpush3.bf16.msra.mxu1 %v6742_v38 }
  0xc0   : > { %5590 = vmatprep.subr.bf16.mxu1 %v8231_v19 }
  0xc2   : > { %645 = vadd.xlane.f32.xlu1 %v644_v58 }
  0xc3   : > { %5592 = vmatpush3.bf16.msra.mxu1 %v6752_v42 }
  0xc4   : > { %5593 = vmatprep.subr.bf16.mxu1 %v8231_v19 }
  0xc6   : > { %648 = vadd.xlane.f32.xlu1 %v647_v62  ;;  %v8225_v62 = vmov 0.0  }
  0xc7   : > { %5595 = vmatpush3.bf16.msra.mxu1 %v6762_v46  ;;  %4634 = vmatprep.mubr.msk.f32.mxu1 %vm6482_vm3, %v8225_v62 }
  0xc8   : > { %874 = vperm.xlu0 %6365, %v567_v1   ;;  %5612 = vmatprep.subr.bf16.mxu1 %v8231_v19 }
  0xca   : > { %651 = vadd.xlane.f32.xlu1 %v650_v5 }
  0xcc   : > { %1105 = vperm.xlu0 %6365, %v1103_v8   ;;  %v3883_v8 = vld [vmem:[%s8213_s6 + $0x8] sm:$0x1f] }
  0xdb   : > { %868 = vperm.xlu1 %6366, %v566_v61  }
 0x13b   : > { %v859_v47 = vpop.xlane.xlu1 %858 }
 0x13c   : > { %v860_v48 = vmul.f32 0.015625, %v859_v47 }
 0x13e   : > { %v861_v49 = vadd.f32 1e-05, %v860_v48 }
 0x13f   : > { %v634_v51 = vpop.xlane.xlu1 %633  ;;  %v631_v52 = vpop.xlane.xlu0 %630 }
 0x140   : > { %6387 = vrsqrt.f32 %v861_v49  ;;  %v654_v53 = vmul.f32 0.015625, %v634_v51  ;;  %v653_v55 = vmul.f32 0.015625, %v631_v52 }
 0x142   : > { %v662_v56 = vadd.f32 1e-05, %v654_v53  ;;  %v661_v57 = vadd.f32 1e-05, %v653_v55 }
 0x143   : > { %v637_v58 = vpop.xlane.xlu1 %636 }
 0x144   : > { %6389 = vrsqrt.f32 %v662_v56  ;;  %v655_v60 = vmul.f32 0.015625, %v637_v58 }
 0x145   : > { %6391 = vrsqrt.f32 %v661_v57 }
 0x146   : > { %v663_v61 = vadd.f32 1e-05, %v655_v60 }
 0x147   : > { %v640_v63 = vpop.xlane.xlu1 %639 }
 0x148   : > { %6393 = vrsqrt.f32 %v663_v61  ;;  %v656_v1 = vmul.f32 0.015625, %v640_v63 }
 0x14a   : > { %v6388_v2 = vpop.eup %6387  ;;  %v664_v3 = vadd.f32 1e-05, %v656_v1 }
 0x14b   : > { %v643_v5 = vpop.xlane.xlu1 %642  ;;  %v863_v6 = vmul.f32 %v6388_v2, %v6612_v22  ;;  %v6780_v22 = vpop.permute.xlu0 %874 }
 0x14c   : > { %6395 = vrsqrt.f32 %v664_v3  ;;  %v657_v7 = vmul.f32 0.015625, %v643_v5 }
 0x14d   : > { %v864_v9 = vmul.f32 %v863_v6, %v847_v4 }
 0x14e   : > { %v6390_v10 = vpop.eup %6389  ;;  %v665_v11 = vadd.f32 1e-05, %v657_v7 }
 0x14f   : > { %v6392_v13 = vpop.eup %6391  ;;  %v646_v14 = vpop.xlane.xlu1 %645  ;;  %v865_v15 = vadd.f32 %v3883_v8, %v864_v9  ;;  %v678_v16 = vmul.f32 %v6390_v10, %v6614_v25  ;;  %v8347_v10 = vmov 0 }
 0x150   : > { %6397 = vrsqrt.f32 %v665_v11  ;;  %v658_v17 = vmul.f32 0.015625, %v646_v14  ;;  %v677_v21 = vmul.f32 %v6392_v13, %v6618_v29  ;;  %v8348_v10 = vsel %vm6812_vm4, 4294967295, %v8347_v10 }
 0x151   : > { %v877_v24 = vmul.f32 %v6780_v22, %v865_v15  ;;  %v690_v26 = vmul.f32 %v3873_v12, %v678_v16  ;;  %8349 = vst [vmem:[#allocation3_spill] sm:$0xff] %v8348_v10 }
 0x152   : > { %v6394_v28 = vpop.eup %6393  ;;  %v666_v30 = vadd.f32 1e-05, %v658_v17  ;;  %v689_v32 = vmul.f32 %v3873_v12, %v677_v21 }
 0x153   : > { %v649_v33 = vpop.xlane.xlu1 %648  ;;  %879 = vrot.lane.b32.xlu1 %v877_v24, %s6484_s1  ;;  %v702_v25 = vadd.f32 %v3874_v18, %v690_v26  ;;  %v679_v36 = vmul.f32 %v6394_v28, %v6623_v34 }
 0x154   : > { %6399 = vrsqrt.f32 %v666_v30  ;;  %v659_v37 = vmul.f32 0.015625, %v649_v33  ;;  %v701_v39 = vadd.f32 %v3874_v18, %v689_v32  ;;  %v1216_v33 = vmul.f32 %v6780_v22, %v6594_v0 }
 0x155   : > { %v691_v41 = vmul.f32 %v3873_v12, %v679_v36 }
 0x156   : > { %v6396_v43 = vpop.eup %6395  ;;  %v667_v44 = vadd.f32 1e-05, %v659_v37  ;;  %4590 = vmatprep.mubr.msk.f32.mxu0 %vm579_vm1, %v701_v39 }
 0x157   : > { %4591 = vmatmul.mubr.msk.f32.vlgmr.msra.gmra.mrb[0].mxu0 %vm579_vm1, %v702_v25  ;;  %v652_v29 = vpop.xlane.xlu1 %651  ;;  %v703_v47 = vadd.f32 %v3874_v18, %v691_v41  ;;  %v680_v48 = vmul.f32 %v6396_v43, %v6629_v40  ;;  %v6850_v43 = vpop.permute.xlu0 %1105 }
 0x158   : > { %6401 = vrsqrt.f32 %v667_v44  ;;  %v660_v49 = vmul.f32 0.015625, %v652_v29  ;;  %vm1107_vm5 = vcmp.eq.s32.totalorder %v6850_v43, 1 }
 0x159   : > { %4593 = vmatprep.mubr.msk.f32.mxu0 %vm579_vm1, %v703_v47  ;;  %v692_v51 = vmul.f32 %v3873_v12, %v680_v48 }
 0x15a   : > { %v6398_v34 = vpop.eup %6397  ;;  %v668_v52 = vadd.f32 1e-05, %v660_v49 }
 0x15b   : > { %v704_v53 = vadd.f32 %v3874_v18, %v692_v51  ;;  %v681_v55 = vmul.f32 %v6398_v34, %v6634_v45 }
 0x15c   : > { %6403 = vrsqrt.f32 %v668_v52 }
 0x15d   : > { %4594 = vmatmul.mubr.msk.f32.gmra.mrb[2].mxu0 %vm579_vm1, %v704_v53  ;;  %v693_v56 = vmul.f32 %v3873_v12, %v681_v55 }
 0x15e   : > { %v6400_v57 = vpop.eup %6399 }
 0x15f   : > { %v705_v58 = vadd.f32 %v3874_v18, %v693_v56  ;;  %v682_v60 = vmul.f32 %v6400_v57, %v6639_v50  ;;  %v6804_v50 = vpop.permute.xlu1 %868 }
 0x161   : > { %4596 = vmatprep.mubr.msk.f32.mxu0 %vm579_vm1, %v705_v58  ;;  %v694_v40 = vmul.f32 %v3873_v12, %v682_v60 }
 0x162   : > { %v6402_v61 = vpop.eup %6401 }
 0x163   : > { %v706_v63 = vadd.f32 %v3874_v18, %v694_v40  ;;  %v683_v1 = vmul.f32 %v6402_v61, %v6643_v54  ;;  %v871_v54 = vmul.f32 %v6804_v50, %v865_v15 }
 0x165   : > { %4597 = vmatmul.mubr.msk.f32.gmra.mrb[4].mxu0 %vm579_vm1, %v706_v63  ;;  %v695_v2 = vmul.f32 %v3873_v12, %v683_v1 }
 0x166   : > { %v6404_v3 = vpop.eup %6403 }
 0x167   : > { %v707_v45 = vadd.f32 %v3874_v18, %v695_v2  ;;  %v684_v4 = vmul.f32 %v6404_v3, %v6649_v59 }
 0x169   : > { %4599 = vmatprep.mubr.msk.f32.mxu0 %vm579_vm1, %v707_v45  ;;  %v696_v5 = vmul.f32 %v3873_v12, %v684_v4 }
 0x16b   : > { %v708_v6 = vadd.f32 %v3874_v18, %v696_v5 }
 0x16d   : > { %4600 = vmatmul.mubr.msk.f32.gmra.mrb[6].mxu0 %vm579_vm1, %v708_v6 }
 0x16e   : > { %4653 = vmatprep.mubr.msk.f32.mxu0 %vm6482_vm3, %v8225_v62 }
 0x1c5   : > { %v880_v7 = vpop.permute.xlu1 %879 }
 0x1c6   : > { %v882_v8 = vsel %vm579_vm1, %v871_v54, %v880_v7 }
 0x1c7   : > { %4635 = vmatmul.mubr.f32.vlgmr.msra.gmra.mrb[0].mxu1 %v882_v8 }
 0x1c8   : > { %4672 = vmatprep.mubr.msk.f32.mxu1 %vm6482_vm3, %v8225_v62 }
 0x22a   : > { %v4592_v59 = vpop.f32.mrb[0].mxu0 }
 0x22b   : > { %v807_v9 = vpop.f32.mrb[1].mxu0 }
 0x22c   : > { %v6367_v11 = vpack.i.bf16 %v4592_v59, %v807_v9  ;;  %v6816_v12 = vpack.c.bf16 %v4592_v59, %v807_v9 }
 0x22e   : > { %8350 = vst [vmem:[#allocation4_spill] sm:$0xff] %v6816_v12  ;;  %5599 = vmatpush3.bf16.xpose.msk.msra.mxu0 %vm6812_vm4, %v6816_v12  ;;  %6368 = vrot.lane.b32.xlu1 %v6367_v11, %s6484_s1 }
 0x22f   : > { %5600 = vmatprep.subr.bf16.mxu0 %v8231_v19 }
 0x230   : > { %v4595_v13 = vpop.f32.mrb[2].mxu0 }
 0x231   : > { %v817_v14 = vpop.f32.mrb[3].mxu0 }
 0x232   : > { %v6372_v15 = vpack.i.bf16 %v4595_v13, %v817_v14  ;;  %v6823_v16 = vpack.c.bf16 %v4595_v13, %v817_v14 }
 0x234   : > { %8351 = vst [vmem:[#allocation5_spill] sm:$0xff] %v6823_v16  ;;  %6373 = vrot.lane.b32.xlu0 %v6372_v15, %s6484_s1 }
 0x236   : > { %5603 = vmatpush3.bf16.xpose.msk.msra.mxu0 %vm6812_vm4, %v6823_v16 }
 0x237   : > { %5604 = vmatprep.subr.bf16.mxu0 %v8231_v19 }
 0x238   : > { %v4598_v17 = vpop.f32.mrb[4].mxu0 }
 0x239   : > { %v827_v18 = vpop.f32.mrb[5].mxu0 }
 0x23a   : > { %v6377_v21 = vpack.i.bf16 %v4598_v17, %v827_v18  ;;  %v6830_v24 = vpack.c.bf16 %v4598_v17, %v827_v18 }
 0x23c   : > { %8352 = vst [vmem:[#allocation6_spill] sm:$0xff] %v6830_v24  ;;  %6378 = vrot.lane.b32.xlu1 %v6377_v21, %s6484_s1 }
 0x23e   : > { %5607 = vmatpush3.bf16.xpose.msk.msra.mxu0 %vm6812_vm4, %v6830_v24 }
 0x23f   : > { %5608 = vmatprep.subr.bf16.mxu0 %v8231_v19 }
 0x240   : > { %v4601_v26 = vpop.f32.mrb[6].mxu0 }
 0x241   : > { %v837_v28 = vpop.f32.mrb[7].mxu0 }
 0x242   : > { %v6382_v30 = vpack.i.bf16 %v4601_v26, %v837_v28  ;;  %v6837_v32 = vpack.c.bf16 %v4601_v26, %v837_v28 }
 0x244   : > { %8353 = vst [vmem:[#allocation7_spill] sm:$0xff] %v6837_v32  ;;  %6383 = vrot.lane.b32.xlu0 %v6382_v30, %s6484_s1 }
 0x246   : > { %5611 = vmatpush3.bf16.xpose.msk.msra.mxu0 %vm6812_vm4, %v6837_v32 }
 0x247   : > { %5624 = vmatprep.subr.bf16.mxu0 %v8231_v19 }
 0x248   : > { %1218 = vrot.lane.b32.xlu0 %v1216_v33, %s6484_s1 }
 0x29a   : > { %v965_v25 = vpop.f32.mrb[0].mxu1 }
 0x29b   : > { %v4636_v36 = vpop.f32.mrb[1].mxu1  ;;  %4654 = vmatmul.mubr.msk.f32.vlgmr.msra.gmra.mrb[8].mxu0 %vm579_vm1, %v965_v25 }
 0x29c   : > { %4707 = vmatprep.mubr.msk.f32.mxu0 %vm6482_vm3, %v8225_v62 }
 0x2a0   : > { %v6369_v37 = vpop.permute.xlu1 %6368 }
 0x2a1   : > { %v6371_v39 = vunpack.i.h.bf16 %v6369_v37  ;;  %v6370_v41 = vunpack.i.l.bf16 %v6369_v37 }
 0x2a3   : > { %v6852_v44 = vpack.c.bf16 %v6371_v39, %v6370_v41 }
 0x2a5   : > { %5614 = vmatpush3.bf16.msra.mxu1 %v6852_v44 }
 0x2a6   : > { %v6374_v0 = vpop.permute.xlu0 %6373  ;;  %5615 = vmatprep.subr.bf16.mxu1 %v8231_v19 }
 0x2a7   : > { %v6376_v29 = vunpack.i.h.bf16 %v6374_v0  ;;  %v6375_v47 = vunpack.i.l.bf16 %v6374_v0 }
 0x2a9   : > { %v6856_v48 = vpack.c.bf16 %v6376_v29, %v6375_v47 }
 0x2ab   : > { %5617 = vmatpush3.bf16.msra.mxu1 %v6856_v48 }
 0x2ac   : > { %5618 = vmatprep.subr.bf16.mxu1 %v8231_v19 }
 0x2ae   : > { %v6379_v49 = vpop.permute.xlu1 %6378 }
 0x2af   : > { %v6381_v51 = vunpack.i.h.bf16 %v6379_v49  ;;  %v6380_v34 = vunpack.i.l.bf16 %v6379_v49 }
 0x2b1   : > { %v6860_v52 = vpack.c.bf16 %v6381_v51, %v6380_v34 }
 0x2b3   : > { %8354 = vst [vmem:[#allocation8_spill] sm:$0xff] %v6860_v52  ;;  %5620 = vmatpush3.bf16.msra.mxu1 %v6860_v52 }
 0x2b4   : > { %5621 = vmatprep.subr.bf16.mxu1 %v8231_v19 }
 0x2b6   : > { %v6384_v53 = vpop.permute.xlu0 %6383 }
 0x2b7   : > { %v6386_v55 = vunpack.i.h.bf16 %v6384_v53  ;;  %v6385_v56 = vunpack.i.l.bf16 %v6384_v53 }
 0x2b9   : > { %v6864_v57 = vpack.c.bf16 %v6386_v55, %v6385_v56 }
 0x2bb   : > { %8355 = vst [vmem:[#allocation9_spill] sm:$0xff] %v6864_v57  ;;  %5623 = vmatpush3.bf16.msra.mxu1 %v6864_v57 }
 0x2bc   : > { %5672 = vmatprep.subr.bf16.mxu1 %v8231_v19 }
 0x36e   : > { %v1062_v58 = vpop.f32.mrb[8].mxu0 }
 0x36f   : > { %v1066_v60 = vmul.f32 4.0, %v1062_v58  ;;  %v4655_v40 = vpop.f32.mrb[9].mxu0  ;;  %v1222_v58 = vld [vmem:[%s8215_s8] sm:$0xff] }
 0x370   : > { %v3894_v40 = vld [vmem:[%s8215_s8 + $0x80] sm:$0xff] }
 0x371   : > { %v1067_v61 = vsel %vm850_vm0, %v1066_v60, -inf }
 0x372   : > { %v1068_v63 = vrot.slane %v1067_v61, 4 }
 0x374   : > { %v1069_v1 = vmax.f32 %v1067_v61, %v1068_v63  ;;  %v3895_v63 = vld [vmem:[%s8215_s8 + $0x88] sm:$0xff] }
 0x376   : > { %v1070_v2 = vrot.slane %v1069_v1, 2 }
 0x378   : > { %v1071_v3 = vmax.f32 %v1069_v1, %v1070_v2  ;;  %v1224_v1 = vld [vmem:[%s8215_s8 + $0x10] sm:$0xff]  ;;  %v1225_v2 = vld [vmem:[%s8215_s8 + $0x18] sm:$0xff] }
 0x37a   : > { %v1072_v45 = vrot.slane %v1071_v3, 1 }
 0x37c   : > { %v1073_v4 = vmax.f32 %v1071_v3, %v1072_v45  ;;  %v6900_v3 = vpack.c.bf16 %v3895_v63, %v3894_v40  ;;  %v3896_v45 = vld [vmem:[%s8215_s8 + $0x90] sm:$0xff]  ;;  %v3909_v63 = vld [vmem:[%s8215_s8 + $0xf8] sm:$0xff] }
 0x37d   : > { %v3908_v40 = vld [vmem:[%s8215_s8 + $0xf0] sm:$0xff] }
 0x37e   : > { %v1074_v5 = vsub.f32 %v1066_v60, %v1073_v4  ;;  %v1223_v60 = vld [vmem:[%s8215_s8 + $0x8] sm:$0xff]  ;;  %v3897_v4 = vld [vmem:[%s8215_s8 + $0x98] sm:$0xff] }
 0x37f   : > { %v6889_v61 = vpack.c.bf16 %v1223_v60, %v1222_v58  ;;  %v1236_v58 = vld [vmem:[%s8215_s8 + $0x70] sm:$0xff]  ;;  %v1237_v60 = vld [vmem:[%s8215_s8 + $0x78] sm:$0xff] }
 0x380   : > { %v1075_v6 = vmul.f32 1.442695, %v1074_v5  ;;  %v6909_v5 = vpack.c.bf16 %v1225_v2, %v1224_v1  ;;  %v7029_v1 = vpack.c.bf16 %v1237_v60, %v1236_v58  ;;  %v7033_v2 = vpack.c.bf16 %v3909_v63, %v3908_v40  ;;  %v1315_v40 = vld [vmem:[%s8216_s9 + $0x30] sm:$0xff]  ;;  %v1316_v63 = vld [vmem:[%s8216_s9 + $0x38] sm:$0xff] }
 0x381   : > { %8356 = vst [vmem:[#allocation10_spill] sm:$0xff] %v6889_v61  ;;  %5626 = vmatpush3.bf16.msra.mxu0 %v6889_v61 }
 0x382   : > { %6405 = vpow2.f32 %v1075_v6  ;;  %8357 = vst [vmem:[#allocation11_spill] sm:$0xff] %v6909_v5  ;;  %5627 = vmatprep.subr.bf16.mxu0 %v8231_v19  ;;  %v6913_v6 = vpack.c.bf16 %v3897_v4, %v3896_v45  ;;  %8363 = vst [vmem:[#allocation17_spill] sm:$0xff] %v7029_v1 }
 0x385   : > { %5629 = vmatpush3.bf16.msra.mxu0 %v6909_v5 }
 0x386   : > { %5630 = vmatprep.subr.bf16.mxu0 %v8231_v19 }
 0x38c   : > { %v6406_v54 = vpop.eup %6405 }
 0x38d   : > { %v1077_v7 = vsel %vm850_vm0, %v6406_v54, 0.0 }
 0x38e   : > { %v1078_v8 = vrot.slane %v1077_v7, 4 }
 0x390   : > { %v1079_v59 = vadd.f32 %v1078_v8, %v1077_v7  ;;  %v1227_v7 = vld [vmem:[%s8215_s8 + $0x28] sm:$0xff]  ;;  %v3898_v8 = vld [vmem:[%s8215_s8 + $0xa0] sm:$0xff] }
 0x392   : > { %v1080_v9 = vrot.slane %v1079_v59, 2 }
 0x394   : > { %v1081_v11 = vadd.f32 %v1080_v9, %v1079_v59  ;;  %v3899_v59 = vld [vmem:[%s8215_s8 + $0xa8] sm:$0xff] }
 0x396   : > { %v1082_v13 = vrot.slane %v1081_v11, 1 }
 0x398   : > { %v1083_v14 = vadd.f32 %v1082_v13, %v1081_v11  ;;  %v6933_v11 = vpack.c.bf16 %v3899_v59, %v3898_v8  ;;  %v1228_v13 = vld [vmem:[%s8215_s8 + $0x30] sm:$0xff]  ;;  %v1310_v8 = vld [vmem:[%s8216_s9 + $0x8] sm:$0xff]  ;;  %v3911_v59 = vld [vmem:[%s8216_s9 + $0x80] sm:$0xff] }
 0x39a   : > { %6407 = vrcp.f32 %v1083_v14  ;;  %v1229_v14 = vld [vmem:[%s8215_s8 + $0x38] sm:$0xff] }
 0x3a4   : > { %v6408_v15 = vpop.eup %6407 }
 0x3a5   : > { %v1085_v17 = vmul.f32 %v6408_v15, %v6406_v54  ;;  %v1226_v54 = vld [vmem:[%s8215_s8 + $0x20] sm:$0xff]  ;;  %v3900_v15 = vld [vmem:[%s8215_s8 + $0xb0] sm:$0xff] }
 0x3a6   : > { %v6929_v9 = vpack.c.bf16 %v1227_v7, %v1226_v54  ;;  %v1309_v7 = vld [vmem:[%s8216_s9] sm:$0xff] }
 0x3a7   : > { %v1086_v18 = vadd.f32 1e-08, %v1085_v17  ;;  %v3901_v17 = vld [vmem:[%s8215_s8 + $0xb8] sm:$0xff] }
 0x3a8   : > { %8358 = vst [vmem:[#allocation12_spill] sm:$0xff] %v6929_v9  ;;  %5632 = vmatpush3.bf16.msra.mxu0 %v6929_v9 }
 0x3a9   : > { %v1087_v21 = vmul.f32 %v1086_v18, %v6804_v50  ;;  %v1095_v26 = vmul.f32 %v1086_v18, %v6780_v22  ;;  %5633 = vmatprep.subr.bf16.mxu0 %v8231_v19 }
 0x3ab   : > { %v1088_v28 = vsel %vm850_vm0, %v1087_v21, 0.0  ;;  %v1096_v30 = vsel %vm850_vm0, %v1095_v26, 0.0  ;;  %v6953_v21 = vpack.c.bf16 %v3901_v17, %v3900_v15  ;;  %v1230_v26 = vld [vmem:[%s8215_s8 + $0x40] sm:$0xff]  ;;  %v7055_v15 = vpack.c.bf16 %v1310_v8, %v1309_v7 }
 0x3ac   : > { %v1089_v33 = vrot.slane %v1088_v28, 4  ;;  %v1097_v25 = vrot.slane %v1096_v30, 4  ;;  %v1317_v8 = vld [vmem:[%s8216_s9 + $0x40] sm:$0xff] }
 0x3ae   : > { %v1090_v36 = vadd.f32 %v1089_v33, %v1088_v28  ;;  %v1098_v37 = vadd.f32 %v1097_v25, %v1096_v30  ;;  %v1231_v28 = vld [vmem:[%s8215_s8 + $0x48] sm:$0xff]  ;;  %v3902_v30 = vld [vmem:[%s8215_s8 + $0xc0] sm:$0xff] }
 0x3af   : > { %v3903_v33 = vld [vmem:[%s8215_s8 + $0xc8] sm:$0xff]  ;;  %v6969_v25 = vpack.c.bf16 %v1231_v28, %v1230_v26  ;;  %v1311_v26 = vld [vmem:[%s8216_s9 + $0x10] sm:$0xff] }
 0x3b0   : > { %v1091_v39 = vrot.slane %v1090_v36, 2  ;;  %v1099_v41 = vrot.slane %v1098_v37, 2 }
 0x3b1   : > { %8360 = vst [vmem:[#allocation14_spill] sm:$0xff] %v6969_v25 }
 0x3b2   : > { %v1092_v0 = vadd.f32 %v1091_v39, %v1090_v36  ;;  %v1100_v29 = vadd.f32 %v1099_v41, %v1098_v37  ;;  %v6973_v36 = vpack.c.bf16 %v3903_v33, %v3902_v30  ;;  %v1232_v37 = vld [vmem:[%s8215_s8 + $0x50] sm:$0xff]  ;;  %v1233_v39 = vld [vmem:[%s8215_s8 + $0x58] sm:$0xff] }
 0x3b3   : > { %v3904_v41 = vld [vmem:[%s8215_s8 + $0xd0] sm:$0xff]  ;;  %v1312_v30 = vld [vmem:[%s8216_s9 + $0x18] sm:$0xff] }
 0x3b4   : > { %v1093_v47 = vrot.slane %v1092_v0, 1  ;;  %v1101_v49 = vrot.slane %v1100_v29, 1  ;;  %v3913_v33 = vld [vmem:[%s8216_s9 + $0x90] sm:$0xff] }
 0x3b6   : > { %v1094_v51 = vadd.f32 %v1093_v47, %v1092_v0  ;;  %v1102_v34 = vadd.f32 %v1101_v49, %v1100_v29  ;;  %v3905_v0 = vld [vmem:[%s8215_s8 + $0xd8] sm:$0xff]  ;;  %v6989_v29 = vpack.c.bf16 %v1233_v39, %v1232_v37  ;;  %v1234_v49 = vld [vmem:[%s8215_s8 + $0x60] sm:$0xff] }
 0x3b7   : > { %v6993_v47 = vpack.c.bf16 %v3905_v0, %v3904_v41  ;;  %v3914_v37 = vld [vmem:[%s8216_s9 + $0x98] sm:$0xff]  ;;  %v7078_v41 = vpack.c.bf16 %v1312_v30, %v1311_v26  ;;  %v1319_v30 = vld [vmem:[%s8216_s9 + $0x50] sm:$0xff] }
 0x3b8   : > { %v1108_v53 = vsel %vm1107_vm5, %v1094_v51, %v1102_v34  ;;  %8361 = vst [vmem:[#allocation15_spill] sm:$0xff] %v6989_v29  ;;  %v1235_v51 = vld [vmem:[%s8215_s8 + $0x68] sm:$0xff]  ;;  %v3906_v34 = vld [vmem:[%s8215_s8 + $0xe0] sm:$0xff]  ;;  %v7080_v0 = vpack.c.bf16 %v3914_v37, %v3913_v33  ;;  %v1320_v33 = vld [vmem:[%s8216_s9 + $0x58] sm:$0xff] }
 0x3b9   : > { %6409 = vrcp.f32 %v1108_v53  ;;  %v3907_v53 = vld [vmem:[%s8215_s8 + $0xe8] sm:$0xff]  ;;  %v3921_v37 = vld [vmem:[%s8216_s9 + $0xd0] sm:$0xff] }
 0x3c3   : > { %v6410_v55 = vpop.eup %6409 }
 0x3c4   : > { %v1110_v56 = vmul.f32 %v6410_v55, %v1086_v18  ;;  %v6949_v18 = vpack.c.bf16 %v1229_v14, %v1228_v13  ;;  %v7009_v55 = vpack.c.bf16 %v1235_v51, %v1234_v49  ;;  %v3912_v13 = vld [vmem:[%s8216_s9 + $0x88] sm:$0xff]  ;;  %v1313_v49 = vld [vmem:[%s8216_s9 + $0x20] sm:$0xff] }
 0x3c5   : > { %v7057_v17 = vpack.c.bf16 %v3912_v13, %v3911_v59  ;;  %v1314_v51 = vld [vmem:[%s8216_s9 + $0x28] sm:$0xff]  ;;  %v3919_v13 = vld [vmem:[%s8216_s9 + $0xc0] sm:$0xff] }
 0x3c6   : > { %4673 = vmatmul.mubr.msk.f32.vlgmr.msra.gmra.mrb[2].mxu1 %vm579_vm1, %v1110_v56  ;;  %8359 = vst [vmem:[#allocation13_spill] sm:$0xff] %v6949_v18  ;;  %5635 = vmatpush3.bf16.msra.mxu0 %v6949_v18  ;;  %8362 = vst [vmem:[#allocation16_spill] sm:$0xff] %v7009_v55  ;;  %v7013_v56 = vpack.c.bf16 %v3907_v53, %v3906_v34  ;;  %v3915_v34 = vld [vmem:[%s8216_s9 + $0xa0] sm:$0xff]  ;;  %v3916_v53 = vld [vmem:[%s8216_s9 + $0xa8] sm:$0xff]  ;;  %v7102_v58 = vpack.c.bf16 %v1314_v51, %v1313_v49 }
 0x3c7   : > { %4777 = vmatprep.mubr.msk.f32.mxu1 %vm6482_vm3, %v8225_v62  ;;  %5674 = vmatpush3.bf16.msra.mxu1 %v6900_v3  ;;  %v7104_v60 = vpack.c.bf16 %v3916_v53, %v3915_v34  ;;  %v1318_v59 = vld [vmem:[%s8216_s9 + $0x48] sm:$0xff]  ;;  %v3922_v49 = vld [vmem:[%s8216_s9 + $0xd8] sm:$0xff]  ;;  %v7162_v51 = vpack.c.bf16 %v1320_v33, %v1319_v30  ;;  %v1321_v53 = vld [vmem:[%s8216_s9 + $0x60] sm:$0xff] }
 0x3c8   : > { %5675 = vmatprep.subr.bf16.mxu1 %v8231_v19  ;;  %5636 = vmatprep.subr.bf16.mxu0 %v8231_v19  ;;  %v7142_v26 = vpack.c.bf16 %v1318_v59, %v1317_v8  ;;  %v7164_v34 = vpack.c.bf16 %v3922_v49, %v3921_v37  ;;  %v1323_v59 = vld [vmem:[%s8216_s9 + $0x70] sm:$0xff]  ;;  %v3926_v30 = vld [vmem:[%s8216_s9 + $0xf8] sm:$0xff]  ;;  %v3928_v49 = vld [vmem:[%s8215_s8 + $0x100] sm:$0xff] }
 0x3c9   : > { %8367 = vst [vmem:[#allocation21_spill] sm:$0xff] %v7162_v51 }
 0x3ca   : > { %5638 = vmatpush3.bf16.msra.mxu0 %v6969_v25  ;;  %8365 = vst [vmem:[#allocation19_spill] sm:$0xff] %v7142_v26  ;;  %8368 = vst [vmem:[#allocation22_spill] sm:$0xff] %v7164_v34 }
 0x3cb   : > { %5677 = vmatpush3.bf16.msra.mxu1 %v6913_v6  ;;  %5639 = vmatprep.subr.bf16.mxu0 %v8231_v19 }
 0x3cc   : > { %5678 = vmatprep.subr.bf16.mxu1 %v8231_v19 }
 0x3ce   : > { %5641 = vmatpush3.bf16.msra.mxu0 %v6989_v29 }
 0x3cf   : > { %5680 = vmatpush3.bf16.msra.mxu1 %v6933_v11  ;;  %5642 = vmatprep.subr.bf16.mxu0 %v8231_v19 }
 0x3d0   : > { %5681 = vmatprep.subr.bf16.mxu1 %v8231_v19 }
 0x3d2   : > { %5644 = vmatpush3.bf16.msra.mxu0 %v7009_v55 }
 0x3d3   : > { %5683 = vmatpush3.bf16.msra.mxu1 %v6953_v21  ;;  %5645 = vmatprep.subr.bf16.mxu0 %v8231_v19 }
 0x3d4   : > { %5684 = vmatprep.subr.bf16.mxu1 %v8231_v19 }
 0x3d6   : > { %5647 = vmatpush3.bf16.msra.mxu0 %v7029_v1 }
 0x3d7   : > { %5686 = vmatpush3.bf16.msra.mxu1 %v6973_v36  ;;  %5648 = vmatprep.subr.bf16.mxu0 %v8231_v19 }
 0x3d8   : > { %5687 = vmatprep.subr.bf16.mxu1 %v8231_v19 }
 0x3db   : > { %5689 = vmatpush3.bf16.msra.mxu1 %v6993_v47 }
 0x3dc   : > { %5690 = vmatprep.subr.bf16.mxu1 %v8231_v19 }
 0x3df   : > { %5692 = vmatpush3.bf16.msra.mxu1 %v7013_v56 }
 0x3e0   : > { %5693 = vmatprep.subr.bf16.mxu1 %v8231_v19 }
 0x3e3   : > { %5695 = vmatpush3.bf16.msra.mxu1 %v7033_v2 }
 0x3e4   : > { %5696 = vmatprep.subr.bf16.mxu1 %v8231_v19 }
 0x499   : > { %v1204_v45 = vpop.f32.mrb[2].mxu1 }
 0x49a   : > { %v1209_v4 = vmul.f32 %v1204_v45, %v6780_v22  ;;  %v4674_v54 = vpop.f32.mrb[3].mxu1  ;;  %v1208_v14 = vmul.f32 %v1204_v45, %v6804_v50  ;;  %v3917_v45 = vld [vmem:[%s8216_s9 + $0xb0] sm:$0xff] }
 0x49b   : > { %v7122_v54 = vpack.c.bf16 %v1316_v63, %v1315_v40  ;;  %v1322_v40 = vld [vmem:[%s8216_s9 + $0x68] sm:$0xff]  ;;  %v3923_v63 = vld [vmem:[%s8216_s9 + $0xe0] sm:$0xff] }
 0x49c   : > { %1211 = vrot.lane.b32.xlu1 %v1209_v4, %s6484_s1  ;;  %v3918_v4 = vld [vmem:[%s8216_s9 + $0xb8] sm:$0xff] }
 0x49d   : > { %v7124_v7 = vpack.c.bf16 %v3918_v4, %v3917_v45  ;;  %v3924_v45 = vld [vmem:[%s8216_s9 + $0xe8] sm:$0xff]  ;;  %v7182_v4 = vpack.c.bf16 %v1322_v40, %v1321_v53  ;;  %v3945_v40 = vld [vmem:[%s8216_s9 + $0x100] sm:$0xff] }
 0x49e   : > { %v7184_v8 = vpack.c.bf16 %v3924_v45, %v3923_v63  ;;  %v3929_v53 = vld [vmem:[%s8215_s8 + $0x108] sm:$0xff]  ;;  %v1219_v45 = vpop.permute.xlu0 %1218 }
 0x49f   : > { %8364 = vst [vmem:[#allocation18_spill] sm:$0xff] %v7124_v7  ;;  %8369 = vst [vmem:[#allocation23_spill] sm:$0xff] %v7182_v4  ;;  %v3946_v63 = vld [vmem:[%s8216_s9 + $0x108] sm:$0xff] }
 0x4a0   : > { %8370 = vst [vmem:[#allocation24_spill] sm:$0xff] %v7184_v8 }
 0x50e   : > { %v1212_v28 = vpop.permute.xlu1 %1211 }
 0x50f   : > { %v7072_v39 = vsel %vm579_vm1, %v1208_v14, %v1212_v28  ;;  %v3920_v14 = vld [vmem:[%s8216_s9 + $0xc8] sm:$0xff] }
 0x510   : > { %4708 = vmatmul.mubr.f32.vlgmr.msra.gmra.mrb[10].mxu0 %v7072_v39  ;;  %4778 = vmatmul.mubr.f32.vlgmr.msra.gmra.mrb[4].mxu1 %v7072_v39  ;;  %v7144_v28 = vpack.c.bf16 %v3920_v14, %v3919_v13  ;;  %v1324_v13 = vld [vmem:[%s8216_s9 + $0x78] sm:$0xff]  ;;  %v3925_v14 = vld [vmem:[%s8216_s9 + $0xf0] sm:$0xff] }
 0x511   : > { %5650 = vmatpush3.bf16.msra.mxu0 %v7055_v15  ;;  %5698 = vmatpush3.bf16.msra.mxu1 %v7057_v17  ;;  %v7202_v33 = vpack.c.bf16 %v1324_v13, %v1323_v59  ;;  %v7204_v37 = vpack.c.bf16 %v3926_v30, %v3925_v14  ;;  %v7221_v59 = vld [vmem:[%s6591_s0] sm:$0x1f]  ;;  %v7227_v14 = vpack.c.bf16 %v3929_v53, %v3928_v49  ;;  %v3948_v49 = vld [vmem:[%s8216_s9 + $0x118] sm:$0xff] }
 0x512   : > { %5651 = vmatprep.subr.bf16.mxu0 %v8231_v19  ;;  %5699 = vmatprep.subr.bf16.mxu1 %v8231_v19  ;;  %8366 = vst [vmem:[#allocation20_spill] sm:$0xff] %v7144_v28  ;;  %v1215_v13 = vmul.f32 %v7221_v59, %v6804_v50  ;;  %v7229_v30 = vpack.c.bf16 %v3946_v63, %v3945_v40 }
 0x513   : > { %4742 = vmatprep.mubr.msk.f32.mxu0 %vm6482_vm3, %v8225_v62  ;;  %4812 = vmatprep.mubr.msk.f32.mxu1 %vm6482_vm3, %v8225_v62  ;;  %8371 = vst [vmem:[#allocation25_spill] sm:$0xff] %v7202_v33  ;;  %8372 = vst [vmem:[#allocation26_spill] sm:$0xff] %v7204_v37  ;;  %v3930_v62 = vld [vmem:[%s8215_s8 + $0x110] sm:$0xff] }
 0x514   : > { %8373 = vst [vmem:[#allocation27_spill] sm:$0xff] %v7227_v14  ;;  %8374 = vst [vmem:[#allocation28_spill] sm:$0xff] %v7229_v30  ;;  %v7246_v53 = vsel %vm579_vm1, %v1215_v13, %v1219_v45  ;;  %v3933_v45 = vld [vmem:[%s8215_s8 + $0x128] sm:$0xff]  ;;  %v3949_v13 = vld [vmem:[%s8216_s9 + $0x120] sm:$0xff] }
 0x515   : > { %5653 = vmatpush3.bf16.msra.mxu0 %v7078_v41  ;;  %5701 = vmatpush3.bf16.msra.mxu1 %v7080_v0 }
 0x516   : > { %5654 = vmatprep.subr.bf16.mxu0 %v8231_v19  ;;  %5702 = vmatprep.subr.bf16.mxu1 %v8231_v19 }
 0x519   : > { %5656 = vmatpush3.bf16.msra.mxu0 %v7102_v58  ;;  %5704 = vmatpush3.bf16.msra.mxu1 %v7104_v60 }
 0x51a   : > { %5657 = vmatprep.subr.bf16.mxu0 %v8231_v19  ;;  %5705 = vmatprep.subr.bf16.mxu1 %v8231_v19 }
 0x51d   : > { %5659 = vmatpush3.bf16.msra.mxu0 %v7122_v54  ;;  %5707 = vmatpush3.bf16.msra.mxu1 %v7124_v7 }
 0x51e   : > { %5660 = vmatprep.subr.bf16.mxu0 %v8231_v19  ;;  %5708 = vmatprep.subr.bf16.mxu1 %v8231_v19 }
 0x521   : > { %5662 = vmatpush3.bf16.msra.mxu0 %v7142_v26  ;;  %5710 = vmatpush3.bf16.msra.mxu1 %v7144_v28 }
 0x522   : > { %5663 = vmatprep.subr.bf16.mxu0 %v8231_v19  ;;  %5711 = vmatprep.subr.bf16.mxu1 %v8231_v19 }
 0x525   : > { %5665 = vmatpush3.bf16.msra.mxu0 %v7162_v51  ;;  %5713 = vmatpush3.bf16.msra.mxu1 %v7164_v34 }
 0x526   : > { %5666 = vmatprep.subr.bf16.mxu0 %v8231_v19  ;;  %5714 = vmatprep.subr.bf16.mxu1 %v8231_v19 }
 0x529   : > { %5668 = vmatpush3.bf16.msra.mxu0 %v7182_v4  ;;  %5716 = vmatpush3.bf16.msra.mxu1 %v7184_v8  ;;  %v3931_v8 = vld [vmem:[%s8215_s8 + $0x118] sm:$0xff] }
 0x52a   : > { %5669 = vmatprep.subr.bf16.mxu0 %v8231_v19  ;;  %5717 = vmatprep.subr.bf16.mxu1 %v8231_v19  ;;  %v7252_v40 = vpack.c.bf16 %v3931_v8, %v3930_v62  ;;  %v3950_v62 = vld [vmem:[%s8216_s9 + $0x128] sm:$0xff]  ;;  %v8378_v8 = vmov 0.0  }
 0x52c   : > { %8375 = vst [vmem:[#allocation29_spill] sm:$0xff] %v7252_v40 }
 0x52d   : > { %5671 = vmatpush3.bf16.msra.mxu0 %v7202_v33  ;;  %5719 = vmatpush3.bf16.msra.mxu1 %v7204_v37  ;;  %v3947_v37 = vld [vmem:[%s8216_s9 + $0x110] sm:$0xff]  ;;  %v8377_v33 = vmov 0.0|0.0  }
 0x52e   : > { %5720 = vmatprep.subr.bf16.mxu0 %v8231_v19  ;;  %5744 = vmatprep.subr.bf16.mxu1 %v8231_v19  ;;  %v7254_v63 = vpack.c.bf16 %v3948_v49, %v3947_v37  ;;  %v3932_v19 = vld [vmem:[%s8215_s8 + $0x120] sm:$0xff]  ;;  %v7278_v49 = vpack.c.bf16 %v3950_v62, %v3949_v13 }
 0x52f   : > { %v7276_v37 = vpack.c.bf16 %v3933_v45, %v3932_v19  ;;  %v3952_v19 = vld [vmem:[%s8216_s9 + $0x138] sm:$0xff]  ;;  %v3936_v62 = vld [vmem:[%s8215_s8 + $0x140] sm:$0xff] }
 0x530   : > { %4743 = vmatmul.mubr.f32.vlgmr.msra.gmra.mrb[10].mxu0 %v7246_v53  ;;  %4813 = vmatmul.mubr.f32.vlgmr.msra.gmra.mrb[4].mxu1 %v7246_v53  ;;  %8376 = vst [vmem:[#allocation30_spill] sm:$0xff] %v7254_v63  ;;  %8380 = vst [vmem:[#allocation32_spill] sm:$0xff] %v7278_v49 }
 0x531   : > { %5722 = vmatpush3.bf16.msra.mxu0 %v7227_v14  ;;  %5746 = vmatpush3.bf16.msra.mxu1 %v7229_v30  ;;  %8379 = vst [vmem:[#allocation31_spill] sm:$0xff] %v7276_v37  ;;  %v3934_v30 = vld [vmem:[%s8215_s8 + $0x130] sm:$0xff]  ;;  %v3935_v14 = vld [vmem:[%s8215_s8 + $0x138] sm:$0xff] }
 0x532   : > { %5723 = vmatprep.subr.bf16.mxu0 %v8377_v33  ;;  %5747 = vmatprep.subr.bf16.mxu1 %v8377_v33  ;;  %v7296_v45 = vpack.c.bf16 %v3935_v14, %v3934_v30  ;;  %v3954_v14 = vld [vmem:[%s8216_s9 + $0x148] sm:$0xff] }
 0x533   : > { %4847 = vmatprep.mubr.msk.f32.mxu0 %vm6482_vm3, %v8378_v8  ;;  %4882 = vmatprep.mubr.msk.f32.mxu1 %vm6482_vm3, %v8378_v8 }
 0x534   : > { %8381 = vst [vmem:[#allocation33_spill] sm:$0xff] %v7296_v45 }
 0x535   : > { %5725 = vmatpush3.bf16.msra.mxu0 %v7252_v40  ;;  %5749 = vmatpush3.bf16.msra.mxu1 %v7254_v63  ;;  %v3951_v63 = vld [vmem:[%s8216_s9 + $0x130] sm:$0xff]  ;;  %v3937_v40 = vld [vmem:[%s8215_s8 + $0x148] sm:$0xff] }
 0x536   : > { %5726 = vmatprep.subr.bf16.mxu0 %v8377_v33  ;;  %5750 = vmatprep.subr.bf16.mxu1 %v8377_v33  ;;  %v7298_v13 = vpack.c.bf16 %v3952_v19, %v3951_v63  ;;  %v7316_v30 = vpack.c.bf16 %v3937_v40, %v3936_v62  ;;  %v3938_v19 = vld [vmem:[%s8215_s8 + $0x150] sm:$0xff]  ;;  %v3956_v40 = vld [vmem:[%s8216_s9 + $0x158] sm:$0xff] }
 0x538   : > { %8382 = vst [vmem:[#allocation34_spill] sm:$0xff] %v7298_v13  ;;  %8383 = vst [vmem:[#allocation35_spill] sm:$0xff] %v7316_v30 }
 0x539   : > { %5728 = vmatpush3.bf16.msra.mxu0 %v7276_v37  ;;  %5752 = vmatpush3.bf16.msra.mxu1 %v7278_v49  ;;  %v3953_v49 = vld [vmem:[%s8216_s9 + $0x140] sm:$0xff]  ;;  %v3939_v37 = vld [vmem:[%s8215_s8 + $0x158] sm:$0xff] }
 0x53a   : > { %5729 = vmatprep.subr.bf16.mxu0 %v8377_v33  ;;  %5753 = vmatprep.subr.bf16.mxu1 %v8377_v33  ;;  %v7318_v63 = vpack.c.bf16 %v3954_v14, %v3953_v49  ;;  %v7336_v49 = vpack.c.bf16 %v3939_v37, %v3938_v19  ;;  %v3940_v14 = vld [vmem:[%s8215_s8 + $0x160] sm:$0xff]  ;;  %v3958_v37 = vld [vmem:[%s8216_s9 + $0x168] sm:$0xff] }
 0x53c   : > { %8384 = vst [vmem:[#allocation36_spill] sm:$0xff] %v7318_v63  ;;  %8385 = vst [vmem:[#allocation37_spill] sm:$0xff] %v7336_v49 }
 0x53d   : > { %5731 = vmatpush3.bf16.msra.mxu0 %v7296_v45  ;;  %5755 = vmatpush3.bf16.msra.mxu1 %v7298_v13  ;;  %v3955_v13 = vld [vmem:[%s8216_s9 + $0x150] sm:$0xff]  ;;  %v3941_v45 = vld [vmem:[%s8215_s8 + $0x168] sm:$0xff] }
 0x53e   : > { %5732 = vmatprep.subr.bf16.mxu0 %v8377_v33  ;;  %5756 = vmatprep.subr.bf16.mxu1 %v8377_v33  ;;  %v7338_v62 = vpack.c.bf16 %v3956_v40, %v3955_v13  ;;  %v7356_v13 = vpack.c.bf16 %v3941_v45, %v3940_v14  ;;  %v3942_v40 = vld [vmem:[%s8215_s8 + $0x170] sm:$0xff]  ;;  %v3960_v45 = vld [vmem:[%s8216_s9 + $0x178] sm:$0xff] }
 0x540   : > { %8386 = vst [vmem:[#allocation38_spill] sm:$0xff] %v7338_v62  ;;  %8387 = vst [vmem:[#allocation39_spill] sm:$0xff] %v7356_v13 }
 0x541   : > { %5734 = vmatpush3.bf16.msra.mxu0 %v7316_v30  ;;  %5758 = vmatpush3.bf16.msra.mxu1 %v7318_v63  ;;  %v3957_v63 = vld [vmem:[%s8216_s9 + $0x160] sm:$0xff]  ;;  %v3943_v30 = vld [vmem:[%s8215_s8 + $0x178] sm:$0xff] }
 0x542   : > { %5735 = vmatprep.subr.bf16.mxu0 %v8377_v33  ;;  %5759 = vmatprep.subr.bf16.mxu1 %v8377_v33  ;;  %v7358_v19 = vpack.c.bf16 %v3958_v37, %v3957_v63  ;;  %v7376_v63 = vpack.c.bf16 %v3943_v30, %v3942_v40  ;;  %v1238_v30 = vld [vmem:[%s8217_s10] sm:$0x1f] }
 0x544   : > { %8388 = vst [vmem:[#allocation40_spill] sm:$0xff] %v7358_v19  ;;  %8389 = vst [vmem:[#allocation41_spill] sm:$0xff] %v7376_v63 }
 0x545   : > { %5737 = vmatpush3.bf16.msra.mxu0 %v7336_v49  ;;  %5761 = vmatpush3.bf16.msra.mxu1 %v7338_v62  ;;  %v3959_v62 = vld [vmem:[%s8216_s9 + $0x170] sm:$0xff] }
 0x546   : > { %5738 = vmatprep.subr.bf16.mxu0 %v8377_v33  ;;  %5762 = vmatprep.subr.bf16.mxu1 %v8377_v33  ;;  %v7378_v14 = vpack.c.bf16 %v3960_v45, %v3959_v62  ;;  %v1325_v62 = vld [vmem:[%s8218_s11] sm:$0x1f] }
 0x547   : > { %v7395_v37 = vadd.f32 %v1325_v62, %v1238_v30 }
 0x548   : > { %8390 = vst [vmem:[#allocation42_spill] sm:$0xff] %v7378_v14 }
 0x549   : > { %5740 = vmatpush3.bf16.msra.mxu0 %v7356_v13  ;;  %5764 = vmatpush3.bf16.msra.mxu1 %v7358_v19  ;;  %8391 = vst [vmem:[#allocation43_spill] sm:$0xff] %v7395_v37  ;;  %v3910_v19 = vld [vmem:[%s8217_s10 + $0x8] sm:$0x1f] }
 0x54a   : > { %5741 = vmatprep.subr.bf16.mxu0 %v8377_v33  ;;  %5765 = vmatprep.subr.bf16.mxu1 %v8377_v33  ;;  %v3927_v13 = vld [vmem:[%s8218_s11 + $0x8] sm:$0x1f] }
 0x54b   : > { %v7404_v49 = vadd.f32 %v3927_v13, %v3910_v19  ;;  %v7415_v13 = vld [vmem:[%s8217_s10 + $0x10] sm:$0x1f] }
 0x54c   : > { %8394 = vst [vmem:[#allocation46_spill] sm:$0xff] %v7415_v13 }
 0x54d   : > { %5743 = vmatpush3.bf16.msra.mxu0 %v7376_v63  ;;  %5767 = vmatpush3.bf16.msra.mxu1 %v7378_v14  ;;  %8392 = vst [vmem:[#allocation44_spill] sm:$0xff] %v7404_v49 }
 0x54e   : > { %5768 = vmatprep.subr.bf16.mxu0 %v8377_v33 }
 0x550   : > { %4848 = vmatmul.mubr.f32.vlgmr.msra.gmra.mrb[12].mxu0 %v7072_v39  ;;  %4883 = vmatmul.mubr.f32.vlgmr.msra.gmra.mrb[6].mxu1 %v7246_v53 }
 0x551   : > { %4917 = vmatprep.mubr.msk.f32.mxu0 %vm6482_vm3, %v8378_v8 }
 0x603   : > { %v1392_v40 = vpop.f32.mrb[10].mxu0  ;;  %v1570_v45 = vpop.f32.mrb[4].mxu1 }
 0x604   : > { %v6329_v14 = vadd.f32 %v7395_v37, %v1392_v40  ;;  %v4744_v39 = vpop.f32.mrb[11].mxu0  ;;  %v4814_v63 = vpop.f32.mrb[5].mxu1  ;;  %v6331_v30 = vadd.f32 %v7404_v49, %v1570_v45 }
 0x606   : > { %v3962_v53 = vmul.f32 -1.442695, %v6329_v14  ;;  %v3963_v62 = vmul.f32 -1.442695, %v6331_v30  ;;  %v7410_v14 = vld [vmem:[%s8218_s11 + $0x10] sm:$0x1f] }
 0x607   : > { %8393 = vst [vmem:[#allocation45_spill] sm:$0xff] %v7410_v14 }
 0x608   : > { %6411 = vpow2.f32 %v3962_v53 }
 0x609   : > { %6413 = vpow2.f32 %v3963_v62 }
 0x612   : > { %v6412_v4 = vpop.eup %6411 }
 0x613   : > { %v1756_v40 = vadd.f32 1.0, %v6412_v4  ;;  %v6414_v63 = vpop.eup %6413 }
 0x614   : > { %v1763_v39 = vadd.f32 1.0, %v6414_v63 }
 0x615   : > { %6415 = vrcp.f32 %v1756_v40 }
 0x616   : > { %6417 = vrcp.f32 %v1763_v39 }
 0x61f   : > { %v6416_v4 = vpop.eup %6415 }
 0x620   : > { %v6418_v34 = vpop.eup %6417 }
 0x621   : > { %v1769_v63 = vsub.f32 1.0, %v6418_v34  ;;  %v1771_v26 = vmul.f32 %v7221_v59, %v6418_v34  ;;  %v1801_v59 = vld [vmem:[%s8220_s13 + $0x18] sm:$0xff] }
 0x623   : > { %v1659_v19 = vpop.f32.mrb[12].mxu0  ;;  %v1748_v53 = vpop.f32.mrb[6].mxu1 }
 0x624   : > { %v1749_v45 = vadd.f32 %v7410_v14, %v1748_v53  ;;  %v4849_v30 = vpop.f32.mrb[13].mxu0  ;;  %v4884_v62 = vpop.f32.mrb[7].mxu1  ;;  %v1660_v40 = vadd.f32 %v7415_v13, %v1659_v19 }
 0x626   : > { %v1766_v49 = vmul.f32 %v6416_v4, %v1749_v45  ;;  %v1802_v45 = vld [vmem:[%s8220_s13 + $0x20] sm:$0xff]  ;;  %v1803_v4 = vld [vmem:[%s8220_s13 + $0x28] sm:$0xff] }
 0x628   : > { %v1767_v37 = vadd.f32 %v1766_v49, %v1660_v40  ;;  %v7455_v40 = vpack.c.bf16 %v1803_v4, %v1802_v45  ;;  %v1811_v45 = vld [vmem:[%s8220_s13 + $0x68] sm:$0xff] }
 0x62a   : > { %6419 = vtanh.f32 %v1767_v37  ;;  %8397 = vst [vmem:[#allocation49_spill] sm:$0xff] %v7455_v40 }
 0x634   : > { %v6420_v51 = vpop.eup %6419 }
 0x635   : > { %v1770_v28 = vmul.f32 %v6420_v51, %v1769_v63  ;;  %v1800_v51 = vld [vmem:[%s8220_s13 + $0x10] sm:$0xff] }
 0x636   : > { %v7445_v19 = vpack.c.bf16 %v1801_v59, %v1800_v51  ;;  %v1804_v63 = vld [vmem:[%s8220_s13 + $0x30] sm:$0xff]  ;;  %v1810_v59 = vld [vmem:[%s8220_s13 + $0x60] sm:$0xff] }
 0x637   : > { %v7420_v7 = vadd.f32 %v1771_v26, %v1770_v28  ;;  %v1798_v26 = vld [vmem:[%s8220_s13] sm:$0xff]  ;;  %v1799_v28 = vld [vmem:[%s8220_s13 + $0x8] sm:$0xff]  ;;  %v7495_v4 = vpack.c.bf16 %v1811_v45, %v1810_v59 }
 0x638   : > { %v7439_v34 = vpack.c.bf16 %v1799_v28, %v1798_v26  ;;  %8396 = vst [vmem:[#allocation48_spill] sm:$0xff] %v7445_v19  ;;  %v1808_v26 = vld [vmem:[%s8220_s13 + $0x50] sm:$0xff]  ;;  %v1809_v28 = vld [vmem:[%s8220_s13 + $0x58] sm:$0xff]  ;;  %v1904_v59 = vld [vmem:[%s8222_s15 + $0x80] sm:$0xff] }
 0x639   : > { %v1776_v53 = vsel %vm850_vm0, %v7420_v7, 0.0  ;;  %v7485_v51 = vpack.c.bf16 %v1809_v28, %v1808_v26  ;;  %8401 = vst [vmem:[#allocation53_spill] sm:$0xff] %v7495_v4  ;;  %v1905_v45 = vld [vmem:[%s8222_s15 + $0x88] sm:$0xff] }
 0x63a   : > { %1777 = vadd.xlane.f32.xlu1 %v1776_v53  ;;  %8395 = vst [vmem:[#allocation47_spill] sm:$0xff] %v7439_v34  ;;  %5770 = vmatpush3.bf16.msra.mxu0 %v7439_v34  ;;  %v1805_v53 = vld [vmem:[%s8220_s13 + $0x38] sm:$0xff] }
 0x63b   : > { %5771 = vmatprep.subr.bf16.mxu0 %v8377_v33  ;;  %8400 = vst [vmem:[#allocation52_spill] sm:$0xff] %v7485_v51 }
 0x63e   : > { %5773 = vmatpush3.bf16.msra.mxu0 %v7445_v19 }
 0x63f   : > { %5774 = vmatprep.subr.bf16.mxu0 %v8377_v33 }
 0x642   : > { %5776 = vmatpush3.bf16.msra.mxu0 %v7455_v40 }
 0x643   : > { %5777 = vmatprep.subr.bf16.mxu0 %v8377_v33 }
 0x6c7   : > { %v1778_v30 = vpop.xlane.xlu1 %1777 }
 0x6c8   : > { %v1779_v62 = vmul.f32 0.015625, %v1778_v30  ;;  %v7465_v30 = vpack.c.bf16 %v1805_v53, %v1804_v63  ;;  %v1812_v63 = vld [vmem:[%s8220_s13 + $0x70] sm:$0xff]  ;;  %v1813_v53 = vld [vmem:[%s8220_s13 + $0x78] sm:$0xff] }
 0x6ca   : > { %v7425_v39 = vsub.f32 %v7420_v7, %v1779_v62  ;;  %8398 = vst [vmem:[#allocation50_spill] sm:$0xff] %v7465_v30  ;;  %v1806_v62 = vld [vmem:[%s8220_s13 + $0x40] sm:$0xff]  ;;  %5779 = vmatpush3.bf16.msra.mxu0 %v7465_v30 }
 0x6cb   : > { %5780 = vmatprep.subr.bf16.mxu0 %v8377_v33  ;;  %v1892_v30 = vld [vmem:[%s8222_s15 + $0x20] sm:$0xff] }
 0x6cc   : > { %v1781_v49 = vmul.f32 %v7425_v39, %v7425_v39 }
 0x6ce   : > { %v1782_v37 = vsel %vm850_vm0, %v1781_v49, 0.0  ;;  %v1807_v49 = vld [vmem:[%s8220_s13 + $0x48] sm:$0xff] }
 0x6cf   : > { %1783 = vadd.xlane.f32.xlu0 %v1782_v37  ;;  %v7475_v37 = vpack.c.bf16 %v1807_v49, %v1806_v62  ;;  %v7505_v62 = vpack.c.bf16 %v1813_v53, %v1812_v63  ;;  %v1888_v63 = vld [vmem:[%s8222_s15] sm:$0xff]  ;;  %v7519_v53 = vpack.c.bf16 %v1905_v45, %v1904_v59  ;;  %v1890_v59 = vld [vmem:[%s8222_s15 + $0x10] sm:$0xff]  ;;  %v1891_v45 = vld [vmem:[%s8222_s15 + $0x18] sm:$0xff] }
 0x6d1   : > { %8399 = vst [vmem:[#allocation51_spill] sm:$0xff] %v7475_v37  ;;  %5782 = vmatpush3.bf16.msra.mxu0 %v7475_v37  ;;  %8402 = vst [vmem:[#allocation54_spill] sm:$0xff] %v7505_v62  ;;  %5793 = vmatprep.subr.bf16.mxu1 %v7519_v53 }
 0x6d2   : > { %5783 = vmatprep.subr.bf16.mxu0 %v8377_v33  ;;  %8403 = vst [vmem:[#allocation55_spill] sm:$0xff] %v7519_v53 }
 0x6d5   : > { %5785 = vmatpush3.bf16.msra.mxu0 %v7485_v51  ;;  %v7559_v51 = vld [vmem:[%s8219_s12 + $0x8] sm:$0x1f] }
 0x6d6   : > { %5786 = vmatprep.subr.bf16.mxu0 %v8377_v33  ;;  %8408 = vst [vmem:[#allocation60_spill] sm:$0xff] %v7559_v51 }
 0x6d9   : > { %5788 = vmatpush3.bf16.msra.mxu0 %v7495_v4 }
 0x6da   : > { %5789 = vmatprep.subr.bf16.mxu0 %v8377_v33 }
 0x6dd   : > { %5791 = vmatpush3.bf16.msra.mxu0 %v7505_v62  ;;  %v1908_v62 = vld [vmem:[%s8222_s15 + $0xa0] sm:$0xff] }
 0x6de   : > { %5824 = vmatprep.subr.bf16.mxu0 %v8377_v33 }
 0x75c   : > { %v1784_v49 = vpop.xlane.xlu0 %1783 }
 0x75d   : > { %v1785_v26 = vmul.f32 0.015625, %v1784_v49  ;;  %v1889_v49 = vld [vmem:[%s8222_s15 + $0x8] sm:$0xff] }
 0x75e   : > { %v7530_v13 = vpack.c.bf16 %v1889_v49, %v1888_v63  ;;  %v7546_v63 = vld [vmem:[%s8219_s12] sm:$0x1f]  ;;  %v1909_v49 = vld [vmem:[%s8222_s15 + $0xa8] sm:$0xff] }
 0x75f   : > { %v1786_v28 = vadd.f32 1e-05, %v1785_v26  ;;  %v1906_v26 = vld [vmem:[%s8222_s15 + $0x90] sm:$0xff]  ;;  %8406 = vst [vmem:[#allocation58_spill] sm:$0xff] %v7546_v63  ;;  %v7562_v37 = vpack.c.bf16 %v1909_v49, %v1908_v62 }
 0x760   : > { %8404 = vst [vmem:[#allocation56_spill] sm:$0xff] %v7530_v13  ;;  %5795 = vmatpush3.bf16.msra.mxu1 %v7530_v13 }
 0x761   : > { %6421 = vrsqrt.f32 %v1786_v28  ;;  %v1907_v28 = vld [vmem:[%s8222_s15 + $0x98] sm:$0xff]  ;;  %8409 = vst [vmem:[#allocation61_spill] sm:$0xff] %v7562_v37 }
 0x762   : > { %v7532_v14 = vpack.c.bf16 %v1907_v28, %v1906_v26  ;;  %v7554_v28 = vpack.c.bf16 %v1891_v45, %v1890_v59  ;;  %v1910_v59 = vld [vmem:[%s8222_s15 + $0xb0] sm:$0xff]  ;;  %v1911_v45 = vld [vmem:[%s8222_s15 + $0xb8] sm:$0xff] }
 0x763   : > { %v7582_v40 = vpack.c.bf16 %v1911_v45, %v1910_v59  ;;  %v1896_v45 = vld [vmem:[%s8222_s15 + $0x40] sm:$0xff] }
 0x764   : > { %8405 = vst [vmem:[#allocation57_spill] sm:$0xff] %v7532_v14  ;;  %8407 = vst [vmem:[#allocation59_spill] sm:$0xff] %v7554_v28  ;;  %5797 = vmatprep.subr.bf16.mxu1 %v7532_v14 }
 0x765   : > { %5799 = vmatpush3.bf16.msra.mxu1 %v7554_v28  ;;  %8411 = vst [vmem:[#allocation63_spill] sm:$0xff] %v7582_v40 }
 0x766   : > { %5801 = vmatprep.subr.bf16.mxu1 %v7562_v37 }
 0x76b   : > { %v6422_v4 = vpop.eup %6421 }
 0x76c   : > { %v1788_v26 = vmul.f32 %v6422_v4, %v7425_v39  ;;  %v1893_v39 = vld [vmem:[%s8222_s15 + $0x28] sm:$0xff] }
 0x76d   : > { %v7579_v49 = vpack.c.bf16 %v1893_v39, %v1892_v30  ;;  %v1913_v30 = vld [vmem:[%s8222_s15 + $0xc8] sm:$0xff] }
 0x76e   : > { %v1789_v4 = vmul.f32 %v1788_v26, %v7546_v63  ;;  %v1894_v26 = vld [vmem:[%s8222_s15 + $0x30] sm:$0xff]  ;;  %v1895_v63 = vld [vmem:[%s8222_s15 + $0x38] sm:$0xff] }
 0x76f   : > { %8410 = vst [vmem:[#allocation62_spill] sm:$0xff] %v7579_v49  ;;  %5803 = vmatpush3.bf16.msra.mxu1 %v7579_v49  ;;  %v7599_v39 = vpack.c.bf16 %v1895_v63, %v1894_v26  ;;  %v1915_v63 = vld [vmem:[%s8222_s15 + $0xd8] sm:$0xff]  ;;  %v1916_v49 = vld [vmem:[%s8222_s15 + $0xe0] sm:$0xff] }
 0x770   : > { %v1790_v62 = vadd.f32 %v7559_v51, %v1789_v4  ;;  %v1912_v4 = vld [vmem:[%s8222_s15 + $0xc0] sm:$0xff]  ;;  %5805 = vmatprep.subr.bf16.mxu1 %v7582_v40  ;;  %v1897_v51 = vld [vmem:[%s8222_s15 + $0x48] sm:$0xff]  ;;  %v1899_v40 = vld [vmem:[%s8222_s15 + $0x58] sm:$0xff] }
 0x771   : > { %8412 = vst [vmem:[#allocation64_spill] sm:$0xff] %v7599_v39  ;;  %v7602_v59 = vpack.c.bf16 %v1913_v30, %v1912_v4  ;;  %v7617_v26 = vpack.c.bf16 %v1897_v51, %v1896_v45  ;;  %v1898_v30 = vld [vmem:[%s8222_s15 + $0x50] sm:$0xff]  ;;  %v1917_v51 = vld [vmem:[%s8222_s15 + $0xe8] sm:$0xff] }
 0x772   : > { %v1792_v19 = vmul.f32 %v1790_v62, %v6780_v22  ;;  %v7635_v45 = vpack.c.bf16 %v1899_v40, %v1898_v30  ;;  %v1919_v40 = vld [vmem:[%s8222_s15 + $0xf8] sm:$0xff] }
 0x773   : > { %8413 = vst [vmem:[#allocation65_spill] sm:$0xff] %v7602_v59  ;;  %5807 = vmatpush3.bf16.msra.mxu1 %v7599_v39  ;;  %8414 = vst [vmem:[#allocation66_spill] sm:$0xff] %v7617_v26  ;;  %v1918_v39 = vld [vmem:[%s8222_s15 + $0xf0] sm:$0xff] }
 0x774   : > { %1794 = vrot.lane.b32.xlu0 %v1792_v19, %s6484_s1  ;;  %v1914_v19 = vld [vmem:[%s8222_s15 + $0xd0] sm:$0xff]  ;;  %5809 = vmatprep.subr.bf16.mxu1 %v7602_v59  ;;  %8416 = vst [vmem:[#allocation68_spill] sm:$0xff] %v7635_v45  ;;  %v1901_v59 = vld [vmem:[%s8222_s15 + $0x68] sm:$0xff]  ;;  %v7656_v30 = vpack.c.bf16 %v1919_v40, %v1918_v39  ;;  %v1791_v39 = vmul.f32 %v1790_v62, %v6804_v50  ;;  %v7693_v62 = vld [vmem:[%s8221_s14] sm:$0x1f] }
 0x775   : > { %v7620_v4 = vpack.c.bf16 %v1915_v63, %v1914_v19  ;;  %v7638_v19 = vpack.c.bf16 %v1917_v51, %v1916_v49  ;;  %v1900_v63 = vld [vmem:[%s8222_s15 + $0x60] sm:$0xff]  ;;  %v1902_v51 = vld [vmem:[%s8222_s15 + $0x70] sm:$0xff]  ;;  %8421 = vst [vmem:[#allocation73_spill] sm:$0xff] %v7693_v62 }
 0x776   : > { %v7653_v49 = vpack.c.bf16 %v1901_v59, %v1900_v63  ;;  %8419 = vst [vmem:[#allocation71_spill] sm:$0xff] %v7656_v30 }
 0x777   : > { %8415 = vst [vmem:[#allocation67_spill] sm:$0xff] %v7620_v4  ;;  %5811 = vmatpush3.bf16.msra.mxu1 %v7617_v26  ;;  %8417 = vst [vmem:[#allocation69_spill] sm:$0xff] %v7638_v19 }
 0x778   : > { %5813 = vmatprep.subr.bf16.mxu1 %v7620_v4  ;;  %8418 = vst [vmem:[#allocation70_spill] sm:$0xff] %v7653_v49  ;;  %v1903_v4 = vld [vmem:[%s8222_s15 + $0x78] sm:$0xff] }
 0x779   : > { %v7665_v26 = vpack.c.bf16 %v1903_v4, %v1902_v51 }
 0x77b   : > { %5815 = vmatpush3.bf16.msra.mxu1 %v7635_v45  ;;  %8420 = vst [vmem:[#allocation72_spill] sm:$0xff] %v7665_v26 }
 0x77c   : > { %5817 = vmatprep.subr.bf16.mxu1 %v7638_v19 }
 0x77f   : > { %5819 = vmatpush3.bf16.msra.mxu1 %v7653_v49 }
 0x780   : > { %5821 = vmatprep.subr.bf16.mxu1 %v7656_v30 }
 0x783   : > { %5823 = vmatpush3.bf16.msra.mxu1 %v7665_v26 }
 0x784   : > { %5848 = vmatprep.subr.bf16.mxu1 %v8377_v33 }
 0x7e6   : > { %v1795_v59 = vpop.permute.xlu0 %1794 }
 0x7e7   : > { %v1797_v63 = vsel %vm579_vm1, %v1791_v39, %v1795_v59 }
 0x7e8   : > { %4918 = vmatmul.mubr.f32.vlgmr.msra.gmra.mrb[14].mxu0 %v1797_v63 }
 0x7e9   : > { %5826 = vmatpush3.bf16.msra.mxu0 %v6695_v20  ;;  %4952 = vmatprep.mubr.msk.f32.mxu0 %vm6482_vm3, %v8378_v8 }
 0x7ea   : > { %5827 = vmatprep.subr.bf16.mxu0 %v8377_v33 }
 0x7ed   : > { %5829 = vmatpush3.bf16.msra.mxu0 %v6702_v23 }
 0x7ee   : > { %5830 = vmatprep.subr.bf16.mxu0 %v8377_v33 }
 0x7f1   : > { %5832 = vmatpush3.bf16.msra.mxu0 %v6712_v27 }
 0x7f2   : > { %5833 = vmatprep.subr.bf16.mxu0 %v8377_v33 }
 0x7f5   : > { %5835 = vmatpush3.bf16.msra.mxu0 %v6722_v31 }
 0x7f6   : > { %5836 = vmatprep.subr.bf16.mxu0 %v8377_v33 }
 0x7f9   : > { %5838 = vmatpush3.bf16.msra.mxu0 %v6732_v35 }
 0x7fa   : > { %5839 = vmatprep.subr.bf16.mxu0 %v8377_v33 }
 0x7fd   : > { %5841 = vmatpush3.bf16.msra.mxu0 %v6742_v38 }
 0x7fe   : > { %5842 = vmatprep.subr.bf16.mxu0 %v8377_v33 }
 0x801   : > { %5844 = vmatpush3.bf16.msra.mxu0 %v6752_v42 }
 0x802   : > { %5845 = vmatprep.subr.bf16.mxu0 %v8377_v33 }
 0x805   : > { %5847 = vmatpush3.bf16.msra.mxu0 %v6762_v46 }
 0x806   : > { %5864 = vmatprep.subr.bf16.mxu0 %v8377_v33 }
 0x8bb   : > { %v1881_v4 = vpop.f32.mrb[14].mxu0 }
 0x8bc   : > { %v1882_v40 = vadd.f32 %v1881_v4, %v7693_v62  ;;  %v4919_v51 = vpop.f32.mrb[15].mxu0 }
 0x8be   : > { %v1885_v39 = vmax.f32 %v1882_v40, 0.0 }
 0x8c0   : > { %v1886_v59 = vmul.f32 %v1885_v39, %v6804_v50  ;;  %v1887_v63 = vmul.f32 %v1885_v39, %v6780_v22  ;;  %v7719_v39 = vld [vmem:[%s8223_s16] sm:$0x1f] }
 0x8c2   : > { %1984 = vmatprep.mubr.f32.mxu1 %v1887_v63 }
 0x8c3   : > { %1985 = vmatmul.mubr.f32.vlgmr.msra.gmra.mrb[8].mxu1 %v1886_v59 }
 0x8c4   : > { %5851 = vmatpush3.bf16.xpose.msk.msra.mxu1 %vm6812_vm4, %v6816_v12  ;;  %4971 = vmatprep.mubr.msk.f32.mxu1 %vm6482_vm3, %v8378_v8 }
 0x8c5   : > { %5852 = vmatprep.subr.bf16.mxu1 %v8377_v33 }
 0x8cc   : > { %5855 = vmatpush3.bf16.xpose.msk.msra.mxu1 %vm6812_vm4, %v6823_v16 }
 0x8cd   : > { %5856 = vmatprep.subr.bf16.mxu1 %v8377_v33 }
 0x8d4   : > { %5859 = vmatpush3.bf16.xpose.msk.msra.mxu1 %vm6812_vm4, %v6830_v24 }
 0x8d5   : > { %5860 = vmatprep.subr.bf16.mxu1 %v8377_v33 }
 0x8dc   : > { %5863 = vmatpush3.bf16.xpose.msk.msra.mxu1 %vm6812_vm4, %v6837_v32 }
 0x8dd   : > { %5876 = vmatprep.subr.bf16.mxu1 %v8377_v33 }
 0x996   : > { %v4193_v4 = vpop.f32.mrb[8].mxu1 }
 0x997   : > { %v4194_v40 = vpop.f32.mrb[9].mxu1 }
 0x998   : > { %v4195_v51 = vadd.f32 %v4194_v40, %v4193_v4 }
 0x99a   : > { %v1990_v59 = vadd.f32 %v4195_v51, %v7420_v7 }
 0x99c   : > { %v7723_v63 = vadd.f32 %v7719_v39, %v1990_v59  ;;  %v7732_v59 = vld [vmem:[%s8213_s6] sm:$0x1f] }
 0x99e   : > { %v1993_v24 = vsel %vm850_vm0, %v7723_v63, 0.0 }
 0x99f   : > { %1994 = vadd.xlane.f32.xlu1 %v1993_v24 }
 0xa2c   : > { %v1995_v32 = vpop.xlane.xlu1 %1994 }
 0xa2d   : > { %v1996_v16 = vmul.f32 0.015625, %v1995_v32 }
 0xa2f   : > { %v1997_v10 = vsub.f32 %v7723_v63, %v1996_v16  ;;  %v7738_v16 = vld [vmem:[%s8213_s6 + $0x8] sm:$0x1f] }
 0xa31   : > { %v1998_v12 = vmul.f32 %v1997_v10, %v1997_v10 }
 0xa33   : > { %v1999_v4 = vsel %vm850_vm0, %v1998_v12, 0.0 }
 0xa34   : > { %2000 = vadd.xlane.f32.xlu1 %v1999_v4 }
 0xac1   : > { %v2001_v40 = vpop.xlane.xlu1 %2000 }
 0xac2   : > { %v2002_v62 = vmul.f32 0.015625, %v2001_v40 }
 0xac4   : > { %v2003_v46 = vadd.f32 1e-05, %v2002_v62 }
 0xac6   : > { %6423 = vrsqrt.f32 %v2003_v46 }
 0xad0   : > { %v6424_v7 = vpop.eup %6423 }
 0xad1   : > { %v2005_v51 = vmul.f32 %v6424_v7, %v1997_v10 }
 0xad3   : > { %v2006_v24 = vmul.f32 %v7732_v59, %v2005_v51 }
 0xad5   : > { %v2007_v12 = vadd.f32 %v7738_v16, %v2006_v24 }
 0xad7   : > { %v2009_v32 = vmul.f32 %v2007_v12, %v6780_v22  ;;  %v2008_v46 = vmul.f32 %v2007_v12, %v6804_v50 }
 0xad9   : > { %2011 = vrot.lane.b32.xlu1 %v2009_v32, %s6484_s1 }
 0xb4b   : > { %v2012_v10 = vpop.permute.xlu1 %2011 }
 0xb4c   : > { %v2014_v62 = vsel %vm579_vm1, %v2008_v46, %v2012_v10 }
 0xb4d   : > { %4953 = vmatmul.mubr.f32.vlgmr.msra.gmra.mrb[16].mxu0 %v2014_v62 }
 0xb4e   : > { %5866 = vmatpush3.bf16.msra.mxu0 %v6852_v44  ;;  %4990 = vmatprep.mubr.msk.f32.mxu0 %vm6482_vm3, %v8378_v8 }
 0xb4f   : > { %5867 = vmatprep.subr.bf16.mxu0 %v8377_v33 }
 0xb52   : > { %5869 = vmatpush3.bf16.msra.mxu0 %v6856_v48 }
 0xb53   : > { %5870 = vmatprep.subr.bf16.mxu0 %v8377_v33 }
 0xb56   : > { %5872 = vmatpush3.bf16.msra.mxu0 %v6860_v52 }
 0xb57   : > { %5873 = vmatprep.subr.bf16.mxu0 %v8377_v33 }
 0xb5a   : > { %5875 = vmatpush3.bf16.msra.mxu0 %v6864_v57 }
 0xb5b   : > { %5924 = vmatprep.subr.bf16.mxu0 %v8377_v33 }
 0xc20   : > { %v2081_v4 = vpop.f32.mrb[16].mxu0 }
 0xc21   : > { %v4954_v40 = vpop.f32.mrb[17].mxu0  ;;  %4972 = vmatmul.mubr.msk.f32.vlgmr.msra.gmra.mrb[10].mxu1 %vm579_vm1, %v2081_v4 }
 0xc22   : > { %5878 = vmatpush3.bf16.msra.mxu1 %v6889_v61  ;;  %5025 = vmatprep.mubr.msk.f32.mxu1 %vm6482_vm3, %v8378_v8 }
 0xc23   : > { %5879 = vmatprep.subr.bf16.mxu1 %v8377_v33 }
 0xc26   : > { %5881 = vmatpush3.bf16.msra.mxu1 %v6909_v5 }
 0xc27   : > { %5882 = vmatprep.subr.bf16.mxu1 %v8377_v33 }
 0xc2a   : > { %5884 = vmatpush3.bf16.msra.mxu1 %v6929_v9 }
 0xc2b   : > { %5885 = vmatprep.subr.bf16.mxu1 %v8377_v33 }
 0xc2e   : > { %5887 = vmatpush3.bf16.msra.mxu1 %v6949_v18 }
 0xc2f   : > { %5888 = vmatprep.subr.bf16.mxu1 %v8377_v33 }
 0xc32   : > { %5890 = vmatpush3.bf16.msra.mxu1 %v6969_v25 }
 0xc33   : > { %5891 = vmatprep.subr.bf16.mxu1 %v8377_v33 }
 0xc36   : > { %5893 = vmatpush3.bf16.msra.mxu1 %v6989_v29 }
 0xc37   : > { %5894 = vmatprep.subr.bf16.mxu1 %v8377_v33 }
 0xc3a   : > { %5896 = vmatpush3.bf16.msra.mxu1 %v7009_v55 }
 0xc3b   : > { %5897 = vmatprep.subr.bf16.mxu1 %v8377_v33 }
 0xc3e   : > { %5899 = vmatpush3.bf16.msra.mxu1 %v7029_v1 }
 0xc3f   : > { %5900 = vmatprep.subr.bf16.mxu1 %v8377_v33 }
 0xcf4   : > { %v2154_v7 = vpop.f32.mrb[10].mxu1 }
 0xcf5   : > { %v2158_v51 = vmul.f32 4.0, %v2154_v7  ;;  %v4973_v24 = vpop.f32.mrb[11].mxu1 }
 0xcf7   : > { %v2159_v12 = vsel %vm850_vm0, %v2158_v51, -inf }
 0xcf8   : > { %v2160_v32 = vrot.slane %v2159_v12, 4 }
 0xcfa   : > { %v2161_v46 = vmax.f32 %v2159_v12, %v2160_v32 }
 0xcfc   : > { %v2162_v10 = vrot.slane %v2161_v46, 2 }
 0xcfe   : > { %v2163_v62 = vmax.f32 %v2161_v46, %v2162_v10 }
 0xd00   : > { %v2164_v4 = vrot.slane %v2163_v62, 1 }
 0xd02   : > { %v2165_v40 = vmax.f32 %v2163_v62, %v2164_v4 }
 0xd04   : > { %v2166_v29 = vsub.f32 %v2158_v51, %v2165_v40 }
 0xd06   : > { %v2167_v25 = vmul.f32 1.442695, %v2166_v29 }
 0xd08   : > { %6425 = vpow2.f32 %v2167_v25 }
 0xd12   : > { %v6426_v55 = vpop.eup %6425 }
 0xd13   : > { %v2169_v18 = vsel %vm850_vm0, %v6426_v55, 0.0 }
 0xd14   : > { %v2170_v1 = vrot.slane %v2169_v18, 4 }
 0xd16   : > { %v2171_v9 = vadd.f32 %v2170_v1, %v2169_v18 }
 0xd18   : > { %v2172_v5 = vrot.slane %v2171_v9, 2 }
 0xd1a   : > { %v2173_v61 = vadd.f32 %v2172_v5, %v2171_v9 }
 0xd1c   : > { %v2174_v7 = vrot.slane %v2173_v61, 1 }
 0xd1e   : > { %v2175_v24 = vadd.f32 %v2174_v7, %v2173_v61 }
 0xd20   : > { %6427 = vrcp.f32 %v2175_v24 }
 0xd2a   : > { %v6428_v57 = vpop.eup %6427 }
 0xd2b   : > { %v2177_v52 = vmul.f32 %v6428_v57, %v6426_v55 }
 0xd2d   : > { %v2178_v12 = vadd.f32 1e-08, %v2177_v52 }
 0xd2f   : > { %v2179_v32 = vmul.f32 %v2178_v12, %v6804_v50  ;;  %v2187_v46 = vmul.f32 %v2178_v12, %v6780_v22 }
 0xd31   : > { %v2180_v29 = vsel %vm850_vm0, %v2179_v32, 0.0  ;;  %v2188_v25 = vsel %vm850_vm0, %v2187_v46, 0.0 }
 0xd32   : > { %v2181_v51 = vrot.slane %v2180_v29, 4  ;;  %v2189_v10 = vrot.slane %v2188_v25, 4 }
 0xd34   : > { %v2182_v62 = vadd.f32 %v2181_v51, %v2180_v29  ;;  %v2190_v18 = vadd.f32 %v2189_v10, %v2188_v25  ;;  %v2279_v29 = vmul.f32 %v7723_v63, %v6780_v22 }
 0xd36   : > { %v2183_v1 = vrot.slane %v2182_v62, 2  ;;  %v2191_v5 = vrot.slane %v2190_v18, 2 }
 0xd38   : > { %v2184_v9 = vadd.f32 %v2183_v1, %v2182_v62  ;;  %v2192_v61 = vadd.f32 %v2191_v5, %v2190_v18  ;;  %v8422_v62 = vld [vmem:[#allocation18_spill] sm:$0xff]  ;;  %v8423_v18 = vld [vmem:[#allocation19_spill] sm:$0xff]  ;;  %v8424_v1 = vld [vmem:[#allocation20_spill] sm:$0xff] }
 0xd39   : > { %v8425_v5 = vld [vmem:[#allocation21_spill] sm:$0xff] }
 0xd3a   : > { %v2185_v4 = vrot.slane %v2184_v9, 1  ;;  %v2193_v40 = vrot.slane %v2192_v61, 1 }
 0xd3c   : > { %v2186_v57 = vadd.f32 %v2185_v4, %v2184_v9  ;;  %v2194_v52 = vadd.f32 %v2193_v40, %v2192_v61  ;;  %v8426_v9 = vld [vmem:[#allocation22_spill] sm:$0xff]  ;;  %v8427_v61 = vld [vmem:[#allocation23_spill] sm:$0xff]  ;;  %v8428_v4 = vld [vmem:[#allocation24_spill] sm:$0xff] }
 0xd3e   : > { %v2195_v55 = vsel %vm1107_vm5, %v2186_v57, %v2194_v52  ;;  %v2278_v57 = vmul.f32 %v7723_v63, %v6804_v50  ;;  %v8429_v52 = vld [vmem:[#allocation25_spill] sm:$0xff] }
 0xd3f   : > { %6429 = vrcp.f32 %v2195_v55  ;;  %v8430_v55 = vld [vmem:[#allocation26_spill] sm:$0xff] }
 0xd49   : > { %v6430_v7 = vpop.eup %6429 }
 0xd4a   : > { %v2197_v24 = vmul.f32 %v6430_v7, %v2178_v12 }
 0xd4c   : > { %4991 = vmatmul.mubr.msk.f32.vlgmr.msra.gmra.mrb[18].mxu0 %vm579_vm1, %v2197_v24  ;;  %v8431_v24 = vld [vmem:[#allocation27_spill] sm:$0xff] }
 0xd4d   : > { %5926 = vmatpush3.bf16.msra.mxu0 %v6900_v3  ;;  %5095 = vmatprep.mubr.msk.f32.mxu0 %vm6482_vm3, %v8378_v8 }
 0xd4e   : > { %5927 = vmatprep.subr.bf16.mxu0 %v8377_v33 }
 0xd51   : > { %5929 = vmatpush3.bf16.msra.mxu0 %v6913_v6 }
 0xd52   : > { %5930 = vmatprep.subr.bf16.mxu0 %v8377_v33 }
 0xd55   : > { %5932 = vmatpush3.bf16.msra.mxu0 %v6933_v11 }
 0xd56   : > { %5933 = vmatprep.subr.bf16.mxu0 %v8377_v33 }
 0xd59   : > { %5935 = vmatpush3.bf16.msra.mxu0 %v6953_v21 }
 0xd5a   : > { %5936 = vmatprep.subr.bf16.mxu0 %v8377_v33 }
 0xd5d   : > { %5938 = vmatpush3.bf16.msra.mxu0 %v6973_v36 }
 0xd5e   : > { %5939 = vmatprep.subr.bf16.mxu0 %v8377_v33 }
 0xd61   : > { %5941 = vmatpush3.bf16.msra.mxu0 %v6993_v47 }
 0xd62   : > { %5942 = vmatprep.subr.bf16.mxu0 %v8377_v33 }
 0xd65   : > { %5944 = vmatpush3.bf16.msra.mxu0 %v7013_v56 }
 0xd66   : > { %5945 = vmatprep.subr.bf16.mxu0 %v8377_v33 }
 0xd69   : > { %5947 = vmatpush3.bf16.msra.mxu0 %v7033_v2 }
 0xd6a   : > { %5948 = vmatprep.subr.bf16.mxu0 %v8377_v33 }
 0xe1f   : > { %v2267_v12 = vpop.f32.mrb[18].mxu0 }
 0xe20   : > { %v2272_v32 = vmul.f32 %v2267_v12, %v6780_v22  ;;  %v4992_v46 = vpop.f32.mrb[19].mxu0  ;;  %v2271_v25 = vmul.f32 %v2267_v12, %v6804_v50  ;;  %v8432_v12 = vld [vmem:[#allocation28_spill] sm:$0xff] }
 0xe21   : > { %v8434_v46 = vld [vmem:[#allocation30_spill] sm:$0xff] }
 0xe22   : > { %2274 = vrot.lane.b32.xlu0 %v2272_v32, %s6484_s1  ;;  %v8433_v32 = vld [vmem:[#allocation29_spill] sm:$0xff] }
 0xe26   : > { %2281 = vrot.lane.b32.xlu0 %v2279_v29, %s6484_s1  ;;  %v8435_v29 = vld [vmem:[#allocation31_spill] sm:$0xff] }
 0xe94   : > { %v2275_v51 = vpop.permute.xlu0 %2274 }
 0xe95   : > { %v7808_v10 = vsel %vm579_vm1, %v2271_v25, %v2275_v51  ;;  %v8436_v25 = vld [vmem:[#allocation32_spill] sm:$0xff]  ;;  %v8437_v51 = vld [vmem:[#allocation33_spill] sm:$0xff] }
 0xe96   : > { %5026 = vmatmul.mubr.f32.vlgmr.msra.gmra.mrb[12].mxu1 %v7808_v10  ;;  %5096 = vmatmul.mubr.f32.vlgmr.msra.gmra.mrb[20].mxu0 %v7808_v10 }
 0xe97   : > { %5902 = vmatpush3.bf16.msra.mxu1 %v7055_v15  ;;  %5950 = vmatpush3.bf16.msra.mxu0 %v7057_v17 }
 0xe98   : > { %5903 = vmatprep.subr.bf16.mxu1 %v8377_v33  ;;  %5951 = vmatprep.subr.bf16.mxu0 %v8377_v33  ;;  %v2282_v40 = vpop.permute.xlu0 %2281 }
 0xe99   : > { %5060 = vmatprep.mubr.msk.f32.mxu1 %vm6482_vm3, %v8378_v8  ;;  %5130 = vmatprep.mubr.msk.f32.mxu0 %vm6482_vm3, %v8378_v8  ;;  %v2284_v7 = vsel %vm579_vm1, %v2278_v57, %v2282_v40  ;;  %v8438_v40 = vld [vmem:[#allocation34_spill] sm:$0xff]  ;;  %v8439_v57 = vld [vmem:[#allocation35_spill] sm:$0xff] }
 0xe9b   : > { %5905 = vmatpush3.bf16.msra.mxu1 %v7078_v41  ;;  %5953 = vmatpush3.bf16.msra.mxu0 %v7080_v0 }
 0xe9c   : > { %5906 = vmatprep.subr.bf16.mxu1 %v8377_v33  ;;  %5954 = vmatprep.subr.bf16.mxu0 %v8377_v33 }
 0xe9f   : > { %5908 = vmatpush3.bf16.msra.mxu1 %v7102_v58  ;;  %5956 = vmatpush3.bf16.msra.mxu0 %v7104_v60 }
 0xea0   : > { %5909 = vmatprep.subr.bf16.mxu1 %v8377_v33  ;;  %5957 = vmatprep.subr.bf16.mxu0 %v8377_v33 }
 0xea3   : > { %5911 = vmatpush3.bf16.msra.mxu1 %v7122_v54  ;;  %5959 = vmatpush3.bf16.msra.mxu0 %v8422_v62 }
 0xea4   : > { %5912 = vmatprep.subr.bf16.mxu1 %v8377_v33  ;;  %5960 = vmatprep.subr.bf16.mxu0 %v8377_v33 }
 0xea7   : > { %5914 = vmatpush3.bf16.msra.mxu1 %v8423_v18  ;;  %5962 = vmatpush3.bf16.msra.mxu0 %v8424_v1 }
 0xea8   : > { %5915 = vmatprep.subr.bf16.mxu1 %v8377_v33  ;;  %5963 = vmatprep.subr.bf16.mxu0 %v8377_v33 }
 0xeab   : > { %5917 = vmatpush3.bf16.msra.mxu1 %v8425_v5  ;;  %5965 = vmatpush3.bf16.msra.mxu0 %v8426_v9 }
 0xeac   : > { %5918 = vmatprep.subr.bf16.mxu1 %v8377_v33  ;;  %5966 = vmatprep.subr.bf16.mxu0 %v8377_v33 }
 0xeaf   : > { %5920 = vmatpush3.bf16.msra.mxu1 %v8427_v61  ;;  %5968 = vmatpush3.bf16.msra.mxu0 %v8428_v4 }
 0xeb0   : > { %5921 = vmatprep.subr.bf16.mxu1 %v8377_v33  ;;  %5969 = vmatprep.subr.bf16.mxu0 %v8377_v33 }
 0xeb3   : > { %5923 = vmatpush3.bf16.msra.mxu1 %v8429_v52  ;;  %5971 = vmatpush3.bf16.msra.mxu0 %v8430_v55 }
 0xeb4   : > { %5972 = vmatprep.subr.bf16.mxu1 %v8377_v33  ;;  %5996 = vmatprep.subr.bf16.mxu0 %v8377_v33 }
 0xeb6   : > { %5061 = vmatmul.mubr.f32.vlgmr.msra.gmra.mrb[12].mxu1 %v2284_v7  ;;  %5131 = vmatmul.mubr.f32.vlgmr.msra.gmra.mrb[20].mxu0 %v2284_v7 }
 0xeb7   : > { %5974 = vmatpush3.bf16.msra.mxu1 %v8431_v24  ;;  %5998 = vmatpush3.bf16.msra.mxu0 %v8432_v12 }
 0xeb8   : > { %5975 = vmatprep.subr.bf16.mxu1 %v8377_v33  ;;  %5999 = vmatprep.subr.bf16.mxu0 %v8377_v33 }
 0xeb9   : > { %5165 = vmatprep.mubr.msk.f32.mxu1 %vm6482_vm3, %v8378_v8  ;;  %5200 = vmatprep.mubr.msk.f32.mxu0 %vm6482_vm3, %v8378_v8 }
 0xebb   : > { %5977 = vmatpush3.bf16.msra.mxu1 %v8433_v32  ;;  %6001 = vmatpush3.bf16.msra.mxu0 %v8434_v46  ;;  %v8440_v46 = vld [vmem:[#allocation36_spill] sm:$0xff] }
 0xebc   : > { %5978 = vmatprep.subr.bf16.mxu1 %v8377_v33  ;;  %6002 = vmatprep.subr.bf16.mxu0 %v8377_v33 }
 0xebf   : > { %5980 = vmatpush3.bf16.msra.mxu1 %v8435_v29  ;;  %6004 = vmatpush3.bf16.msra.mxu0 %v8436_v25  ;;  %v8441_v25 = vld [vmem:[#allocation37_spill] sm:$0xff]  ;;  %v8442_v29 = vld [vmem:[#allocation38_spill] sm:$0xff] }
 0xec0   : > { %5981 = vmatprep.subr.bf16.mxu1 %v8377_v33  ;;  %6005 = vmatprep.subr.bf16.mxu0 %v8377_v33 }
 0xec3   : > { %5983 = vmatpush3.bf16.msra.mxu1 %v8437_v51  ;;  %6007 = vmatpush3.bf16.msra.mxu0 %v8438_v40  ;;  %v8443_v40 = vld [vmem:[#allocation39_spill] sm:$0xff]  ;;  %v8444_v51 = vld [vmem:[#allocation40_spill] sm:$0xff] }
 0xec4   : > { %5984 = vmatprep.subr.bf16.mxu1 %v8377_v33  ;;  %6008 = vmatprep.subr.bf16.mxu0 %v8377_v33 }
 0xec7   : > { %5986 = vmatpush3.bf16.msra.mxu1 %v8439_v57  ;;  %6010 = vmatpush3.bf16.msra.mxu0 %v8440_v46  ;;  %v8445_v46 = vld [vmem:[#allocation41_spill] sm:$0xff]  ;;  %v8446_v57 = vld [vmem:[#allocation42_spill] sm:$0xff] }
 0xec8   : > { %5987 = vmatprep.subr.bf16.mxu1 %v8377_v33  ;;  %6011 = vmatprep.subr.bf16.mxu0 %v8377_v33 }
 0xecb   : > { %5989 = vmatpush3.bf16.msra.mxu1 %v8441_v25  ;;  %6013 = vmatpush3.bf16.msra.mxu0 %v8442_v29 }
 0xecc   : > { %5990 = vmatprep.subr.bf16.mxu1 %v8377_v33  ;;  %6014 = vmatprep.subr.bf16.mxu0 %v8377_v33 }
 0xecf   : > { %5992 = vmatpush3.bf16.msra.mxu1 %v8443_v40  ;;  %6016 = vmatpush3.bf16.msra.mxu0 %v8444_v51  ;;  %v8462_v40 = vld [vmem:[#allocation45_spill] sm:$0xff] }
 0xed0   : > { %5993 = vmatprep.subr.bf16.mxu1 %v8377_v33  ;;  %6017 = vmatprep.subr.bf16.mxu0 %v8377_v33 }
 0xed3   : > { %5995 = vmatpush3.bf16.msra.mxu1 %v8445_v46  ;;  %6019 = vmatpush3.bf16.msra.mxu0 %v8446_v57  ;;  %v8447_v46 = vld [vmem:[#allocation48_spill] sm:$0xff] }
 0xed4   : > { %6020 = vmatprep.subr.bf16.mxu1 %v8377_v33  ;;  %6045 = vmatprep.subr.bf16.mxu0 %v7519_v53  ;;  %v8451_v53 = vld [vmem:[#allocation50_spill] sm:$0xff] }
 0xed6   : > { %5166 = vmatmul.mubr.f32.vlgmr.msra.gmra.mrb[14].mxu1 %v7808_v10  ;;  %5201 = vmatmul.mubr.f32.vlgmr.msra.gmra.mrb[22].mxu0 %v2284_v7  ;;  %v8448_v10 = vld [vmem:[#allocation49_spill] sm:$0xff]  ;;  %v8449_v7 = vld [vmem:[#allocation62_spill] sm:$0xff] }
 0xed7   : > { %6022 = vmatpush3.bf16.msra.mxu1 %v7439_v34  ;;  %5235 = vmatprep.mubr.msk.f32.mxu1 %vm6482_vm3, %v8378_v8  ;;  %v8450_v34 = vld [vmem:[#allocation63_spill] sm:$0xff] }
 0xed8   : > { %6023 = vmatprep.subr.bf16.mxu1 %v8377_v33  ;;  %6047 = vmatpush3.bf16.msra.mxu0 %v7530_v13  ;;  %v8454_v13 = vld [vmem:[#allocation51_spill] sm:$0xff] }
 0xed9   : > { %6049 = vmatprep.subr.bf16.mxu0 %v7532_v14  ;;  %v8452_v14 = vld [vmem:[#allocation64_spill] sm:$0xff] }
 0xedb   : > { %6025 = vmatpush3.bf16.msra.mxu1 %v8447_v46  ;;  %v8453_v46 = vld [vmem:[#allocation65_spill] sm:$0xff] }
 0xedc   : > { %6026 = vmatprep.subr.bf16.mxu1 %v8377_v33  ;;  %6051 = vmatpush3.bf16.msra.mxu0 %v7554_v28  ;;  %v8457_v28 = vld [vmem:[#allocation52_spill] sm:$0xff] }
 0xedd   : > { %6053 = vmatprep.subr.bf16.mxu0 %v7562_v37  ;;  %v8455_v37 = vld [vmem:[#allocation66_spill] sm:$0xff] }
 0xedf   : > { %6028 = vmatpush3.bf16.msra.mxu1 %v8448_v10  ;;  %v8456_v10 = vld [vmem:[#allocation67_spill] sm:$0xff] }
 0xee0   : > { %6029 = vmatprep.subr.bf16.mxu1 %v8377_v33  ;;  %6055 = vmatpush3.bf16.msra.mxu0 %v8449_v7 }
 0xee1   : > { %6057 = vmatprep.subr.bf16.mxu0 %v8450_v34 }
 0xee3   : > { %6031 = vmatpush3.bf16.msra.mxu1 %v8451_v53  ;;  %v8458_v53 = vld [vmem:[#allocation53_spill] sm:$0xff] }
 0xee4   : > { %6032 = vmatprep.subr.bf16.mxu1 %v8377_v33  ;;  %6059 = vmatpush3.bf16.msra.mxu0 %v8452_v14  ;;  %v8461_v14 = vld [vmem:[#allocation44_spill] sm:$0xff] }
 0xee5   : > { %6061 = vmatprep.subr.bf16.mxu0 %v8453_v46 }
 0xee7   : > { %6034 = vmatpush3.bf16.msra.mxu1 %v8454_v13  ;;  %v8459_v13 = vld [vmem:[#allocation54_spill] sm:$0xff] }
 0xee8   : > { %6035 = vmatprep.subr.bf16.mxu1 %v8377_v33  ;;  %6063 = vmatpush3.bf16.msra.mxu0 %v8455_v37 }
 0xee9   : > { %6065 = vmatprep.subr.bf16.mxu0 %v8456_v10  ;;  %v8460_v10 = vld [vmem:[#allocation43_spill] sm:$0xff] }
 0xeeb   : > { %6037 = vmatpush3.bf16.msra.mxu1 %v8457_v28 }
 0xeec   : > { %6038 = vmatprep.subr.bf16.mxu1 %v8377_v33  ;;  %6067 = vmatpush3.bf16.msra.mxu0 %v7635_v45 }
 0xeed   : > { %6069 = vmatprep.subr.bf16.mxu0 %v7638_v19 }
 0xeef   : > { %6040 = vmatpush3.bf16.msra.mxu1 %v8458_v53 }
 0xef0   : > { %6041 = vmatprep.subr.bf16.mxu1 %v8377_v33  ;;  %6071 = vmatpush3.bf16.msra.mxu0 %v7653_v49 }
 0xef1   : > { %6073 = vmatprep.subr.bf16.mxu0 %v7656_v30 }
 0xef3   : > { %6043 = vmatpush3.bf16.msra.mxu1 %v8459_v13 }
 0xef4   : > { %6075 = vmatpush3.bf16.msra.mxu0 %v7665_v26  ;;  %6076 = vmatprep.subr.bf16.mxu1 %v8377_v33 }
 0xef5   : > { %6100 = vmatprep.subr.bf16.mxu0 %v8377_v33 }
 0xf89   : > { %v2421_v28 = vpop.f32.mrb[12].mxu1  ;;  %v2561_v45 = vpop.f32.mrb[20].mxu0 }
 0xf8a   : > { %v6333_v19 = vadd.f32 %v8460_v10, %v2421_v28  ;;  %v5062_v37 = vpop.f32.mrb[13].mxu1  ;;  %v5132_v53 = vpop.f32.mrb[21].mxu0  ;;  %v6335_v49 = vadd.f32 %v8461_v14, %v2561_v45 }
 0xf8b   : > { %v8463_v37 = vld [vmem:[#allocation46_spill] sm:$0xff] }
 0xf8c   : > { %v3975_v46 = vmul.f32 -1.442695, %v6333_v19  ;;  %v3976_v34 = vmul.f32 -1.442695, %v6335_v49 }
 0xf8e   : > { %6431 = vpow2.f32 %v3975_v46 }
 0xf8f   : > { %6433 = vpow2.f32 %v3976_v34 }
 0xf98   : > { %v6432_v30 = vpop.eup %6431 }
 0xf99   : > { %v2709_v13 = vadd.f32 1.0, %v6432_v30  ;;  %v6434_v26 = vpop.eup %6433 }
 0xf9a   : > { %v2716_v7 = vadd.f32 1.0, %v6434_v26 }
 0xf9b   : > { %6435 = vrcp.f32 %v2709_v13 }
 0xf9c   : > { %6437 = vrcp.f32 %v2716_v7 }
 0xfa5   : > { %v6436_v28 = vpop.eup %6435 }
 0xfa6   : > { %v6438_v45 = vpop.eup %6437 }
 0xfa7   : > { %v2722_v49 = vsub.f32 1.0, %v6438_v45  ;;  %v2724_v13 = vmul.f32 %v6438_v45, %v7723_v63  ;;  %v8465_v63 = vld [vmem:[#allocation60_spill] sm:$0xff] }
 0xfa9   : > { %v2631_v57 = vpop.f32.mrb[14].mxu1  ;;  %v2701_v51 = vpop.f32.mrb[22].mxu0 }
 0xfaa   : > { %v2702_v29 = vadd.f32 %v8462_v40, %v2701_v51  ;;  %v5167_v25 = vpop.f32.mrb[15].mxu1  ;;  %v5202_v32 = vpop.f32.mrb[23].mxu0  ;;  %v2632_v53 = vadd.f32 %v8463_v37, %v2631_v57 }
 0xfac   : > { %v2719_v19 = vmul.f32 %v6436_v28, %v2702_v29 }
 0xfae   : > { %v2720_v46 = vadd.f32 %v2719_v19, %v2632_v53  ;;  %v8464_v19 = vld [vmem:[#allocation58_spill] sm:$0xff] }
 0xfb0   : > { %6439 = vtanh.f32 %v2720_v46 }
 0xfba   : > { %v6440_v34 = vpop.eup %6439 }
 0xfbb   : > { %v2723_v30 = vmul.f32 %v6440_v34, %v2722_v49 }
 0xfbd   : > { %v2725_v26 = vadd.f32 %v2724_v13, %v2723_v30 }
 0xfbf   : > { %v2726_v14 = vsel %vm850_vm0, %v2725_v26, 0.0 }
 0xfc0   : > { %2727 = vadd.xlane.f32.xlu1 %v2726_v14 }
0x104d   : > { %v2728_v51 = vpop.xlane.xlu1 %2727 }
0x104e   : > { %v2729_v25 = vmul.f32 0.015625, %v2728_v51 }
0x1050   : > { %v2730_v32 = vsub.f32 %v2725_v26, %v2729_v25 }
0x1052   : > { %v2731_v40 = vmul.f32 %v2730_v32, %v2730_v32 }
0x1054   : > { %v2732_v7 = vsel %vm850_vm0, %v2731_v40, 0.0  ;;  %v8471_v40 = vld [vmem:[#allocation6_spill] sm:$0xff] }
0x1055   : > { %2733 = vadd.xlane.f32.xlu0 %v2732_v7  ;;  %v8472_v7 = vld [vmem:[#allocation7_spill] sm:$0xff] }
0x10e2   : > { %v2734_v29 = vpop.xlane.xlu0 %2733 }
0x10e3   : > { %v2735_v57 = vmul.f32 0.015625, %v2734_v29 }
0x10e5   : > { %v2736_v28 = vadd.f32 1e-05, %v2735_v57 }
0x10e7   : > { %6441 = vrsqrt.f32 %v2736_v28 }
0x10f1   : > { %v6442_v37 = vpop.eup %6441 }
0x10f2   : > { %v2738_v53 = vmul.f32 %v6442_v37, %v2730_v32  ;;  %v8477_v32 = vld [vmem:[#allocation12_spill] sm:$0xff] }
0x10f4   : > { %v2739_v46 = vmul.f32 %v2738_v53, %v8464_v19 }
0x10f6   : > { %v2740_v45 = vadd.f32 %v8465_v63, %v2739_v46 }
0x10f8   : > { %v2742_v49 = vmul.f32 %v2740_v45, %v6780_v22  ;;  %v2741_v14 = vmul.f32 %v2740_v45, %v6804_v50 }
0x10fa   : > { %2744 = vrot.lane.b32.xlu0 %v2742_v49, %s6484_s1 }
0x116c   : > { %v2745_v34 = vpop.permute.xlu0 %2744 }
0x116d   : > { %v2747_v30 = vsel %vm579_vm1, %v2741_v14, %v2745_v34 }
0x116e   : > { %5236 = vmatmul.mubr.f32.vlgmr.msra.gmra.mrb[16].mxu1 %v2747_v30 }
0x116f   : > { %6078 = vmatpush3.bf16.msra.mxu1 %v6695_v20  ;;  %5270 = vmatprep.mubr.msk.f32.mxu1 %vm6482_vm3, %v8378_v8  ;;  %v8466_v20 = vld [vmem:[#allocation2_spill] sm:$0xff] }
0x1170   : > { %6079 = vmatprep.subr.bf16.mxu1 %v8377_v33 }
0x1173   : > { %6081 = vmatpush3.bf16.msra.mxu1 %v6702_v23 }
0x1174   : > { %6082 = vmatprep.subr.bf16.mxu1 %v8377_v33 }
0x1177   : > { %6084 = vmatpush3.bf16.msra.mxu1 %v6712_v27  ;;  %v8467_v27 = vld [vmem:[#allocation73_spill] sm:$0xff] }
0x1178   : > { %6085 = vmatprep.subr.bf16.mxu1 %v8377_v33 }
0x117b   : > { %6087 = vmatpush3.bf16.msra.mxu1 %v6722_v31 }
0x117c   : > { %6088 = vmatprep.subr.bf16.mxu1 %v8377_v33 }
0x117f   : > { %6090 = vmatpush3.bf16.msra.mxu1 %v6732_v35 }
0x1180   : > { %6091 = vmatprep.subr.bf16.mxu1 %v8377_v33 }
0x1183   : > { %6093 = vmatpush3.bf16.msra.mxu1 %v6742_v38  ;;  %v8468_v38 = vld [vmem:[#allocation4_spill] sm:$0xff] }
0x1184   : > { %6094 = vmatprep.subr.bf16.mxu1 %v8377_v33 }
0x1187   : > { %6096 = vmatpush3.bf16.msra.mxu1 %v6752_v42  ;;  %v8470_v42 = vld [vmem:[#allocation5_spill] sm:$0xff] }
0x1188   : > { %6097 = vmatprep.subr.bf16.mxu1 %v8377_v33 }
0x118b   : > { %6099 = vmatpush3.bf16.msra.mxu1 %v8466_v20 }
0x118c   : > { %6116 = vmatprep.subr.bf16.mxu1 %v8377_v33 }
0x1241   : > { %v2814_v23 = vpop.f32.mrb[16].mxu1 }
0x1242   : > { %v2815_v31 = vadd.f32 %v2814_v23, %v8467_v27  ;;  %v5237_v13 = vpop.f32.mrb[17].mxu1 }
0x1244   : > { %v2818_v51 = vmax.f32 %v2815_v31, 0.0 }
0x1246   : > { %v2819_v35 = vmul.f32 %v2818_v51, %v6804_v50  ;;  %v2820_v25 = vmul.f32 %v2818_v51, %v6780_v22 }
0x1248   : > { %2885 = vmatprep.mubr.f32.mxu0 %v2820_v25 }
0x1249   : > { %2886 = vmatmul.mubr.f32.vlgmr.msra.gmra.mrb[24].mxu0 %v2819_v35 }
0x124a   : > { %6103 = vmatpush3.bf16.xpose.msk.msra.mxu0 %vm6812_vm4, %v8468_v38  ;;  %5289 = vmatprep.mubr.msk.f32.mxu0 %vm6482_vm3, %v8378_v8 }
0x124b   : > { %6104 = vmatprep.subr.bf16.mxu0 %v8377_v33 }
0x1252   : > { %6107 = vmatpush3.bf16.xpose.msk.msra.mxu0 %vm6812_vm4, %v8470_v42  ;;  %v8478_v42 = vld [vmem:[#allocation13_spill] sm:$0xff] }
0x1253   : > { %6108 = vmatprep.subr.bf16.mxu0 %v8377_v33 }
0x125a   : > { %6111 = vmatpush3.bf16.xpose.msk.msra.mxu0 %vm6812_vm4, %v8471_v40  ;;  %v8479_v40 = vld [vmem:[#allocation14_spill] sm:$0xff] }
0x125b   : > { %6112 = vmatprep.subr.bf16.mxu0 %v8377_v33 }
0x1262   : > { %6115 = vmatpush3.bf16.xpose.msk.msra.mxu0 %vm6812_vm4, %v8472_v7  ;;  %v8480_v7 = vld [vmem:[#allocation15_spill] sm:$0xff] }
0x1263   : > { %6128 = vmatprep.subr.bf16.mxu0 %v8377_v33 }
0x131c   : > { %v4382_v29 = vpop.f32.mrb[24].mxu0 }
0x131d   : > { %v4383_v57 = vpop.f32.mrb[25].mxu0 }
0x131e   : > { %v4384_v28 = vadd.f32 %v4383_v57, %v4382_v29  ;;  %v8481_v29 = vld [vmem:[#allocation16_spill] sm:$0xff]  ;;  %v8482_v57 = vld [vmem:[#allocation17_spill] sm:$0xff] }
0x1320   : > { %v2891_v37 = vadd.f32 %v4384_v28, %v2725_v26 }
0x1322   : > { %v7975_v53 = vadd.f32 %v2891_v37, %v7719_v39 }
0x1324   : > { %v2893_v19 = vsel %vm850_vm0, %v7975_v53, 0.0 }
0x1325   : > { %2894 = vadd.xlane.f32.xlu1 %v2893_v19 }
0x13b2   : > { %v2895_v46 = vpop.xlane.xlu1 %2894 }
0x13b3   : > { %v2896_v63 = vmul.f32 0.015625, %v2895_v46 }
0x13b5   : > { %v2897_v45 = vsub.f32 %v7975_v53, %v2896_v63 }
0x13b7   : > { %v2898_v49 = vmul.f32 %v2897_v45, %v2897_v45 }
0x13b9   : > { %v2899_v14 = vsel %vm850_vm0, %v2898_v49, 0.0 }
0x13ba   : > { %2900 = vadd.xlane.f32.xlu1 %v2899_v14 }
0x1447   : > { %v2901_v34 = vpop.xlane.xlu1 %2900 }
0x1448   : > { %v2902_v30 = vmul.f32 0.015625, %v2901_v34 }
0x144a   : > { %v2903_v20 = vadd.f32 1e-05, %v2902_v30 }
0x144c   : > { %6443 = vrsqrt.f32 %v2903_v20 }
0x1456   : > { %v6444_v26 = vpop.eup %6443 }
0x1457   : > { %v2905_v23 = vmul.f32 %v6444_v26, %v2897_v45 }
0x1459   : > { %v2906_v39 = vmul.f32 %v7732_v59, %v2905_v23  ;;  %v8473_v59 = vld [vmem:[#allocation8_spill] sm:$0xff] }
0x145b   : > { %v2907_v27 = vadd.f32 %v7738_v16, %v2906_v39  ;;  %v8474_v16 = vld [vmem:[#allocation9_spill] sm:$0xff] }
0x145d   : > { %v2909_v31 = vmul.f32 %v2907_v27, %v6780_v22  ;;  %v2908_v13 = vmul.f32 %v2907_v27, %v6804_v50 }
0x145f   : > { %2911 = vrot.lane.b32.xlu1 %v2909_v31, %s6484_s1 }
0x14d1   : > { %v2912_v51 = vpop.permute.xlu1 %2911 }
0x14d2   : > { %v2914_v35 = vsel %vm579_vm1, %v2908_v13, %v2912_v51 }
0x14d3   : > { %5271 = vmatmul.mubr.f32.vlgmr.msra.gmra.mrb[18].mxu1 %v2914_v35 }
0x14d4   : > { %6118 = vmatpush3.bf16.msra.mxu1 %v6852_v44  ;;  %5308 = vmatprep.mubr.msk.f32.mxu1 %vm6482_vm3, %v8378_v8  ;;  %v8475_v44 = vld [vmem:[#allocation10_spill] sm:$0xff] }
0x14d5   : > { %6119 = vmatprep.subr.bf16.mxu1 %v8377_v33 }
0x14d8   : > { %6121 = vmatpush3.bf16.msra.mxu1 %v6856_v48  ;;  %v8476_v48 = vld [vmem:[#allocation11_spill] sm:$0xff] }
0x14d9   : > { %6122 = vmatprep.subr.bf16.mxu1 %v8377_v33 }
0x14dc   : > { %6124 = vmatpush3.bf16.msra.mxu1 %v8473_v59 }
0x14dd   : > { %6125 = vmatprep.subr.bf16.mxu1 %v8377_v33 }
0x14e0   : > { %6127 = vmatpush3.bf16.msra.mxu1 %v8474_v16 }
0x14e1   : > { %6176 = vmatprep.subr.bf16.mxu1 %v8377_v33 }
0x15a6   : > { %v2981_v25 = vpop.f32.mrb[18].mxu1 }
0x15a7   : > { %v5272_v38 = vpop.f32.mrb[19].mxu1  ;;  %5290 = vmatmul.mubr.msk.f32.vlgmr.msra.gmra.mrb[26].mxu0 %vm579_vm1, %v2981_v25 }
0x15a8   : > { %6130 = vmatpush3.bf16.msra.mxu0 %v8475_v44  ;;  %5343 = vmatprep.mubr.msk.f32.mxu0 %vm6482_vm3, %v8378_v8 }
0x15a9   : > { %6131 = vmatprep.subr.bf16.mxu0 %v8377_v33 }
0x15ac   : > { %6133 = vmatpush3.bf16.msra.mxu0 %v8476_v48 }
0x15ad   : > { %6134 = vmatprep.subr.bf16.mxu0 %v8377_v33 }
0x15b0   : > { %6136 = vmatpush3.bf16.msra.mxu0 %v8477_v32 }
0x15b1   : > { %6137 = vmatprep.subr.bf16.mxu0 %v8377_v33 }
0x15b4   : > { %6139 = vmatpush3.bf16.msra.mxu0 %v8478_v42 }
0x15b5   : > { %6140 = vmatprep.subr.bf16.mxu0 %v8377_v33 }
0x15b8   : > { %6142 = vmatpush3.bf16.msra.mxu0 %v8479_v40 }
0x15b9   : > { %6143 = vmatprep.subr.bf16.mxu0 %v8377_v33 }
0x15bc   : > { %6145 = vmatpush3.bf16.msra.mxu0 %v8480_v7 }
0x15bd   : > { %6146 = vmatprep.subr.bf16.mxu0 %v8377_v33 }
0x15c0   : > { %6148 = vmatpush3.bf16.msra.mxu0 %v8481_v29 }
0x15c1   : > { %6149 = vmatprep.subr.bf16.mxu0 %v8377_v33 }
0x15c4   : > { %6151 = vmatpush3.bf16.msra.mxu0 %v8482_v57 }
0x15c5   : > { %6152 = vmatprep.subr.bf16.mxu0 %v8377_v33 }
0x167a   : > { %v3054_v28 = vpop.f32.mrb[26].mxu0 }
0x167b   : > { %v3058_v37 = vmul.f32 4.0, %v3054_v28  ;;  %v5291_v19 = vpop.f32.mrb[27].mxu0 }
0x167d   : > { %v3059_v46 = vsel %vm850_vm0, %v3058_v37, -inf }
0x167e   : > { %v3060_v63 = vrot.slane %v3059_v46, 4 }
0x1680   : > { %v3061_v45 = vmax.f32 %v3059_v46, %v3060_v63 }
0x1682   : > { %v3062_v49 = vrot.slane %v3061_v45, 2 }
0x1684   : > { %v3063_v14 = vmax.f32 %v3061_v45, %v3062_v49 }
0x1686   : > { %v3064_v34 = vrot.slane %v3063_v14, 1 }
0x1688   : > { %v3065_v30 = vmax.f32 %v3063_v14, %v3064_v34 }
0x168a   : > { %v3066_v20 = vsub.f32 %v3058_v37, %v3065_v30 }
0x168c   : > { %v3067_v26 = vmul.f32 1.442695, %v3066_v20 }
0x168e   : > { %6445 = vpow2.f32 %v3067_v26  ;;  %v8500_v26 = vld [vmem:[#allocation57_spill] sm:$0xff] }
0x1698   : > { %v6446_v23 = vpop.eup %6445 }
0x1699   : > { %v3069_v39 = vsel %vm850_vm0, %v6446_v23, 0.0 }
0x169a   : > { %v3070_v27 = vrot.slane %v3069_v39, 4 }
0x169c   : > { %v3071_v31 = vadd.f32 %v3070_v27, %v3069_v39  ;;  %v8502_v39 = vld [vmem:[#allocation59_spill] sm:$0xff]  ;;  %v8503_v27 = vld [vmem:[#allocation61_spill] sm:$0xff] }
0x169e   : > { %v3072_v13 = vrot.slane %v3071_v31, 2 }
0x16a0   : > { %v3073_v51 = vadd.f32 %v3072_v13, %v3071_v31  ;;  %v8504_v31 = vld [vmem:[#allocation49_spill] sm:$0xff]  ;;  %v8505_v13 = vld [vmem:[#allocation62_spill] sm:$0xff] }
0x16a2   : > { %v3074_v35 = vrot.slane %v3073_v51, 1 }
0x16a4   : > { %v3075_v59 = vadd.f32 %v3074_v35, %v3073_v51  ;;  %v8507_v51 = vld [vmem:[#allocation50_spill] sm:$0xff]  ;;  %v8508_v35 = vld [vmem:[#allocation64_spill] sm:$0xff] }
0x16a6   : > { %6447 = vrcp.f32 %v3075_v59  ;;  %v8509_v59 = vld [vmem:[#allocation65_spill] sm:$0xff] }
0x16b0   : > { %v6448_v16 = vpop.eup %6447 }
0x16b1   : > { %v3077_v25 = vmul.f32 %v6448_v16, %v6446_v23  ;;  %v8501_v23 = vld [vmem:[#allocation48_spill] sm:$0xff]  ;;  %v8510_v16 = vld [vmem:[#allocation51_spill] sm:$0xff] }
0x16b3   : > { %v8018_v38 = vadd.f32 1e-08, %v3077_v25  ;;  %v8511_v25 = vld [vmem:[#allocation66_spill] sm:$0xff] }
0x16b5   : > { %v3079_v44 = vmul.f32 %v8018_v38, %v6804_v50  ;;  %v3087_v48 = vmul.f32 %v8018_v38, %v6780_v22 }
0x16b7   : > { %v3080_v32 = vsel %vm850_vm0, %v3079_v44, 0.0  ;;  %v3088_v42 = vsel %vm850_vm0, %v3087_v48, 0.0  ;;  %v8512_v44 = vld [vmem:[#allocation67_spill] sm:$0xff]  ;;  %v8513_v48 = vld [vmem:[#allocation52_spill] sm:$0xff] }
0x16b8   : > { %v3081_v40 = vrot.slane %v3080_v32, 4  ;;  %v3089_v7 = vrot.slane %v3088_v42, 4 }
0x16ba   : > { %v3082_v29 = vadd.f32 %v3081_v40, %v3080_v32  ;;  %v3090_v57 = vadd.f32 %v3089_v7, %v3088_v42  ;;  %v8514_v32 = vld [vmem:[#allocation68_spill] sm:$0xff]  ;;  %v8515_v42 = vld [vmem:[#allocation69_spill] sm:$0xff]  ;;  %v8517_v7 = vld [vmem:[#allocation70_spill] sm:$0xff] }
0x16bb   : > { %v8516_v40 = vld [vmem:[#allocation53_spill] sm:$0xff] }
0x16bc   : > { %v3083_v28 = vrot.slane %v3082_v29, 2  ;;  %v3091_v37 = vrot.slane %v3090_v57, 2 }
0x16be   : > { %v3084_v19 = vadd.f32 %v3083_v28, %v3082_v29  ;;  %v3092_v46 = vadd.f32 %v3091_v37, %v3090_v57  ;;  %v8518_v29 = vld [vmem:[#allocation71_spill] sm:$0xff]  ;;  %v8519_v57 = vld [vmem:[#allocation54_spill] sm:$0xff]  ;;  %v8520_v28 = vld [vmem:[#allocation72_spill] sm:$0xff] }
0x16c0   : > { %v3085_v63 = vrot.slane %v3084_v19, 1  ;;  %v3093_v45 = vrot.slane %v3092_v46, 1 }
0x16c2   : > { %v3086_v49 = vadd.f32 %v3085_v63, %v3084_v19  ;;  %v3094_v14 = vadd.f32 %v3093_v45, %v3092_v46 }
0x16c4   : > { %v3095_v34 = vsel %vm1107_vm5, %v3086_v49, %v3094_v14  ;;  %v8521_v14 = vld [vmem:[#allocation44_spill] sm:$0xff] }
0x16c5   : > { %6449 = vrcp.f32 %v3095_v34 }
0x16cf   : > { %v6450_v30 = vpop.eup %6449 }
0x16d0   : > { %v3097_v20 = vmul.f32 %v6450_v30, %v8018_v38 }
0x16d2   : > { %5309 = vmatmul.mubr.msk.f32.vlgmr.msra.gmra.mrb[20].mxu1 %vm579_vm1, %v3097_v20 }
0x16d3   : > { %6178 = vmatpush3.bf16.msra.mxu1 %v6900_v3  ;;  %5413 = vmatprep.mubr.msk.f32.mxu1 %vm6482_vm3, %v8378_v8 }
0x16d4   : > { %6179 = vmatprep.subr.bf16.mxu1 %v8377_v33 }
0x16d7   : > { %6181 = vmatpush3.bf16.msra.mxu1 %v6913_v6 }
0x16d8   : > { %6182 = vmatprep.subr.bf16.mxu1 %v8377_v33 }
0x16db   : > { %6184 = vmatpush3.bf16.msra.mxu1 %v6933_v11  ;;  %v3179_v11 = vmul.f32 %v7975_v53, %v6780_v22 }
0x16dc   : > { %6185 = vmatprep.subr.bf16.mxu1 %v8377_v33 }
0x16df   : > { %6187 = vmatpush3.bf16.msra.mxu1 %v6953_v21 }
0x16e0   : > { %6188 = vmatprep.subr.bf16.mxu1 %v8377_v33 }
0x16e3   : > { %6190 = vmatpush3.bf16.msra.mxu1 %v6973_v36 }
0x16e4   : > { %6191 = vmatprep.subr.bf16.mxu1 %v8377_v33 }
0x16e7   : > { %6193 = vmatpush3.bf16.msra.mxu1 %v6993_v47 }
0x16e8   : > { %6194 = vmatprep.subr.bf16.mxu1 %v8377_v33 }
0x16eb   : > { %6196 = vmatpush3.bf16.msra.mxu1 %v7013_v56 }
0x16ec   : > { %6197 = vmatprep.subr.bf16.mxu1 %v8377_v33 }
0x16ef   : > { %6199 = vmatpush3.bf16.msra.mxu1 %v7033_v2  ;;  %v3178_v2 = vmul.f32 %v7975_v53, %v6804_v50 }
0x16f0   : > { %6200 = vmatprep.subr.bf16.mxu1 %v8377_v33 }
0x17a5   : > { %v3167_v43 = vpop.f32.mrb[20].mxu1 }
0x17a6   : > { %v3172_v3 = vmul.f32 %v3167_v43, %v6780_v22  ;;  %v5310_v6 = vpop.f32.mrb[21].mxu1  ;;  %v3171_v21 = vmul.f32 %v3167_v43, %v6804_v50 }
0x17a8   : > { %3174 = vrot.lane.b32.xlu0 %v3172_v3, %s6484_s1 }
0x17ac   : > { %3181 = vrot.lane.b32.xlu0 %v3179_v11, %s6484_s1 }
0x181a   : > { %v3175_v36 = vpop.permute.xlu0 %3174 }
0x181b   : > { %v8055_v47 = vsel %vm579_vm1, %v3171_v21, %v3175_v36  ;;  %v6466_v21 = vld [vmem:[%s8218_s11 + $0x10] sm:$0x1f] }
0x181c   : > { %5344 = vmatmul.mubr.f32.vlgmr.msra.gmra.mrb[28].mxu0 %v8055_v47  ;;  %5414 = vmatmul.mubr.f32.vlgmr.msra.gmra.mrb[22].mxu1 %v8055_v47 }
0x181d   : > { %6154 = vmatpush3.bf16.msra.mxu0 %v7055_v15  ;;  %6202 = vmatpush3.bf16.msra.mxu1 %v7057_v17  ;;  %v8483_v17 = vld [vmem:[#allocation29_spill] sm:$0xff] }
0x181e   : > { %6155 = vmatprep.subr.bf16.mxu0 %v8377_v33  ;;  %6203 = vmatprep.subr.bf16.mxu1 %v8377_v33  ;;  %v3182_v56 = vpop.permute.xlu0 %3181 }
0x181f   : > { %5378 = vmatprep.mubr.msk.f32.mxu0 %vm6482_vm3, %v8378_v8  ;;  %5448 = vmatprep.mubr.msk.f32.mxu1 %vm6482_vm3, %v8378_v8  ;;  %v3184_v15 = vsel %vm579_vm1, %v3178_v2, %v3182_v56  ;;  %v6467_v2 = vld [vmem:[%s8217_s10 + $0x10] sm:$0x1f] }
0x1821   : > { %6157 = vmatpush3.bf16.msra.mxu0 %v7078_v41  ;;  %6205 = vmatpush3.bf16.msra.mxu1 %v7080_v0  ;;  %v8484_v41 = vld [vmem:[#allocation30_spill] sm:$0xff]  ;;  %v8485_v0 = vld [vmem:[#allocation31_spill] sm:$0xff] }
0x1822   : > { %6158 = vmatprep.subr.bf16.mxu0 %v8377_v33  ;;  %6206 = vmatprep.subr.bf16.mxu1 %v8377_v33 }
0x1825   : > { %6160 = vmatpush3.bf16.msra.mxu0 %v7102_v58  ;;  %6208 = vmatpush3.bf16.msra.mxu1 %v7104_v60  ;;  %v8486_v58 = vld [vmem:[#allocation32_spill] sm:$0xff]  ;;  %v8487_v60 = vld [vmem:[#allocation33_spill] sm:$0xff] }
0x1826   : > { %6161 = vmatprep.subr.bf16.mxu0 %v8377_v33  ;;  %6209 = vmatprep.subr.bf16.mxu1 %v8377_v33 }
0x1829   : > { %6163 = vmatpush3.bf16.msra.mxu0 %v7122_v54  ;;  %6211 = vmatpush3.bf16.msra.mxu1 %v8422_v62  ;;  %v8488_v54 = vld [vmem:[#allocation34_spill] sm:$0xff]  ;;  %v8489_v62 = vld [vmem:[#allocation35_spill] sm:$0xff] }
0x182a   : > { %6164 = vmatprep.subr.bf16.mxu0 %v8377_v33  ;;  %6212 = vmatprep.subr.bf16.mxu1 %v8377_v33 }
0x182d   : > { %6166 = vmatpush3.bf16.msra.mxu0 %v8423_v18  ;;  %6214 = vmatpush3.bf16.msra.mxu1 %v8424_v1  ;;  %v8490_v18 = vld [vmem:[#allocation36_spill] sm:$0xff]  ;;  %v8491_v1 = vld [vmem:[#allocation37_spill] sm:$0xff] }
0x182e   : > { %6167 = vmatprep.subr.bf16.mxu0 %v8377_v33  ;;  %6215 = vmatprep.subr.bf16.mxu1 %v8377_v33 }
0x1831   : > { %6169 = vmatpush3.bf16.msra.mxu0 %v8425_v5  ;;  %6217 = vmatpush3.bf16.msra.mxu1 %v8426_v9  ;;  %v8492_v5 = vld [vmem:[#allocation38_spill] sm:$0xff]  ;;  %v8493_v9 = vld [vmem:[#allocation39_spill] sm:$0xff] }
0x1832   : > { %6170 = vmatprep.subr.bf16.mxu0 %v8377_v33  ;;  %6218 = vmatprep.subr.bf16.mxu1 %v8377_v33 }
0x1835   : > { %6172 = vmatpush3.bf16.msra.mxu0 %v8427_v61  ;;  %6220 = vmatpush3.bf16.msra.mxu1 %v8428_v4  ;;  %v8494_v61 = vld [vmem:[#allocation40_spill] sm:$0xff]  ;;  %v8495_v4 = vld [vmem:[#allocation41_spill] sm:$0xff] }
0x1836   : > { %6173 = vmatprep.subr.bf16.mxu0 %v8377_v33  ;;  %6221 = vmatprep.subr.bf16.mxu1 %v8377_v33 }
0x1839   : > { %6175 = vmatpush3.bf16.msra.mxu0 %v8429_v52  ;;  %6223 = vmatpush3.bf16.msra.mxu1 %v8430_v55  ;;  %v8496_v52 = vld [vmem:[#allocation42_spill] sm:$0xff]  ;;  %v8497_v55 = vld [vmem:[#allocation55_spill] sm:$0xff] }
0x183a   : > { %6224 = vmatprep.subr.bf16.mxu0 %v8377_v33  ;;  %6248 = vmatprep.subr.bf16.mxu1 %v8377_v33 }
0x183c   : > { %5379 = vmatmul.mubr.f32.vlgmr.msra.gmra.mrb[28].mxu0 %v3184_v15  ;;  %5449 = vmatmul.mubr.f32.vlgmr.msra.gmra.mrb[22].mxu1 %v3184_v15 }
0x183d   : > { %6226 = vmatpush3.bf16.msra.mxu0 %v8431_v24  ;;  %6250 = vmatpush3.bf16.msra.mxu1 %v8432_v12  ;;  %v8498_v24 = vld [vmem:[#allocation47_spill] sm:$0xff]  ;;  %v8499_v12 = vld [vmem:[#allocation56_spill] sm:$0xff] }
0x183e   : > { %6227 = vmatprep.subr.bf16.mxu0 %v8377_v33  ;;  %6251 = vmatprep.subr.bf16.mxu1 %v8377_v33 }
0x183f   : > { %5483 = vmatprep.mubr.msk.f32.mxu0 %vm6482_vm3, %v8378_v8  ;;  %5518 = vmatprep.mubr.msk.f32.mxu1 %vm6482_vm3, %v8378_v8 }
0x1841   : > { %6229 = vmatpush3.bf16.msra.mxu0 %v8483_v17  ;;  %6253 = vmatpush3.bf16.msra.mxu1 %v8484_v41 }
0x1842   : > { %6230 = vmatprep.subr.bf16.mxu0 %v8377_v33  ;;  %6254 = vmatprep.subr.bf16.mxu1 %v8377_v33 }
0x1845   : > { %6232 = vmatpush3.bf16.msra.mxu0 %v8485_v0  ;;  %6256 = vmatpush3.bf16.msra.mxu1 %v8486_v58 }
0x1846   : > { %6233 = vmatprep.subr.bf16.mxu0 %v8377_v33  ;;  %6257 = vmatprep.subr.bf16.mxu1 %v8377_v33 }
0x1849   : > { %6235 = vmatpush3.bf16.msra.mxu0 %v8487_v60  ;;  %6259 = vmatpush3.bf16.msra.mxu1 %v8488_v54 }
0x184a   : > { %6236 = vmatprep.subr.bf16.mxu0 %v8377_v33  ;;  %6260 = vmatprep.subr.bf16.mxu1 %v8377_v33 }
0x184d   : > { %6238 = vmatpush3.bf16.msra.mxu0 %v8489_v62  ;;  %6262 = vmatpush3.bf16.msra.mxu1 %v8490_v18 }
0x184e   : > { %6239 = vmatprep.subr.bf16.mxu0 %v8377_v33  ;;  %6263 = vmatprep.subr.bf16.mxu1 %v8377_v33 }
0x1851   : > { %6241 = vmatpush3.bf16.msra.mxu0 %v8491_v1  ;;  %6265 = vmatpush3.bf16.msra.mxu1 %v8492_v5 }
0x1852   : > { %6242 = vmatprep.subr.bf16.mxu0 %v8377_v33  ;;  %6266 = vmatprep.subr.bf16.mxu1 %v8377_v33 }
0x1855   : > { %6244 = vmatpush3.bf16.msra.mxu0 %v8493_v9  ;;  %6268 = vmatpush3.bf16.msra.mxu1 %v8494_v61 }
0x1856   : > { %6245 = vmatprep.subr.bf16.mxu0 %v8377_v33  ;;  %6269 = vmatprep.subr.bf16.mxu1 %v8377_v33 }
0x1859   : > { %6247 = vmatpush3.bf16.msra.mxu0 %v8495_v4  ;;  %6271 = vmatpush3.bf16.msra.mxu1 %v8496_v52 }
0x185a   : > { %6272 = vmatprep.subr.bf16.mxu0 %v8377_v33  ;;  %6297 = vmatprep.subr.bf16.mxu1 %v8497_v55 }
0x185c   : > { %5484 = vmatmul.mubr.f32.vlgmr.msra.gmra.mrb[30].mxu0 %v8055_v47  ;;  %5519 = vmatmul.mubr.f32.vlgmr.msra.gmra.mrb[24].mxu1 %v3184_v15 }
0x185d   : > { %6274 = vmatpush3.bf16.msra.mxu0 %v8498_v24  ;;  %5553 = vmatprep.mubr.msk.f32.mxu0 %vm6482_vm3, %v8378_v8  ;;  %v8506_v8 = vld [vmem:[#allocation63_spill] sm:$0xff] }
0x185e   : > { %6275 = vmatprep.subr.bf16.mxu0 %v8377_v33  ;;  %6299 = vmatpush3.bf16.msra.mxu1 %v8499_v12 }
0x185f   : > { %6301 = vmatprep.subr.bf16.mxu1 %v8500_v26 }
0x1861   : > { %6277 = vmatpush3.bf16.msra.mxu0 %v8501_v23  ;;  %v6468_v23 = vld [vmem:[%s8219_s12] sm:$0x1f] }
0x1862   : > { %6278 = vmatprep.subr.bf16.mxu0 %v8377_v33  ;;  %6303 = vmatpush3.bf16.msra.mxu1 %v8502_v39 }
0x1863   : > { %6305 = vmatprep.subr.bf16.mxu1 %v8503_v27 }
0x1865   : > { %6280 = vmatpush3.bf16.msra.mxu0 %v8504_v31 }
0x1866   : > { %6281 = vmatprep.subr.bf16.mxu0 %v8377_v33  ;;  %6307 = vmatpush3.bf16.msra.mxu1 %v8505_v13 }
0x1867   : > { %6309 = vmatprep.subr.bf16.mxu1 %v8506_v8 }
0x1869   : > { %6283 = vmatpush3.bf16.msra.mxu0 %v8507_v51 }
0x186a   : > { %6284 = vmatprep.subr.bf16.mxu0 %v8377_v33  ;;  %6311 = vmatpush3.bf16.msra.mxu1 %v8508_v35 }
0x186b   : > { %6313 = vmatprep.subr.bf16.mxu1 %v8509_v59  ;;  %v6470_v59 = vld [vmem:[%s8221_s14] sm:$0x1f] }
0x186d   : > { %6286 = vmatpush3.bf16.msra.mxu0 %v8510_v16 }
0x186e   : > { %6287 = vmatprep.subr.bf16.mxu0 %v8377_v33  ;;  %6315 = vmatpush3.bf16.msra.mxu1 %v8511_v25 }
0x186f   : > { %6317 = vmatprep.subr.bf16.mxu1 %v8512_v44 }
0x1871   : > { %6289 = vmatpush3.bf16.msra.mxu0 %v8513_v48 }
0x1872   : > { %6290 = vmatprep.subr.bf16.mxu0 %v8377_v33  ;;  %6319 = vmatpush3.bf16.msra.mxu1 %v8514_v32 }
0x1873   : > { %6321 = vmatprep.subr.bf16.mxu1 %v8515_v42 }
0x1875   : > { %6292 = vmatpush3.bf16.msra.mxu0 %v8516_v40 }
0x1876   : > { %6293 = vmatprep.subr.bf16.mxu0 %v8377_v33  ;;  %6323 = vmatpush3.bf16.msra.mxu1 %v8517_v7 }
0x1877   : > { %6325 = vmatprep.subr.bf16.mxu1 %v8518_v29 }
0x1879   : > { %6295 = vmatpush3.bf16.msra.mxu0 %v8519_v57  ;;  %v6471_v57 = vld [vmem:[%s8223_s16] sm:$0x1f] }
0x187a   : > { %6327 = vmatpush3.bf16.msra.mxu1 %v8520_v28 }
0x190f   : > { %v3321_v37 = vpop.f32.mrb[28].mxu0  ;;  %v3461_v19 = vpop.f32.mrb[22].mxu1 }
0x1910   : > { %v6337_v46 = vadd.f32 %v8460_v10, %v3321_v37  ;;  %v5380_v63 = vpop.f32.mrb[29].mxu0  ;;  %v5450_v45 = vpop.f32.mrb[23].mxu1  ;;  %v6339_v34 = vadd.f32 %v8521_v14, %v3461_v19 }
0x1912   : > { %v3987_v49 = vmul.f32 -1.442695, %v6337_v46  ;;  %v3988_v30 = vmul.f32 -1.442695, %v6339_v34 }
0x1914   : > { %6451 = vpow2.f32 %v3987_v49 }
0x1915   : > { %6453 = vpow2.f32 %v3988_v30 }
0x191e   : > { %v6452_v33 = vpop.eup %6451 }
0x191f   : > { %v3609_v20 = vadd.f32 1.0, %v6452_v33  ;;  %v6454_v43 = vpop.eup %6453 }
0x1920   : > { %v3616_v3 = vadd.f32 1.0, %v6454_v43 }
0x1921   : > { %6455 = vrcp.f32 %v3609_v20 }
0x1922   : > { %6457 = vrcp.f32 %v3616_v3 }
0x192b   : > { %v6456_v56 = vpop.eup %6455 }
0x192c   : > { %v6458_v0 = vpop.eup %6457 }
0x192d   : > { %v3622_v58 = vsub.f32 1.0, %v6458_v0  ;;  %v3624_v62 = vmul.f32 %v6458_v0, %v7975_v53 }
0x192f   : > { %v3531_v6 = vpop.f32.mrb[30].mxu0  ;;  %v3601_v11 = vpop.f32.mrb[24].mxu1 }
0x1930   : > { %v3602_v10 = vadd.f32 %v6466_v21, %v3601_v11  ;;  %v5485_v36 = vpop.f32.mrb[31].mxu0  ;;  %v5520_v47 = vpop.f32.mrb[25].mxu1  ;;  %v3532_v15 = vadd.f32 %v6467_v2, %v3531_v6 }
0x1932   : > { %v3619_v17 = vmul.f32 %v6456_v56, %v3602_v10 }
0x1934   : > { %v3620_v41 = vadd.f32 %v3619_v17, %v3532_v15 }
0x1936   : > { %6459 = vtanh.f32 %v3620_v41 }
0x1940   : > { %v6460_v60 = vpop.eup %6459 }
0x1941   : > { %v3623_v54 = vmul.f32 %v6460_v60, %v3622_v58 }
0x1943   : > { %v3625_v18 = vadd.f32 %v3624_v62, %v3623_v54 }
0x1945   : > { %v3626_v1 = vsel %vm850_vm0, %v3625_v18, 0.0 }
0x1946   : > { %3627 = vadd.xlane.f32.xlu1 %v3626_v1 }
0x1957   : > { %3794 = vrot.lane.b32.xlu1 %v8018_v38, %s6484_s1  ;;  %v6469_v38 = vld [vmem:[%s8219_s12 + $0x8] sm:$0x1f] }
0x19d3   : > { %v3628_v5 = vpop.xlane.xlu1 %3627 }
0x19d4   : > { %v3629_v9 = vmul.f32 0.015625, %v3628_v5 }
0x19d6   : > { %v3630_v61 = vsub.f32 %v3625_v18, %v3629_v9 }
0x19d7   : > { %v3795_v37 = vpop.permute.xlu1 %3794 }
0x19d8   : > { %v3631_v4 = vmul.f32 %v3630_v61, %v3630_v61 }
0x19da   : > { %v3632_v52 = vsel %vm850_vm0, %v3631_v4, 0.0 }
0x19db   : > { %3633 = vadd.xlane.f32.xlu0 %v3632_v52 }
0x1a68   : > { %v3634_v55 = vpop.xlane.xlu0 %3633 }
0x1a69   : > { %v3635_v24 = vmul.f32 0.015625, %v3634_v55 }
0x1a6b   : > { %v3636_v12 = vadd.f32 1e-05, %v3635_v24 }
0x1a6d   : > { %6461 = vrsqrt.f32 %v3636_v12 }
0x1a77   : > { %v6462_v26 = vpop.eup %6461 }
0x1a78   : > { %v3638_v53 = vmul.f32 %v6462_v26, %v3630_v61 }
0x1a7a   : > { %v3639_v39 = vmul.f32 %v6468_v23, %v3638_v53 }
0x1a7c   : > { %v3640_v27 = vadd.f32 %v6469_v38, %v3639_v39 }
0x1a7e   : > { %v3642_v31 = vmul.f32 %v3640_v27, %v6780_v22  ;;  %v3641_v13 = vmul.f32 %v3640_v27, %v6804_v50 }
0x1a80   : > { %3644 = vrot.lane.b32.xlu0 %v3642_v31, %s6484_s1 }
0x1af2   : > { %v3645_v8 = vpop.permute.xlu0 %3644 }
0x1af3   : > { %v3647_v51 = vsel %vm579_vm1, %v3641_v13, %v3645_v8 }
0x1af4   : > { %5554 = vmatmul.mubr.f32.vlgmr.msra.gmra.mrb[32].mxu0 %v3647_v51 }
0x1bc7   : > { %v3714_v35 = vpop.f32.mrb[32].mxu0 }
0x1bc8   : > { %v3715_v16 = vadd.f32 %v6470_v59, %v3714_v35  ;;  %v5555_v25 = vpop.f32.mrb[33].mxu0 }
0x1bca   : > { %v3718_v44 = vmax.f32 %v3715_v16, 0.0 }
0x1bcc   : > { %v3719_v48 = vmul.f32 %v3718_v44, %v6804_v50  ;;  %v3720_v32 = vmul.f32 %v3718_v44, %v6780_v22 }
0x1bce   : > { %3785 = vmatprep.mubr.f32.mxu1 %v3720_v32 }
0x1bcf   : > { %3786 = vmatmul.mubr.f32.vlgmr.msra.gmra.mrb[26].mxu1 %v3719_v48 }
0x1ca2   : > { %v4571_v42 = vpop.f32.mrb[26].mxu1 }
0x1ca3   : > { %v4572_v40 = vpop.f32.mrb[27].mxu1 }
0x1ca4   : > { %v4573_v7 = vadd.f32 %v4572_v40, %v4571_v42 }
0x1ca6   : > { %v3791_v29 = vadd.f32 %v4573_v7, %v3625_v18 }
0x1ca8   : > { %v3792_v28 = vadd.f32 %v6471_v57, %v3791_v29 }
0x1caa   : > { %v3797_v50 = vsel %vm579_vm1, %v3792_v28, %v3795_v37 }
0x1cab   : > { %3798 = vst [vmem:[%s565_s18] sm:$0x1f] %v3797_v50 }
0x1cac PF: > { %s27_s23 = sadd.s32 1, %s6478_s23  }
0x1cad   : > { %p24_p5 = scmp.ge.s32.totalorder %s27_s23, 4  }
0x1caf   :  { %26 = sbr.rel (!%p24_p5) target bundleno = 3 (0x3), region = 131 }

</bundles_post_ra>
